<compile_context>
chip_gen: v7x
topology: tpu7x:2x2x1
jax: 0.10.0
libtpu: 0.0.40
codegen_flags: <defaults>
</compile_context>

<pallas_src>
import jax
import jax.numpy as jnp
from jax.experimental import pallas as pl
from jax.experimental.pallas import tpu as pltpu


# Picker budget is sized for v7x (64 MiB physical VMEM per TC) so one code
# path is safe on v5e / v6e / v7x; the Mosaic scoped-VMEM limit is raised to
# match (defaults are only 16 MiB on v5e, 32 MiB on v6e/v7x).
_VMEM_TILE_BUDGET = 40 * 1024 * 1024
_VMEM_LIMIT_BYTES = 48 * 1024 * 1024


def _autoencoder_kernel(x_ref, w_enc_ref, w_dec_ref, hid_ref, out_ref):
    # x_ref:     (TB, C)
    # w_enc_ref: (C, H)   MXU-native (K, N) layout, VMEM-resident
    # w_dec_ref: (H, C)   MXU-native (K, N) layout, VMEM-resident
    x = x_ref[...]

    # Encoder matmul on MXU + ReLU on VPU.
    pre_h = jnp.dot(x, w_enc_ref[...], preferred_element_type=jnp.float32)
    h = jnp.maximum(pre_h, 0.0)
    hid_ref[...] = h.astype(hid_ref.dtype)

    # Decoder matmul on MXU + sigmoid.  exp goes to the EUP; the divide is
    # replaced by an EUP approximate reciprocal + one Newton step so the VALU
    # does not run a full division sequence per element.
    pre_o = jnp.dot(h.astype(w_dec_ref.dtype), w_dec_ref[...],
                    preferred_element_type=jnp.float32)
    denom = 1.0 + jnp.exp(-pre_o)
    r = pl.reciprocal(denom, approx=True)
    r = r * (2.0 - denom * r)          # one Newton step -> ~f32 accuracy
    out_ref[...] = r.astype(out_ref.dtype)


def _round_up(n, m):
    return -(-n // m) * m


def _pick_batch_tile(batch, capacity, hidden, itemsize,
                     vmem_budget=_VMEM_TILE_BUDGET):
    """Pick a sublane-aligned batch tile whose pipeline footprint fits VMEM.

    Accounting (per grid step):
      * both weights, counted TWICE each (Pallas double-buffers every input,
        even with a constant index_map),
      * x / hidden / decoded tiles, double-buffered by the pipeline.
    """
    weight_bytes = 2 * (2 * capacity * hidden) * itemsize    # 2x double-buffer

    def act_bytes(tb):
        return 2 * itemsize * tb * (2 * capacity + hidden)

    if weight_bytes + act_bytes(8) > vmem_budget:
        # TODO(synk): fall back to a K/N-tiled grid with a VMEM accumulator
        # when the weights alone do not fit; for now fail loudly.
        raise ValueError(
            f"Autoencoder weights ({weight_bytes / 2**20:.1f} MiB incl. "
            f"double-buffering) exceed the {vmem_budget / 2**20:.0f} MiB "
            "VMEM budget; capacity/multiplier too large for this kernel.")

    # Large tiles amortize MXU weight pushes (256x256 on v6e/v7x) and the
    # per-grid-step overhead; 512 rows is the sweet spot when the batch and
    # VMEM allow it.
    if batch >= 512:
        tb = 512
    else:
        tb = max(8, _round_up(batch, 8))
    while tb > 8 and weight_bytes + act_bytes(tb) > vmem_budget:
        tb = max(8, _round_up(tb // 2, 8))
    return tb


def prepare_autoencoder_params(w_enc, w_dec, *, compute_dtype=None):
    """One-time parameter prep, hoisted out of the per-call forward path.

    Transposes the weights ONCE into MXU-native (K, N) layout:
        w_enc_t : (C, H),  w_dec_t : (H, C)
    Optionally casts them to `compute_dtype` (e.g. jnp.bfloat16) for extra
    MXU / HBM throughput -- accuracy-gated, off by default.
    """
    H, C = w_enc.shape
    assert w_dec.shape == (C, H), (w_enc.shape, w_dec.shape)
    w_enc_t = jnp.transpose(w_enc)   # (C, H)
    w_dec_t = jnp.transpose(w_dec)   # (H, C)
    if compute_dtype is not None:
        w_enc_t = w_enc_t.astype(compute_dtype)
        w_dec_t = w_dec_t.astype(compute_dtype)
    return {"w_enc": w_enc, "w_enc_t": w_enc_t, "w_dec_t": w_dec_t}


def autoencoder_forward(x, params):
    """Mirrors Autoencoder.forward: returns [encoder_weight, output_encoder, output]."""
    shape = x.shape
    B = shape[0]
    x_flat = x.reshape(B, -1)

    w_enc_t = params["w_enc_t"]   # (C, H)
    w_dec_t = params["w_dec_t"]   # (H, C)
    C, H = w_enc_t.shape
    assert x_flat.shape[1] == C
    assert w_dec_t.shape == (H, C)

    compute_dtype = w_enc_t.dtype
    out_dtype = x.dtype
    x_flat = x_flat.astype(compute_dtype)

    itemsize = jnp.dtype(compute_dtype).itemsize
    tb = _pick_batch_tile(B, C, H, itemsize)

    # Pad batch to a multiple of the tile (padded rows discarded afterwards).
    padded_b = _round_up(B, tb)
    if padded_b != B:
        x_flat = jnp.pad(x_flat, ((0, padded_b - B), (0, 0)))
    grid_b = padded_b // tb

    cost = pl.CostEstimate(
        flops=4 * padded_b * C * H,                 # two matmuls
        transcendentals=padded_b * C,               # exp in the sigmoid
        bytes_accessed=itemsize * (padded_b * C     # x
                                   + 2 * C * H      # both weights
                                   + padded_b * H   # hidden out
                                   + padded_b * C), # decoded out
    )

    hidden, decoded = pl.pallas_call(
        _autoencoder_kernel,
        out_shape=(
            jax.ShapeDtypeStruct((padded_b, H), out_dtype),
            jax.ShapeDtypeStruct((padded_b, C), out_dtype),
        ),
        grid=(grid_b,),
        in_specs=[
            pl.BlockSpec((tb, C), lambda i: (i, 0)),   # batch-tiled x (pipelined)
            pl.BlockSpec((C, H), lambda i: (0, 0)),    # encoder weight, resident
            pl.BlockSpec((H, C), lambda i: (0, 0)),    # decoder weight, resident
        ],
        out_specs=(
            pl.BlockSpec((tb, H), lambda i: (i, 0)),
            pl.BlockSpec((tb, C), lambda i: (i, 0)),
        ),
        compiler_params=pltpu.CompilerParams(
            # Independent batch tiles -> shard across v7x's 2 TensorCores.
            dimension_semantics=("parallel",),
            # Keep the scoped-VMEM limit consistent with the tile picker.
            vmem_limit_bytes=_VMEM_LIMIT_BYTES,
        ),
        cost_estimate=cost,
    )(x_flat, w_enc_t, w_dec_t)

    hidden = hidden[:B]
    output = decoded[:B].reshape(shape)
    # Module returns [state_dict()['encoder.weight'], output_encoder, output]
    return [params["w_enc"], hidden, output]


def _init_linear_weight(key, out_features, in_features):
    # PyTorch nn.Linear default init: U(-1/sqrt(in_features), 1/sqrt(in_features))
    bound = 1.0 / jnp.sqrt(jnp.float32(in_features))
    return jax.random.uniform(
        key, (out_features, in_features), dtype=jnp.float32,
        minval=-bound, maxval=bound,
    )


def _reference_forward(x, w_enc, w_dec):
    shape = x.shape
    x_flat = x.reshape(shape[0], -1)
    h = jnp.maximum(x_flat @ w_enc.T, 0.0)
    o = jax.nn.sigmoid(h @ w_dec.T).reshape(shape)
    return [w_enc, h, o]


if __name__ == "__main__":
    # Small shapes: input (2, 4, 16, 16) -> capacity = 4*16*16 = 1024,
    # multiplier = 0.5 -> nb_neurons = 512. Both lane-aligned (multiples of 128).
    B, Cc, Hs, Ws = 2, 4, 16, 16
    capacity = Cc * Hs * Ws                   # 1024
    multiplier = 0.5
    nb_neurons = int(multiplier * capacity)   # 512

    key = jax.random.PRNGKey(0)
    k_x, k_enc, k_dec = jax.random.split(key, 3)

    x = jax.random.normal(k_x, (B, Cc, Hs, Ws), dtype=jnp.float32)
    w_enc = _init_linear_weight(k_enc, nb_neurons, capacity)   # (H, C)
    w_dec = _init_linear_weight(k_dec, capacity, nb_neurons)   # (C, H)

    # One-time prep (weight transpose hoisted out of the per-call path).
    params = prepare_autoencoder_params(w_enc, w_dec)

    enc_w, hidden, output = autoencoder_forward(x, params)
    jax.block_until_ready((enc_w, hidden, output))

    # Correctness check against pure-JAX reference.
    ref_w, ref_h, ref_o = _reference_forward(x, w_enc, w_dec)
    assert enc_w.shape == (nb_neurons, capacity)
    assert hidden.shape == (B, nb_neurons)
    assert output.shape == x.shape
    assert jnp.allclose(enc_w, ref_w)
    assert jnp.allclose(hidden, ref_h, atol=1e-5, rtol=1e-5)
    assert jnp.allclose(output, ref_o, atol=1e-5, rtol=1e-5)

    print("KERNEL_OK")
</pallas_src>

<mosaic_0001>
module attributes {stable_mosaic.version = 11 : i64} {
  func.func @_autoencoder_kernel(%arg0: i32, %arg1: memref<8x1024xf32, #tpu.memory_space<vmem>>, %arg2: memref<1024x512xf32, #tpu.memory_space<vmem>>, %arg3: memref<512x1024xf32, #tpu.memory_space<vmem>>, %arg4: memref<8x512xf32, #tpu.memory_space<vmem>>, %arg5: memref<8x1024xf32, #tpu.memory_space<vmem>>) attributes {dimension_semantics = [#tpu.dimension_semantics<parallel>], iteration_bounds = array<i64: 1>, scalar_prefetch = 0 : i64, scratch_operands = 0 : i64, tpu.core_type = #tpu.core_type<tc>, window_params = [{transform_indices = @transform_0, window_bounds = array<i64: 8, 1024>}, {pipeline_mode = #tpu.pipeline_mode<synchronous>, transform_indices = @transform_1, window_bounds = array<i64: 1024, 512>}, {pipeline_mode = #tpu.pipeline_mode<synchronous>, transform_indices = @transform_2, window_bounds = array<i64: 512, 1024>}, {transform_indices = @transform_3, window_bounds = array<i64: 8, 512>}, {transform_indices = @transform_4, window_bounds = array<i64: 8, 1024>}]} {
    %c0 = arith.constant 0 : index
    %c0_0 = arith.constant 0 : index
    %0 = vector.load %arg1[%c0, %c0_0] : memref<8x1024xf32, #tpu.memory_space<vmem>>, vector<8x1024xf32>
    %c0_1 = arith.constant 0 : index
    %c0_2 = arith.constant 0 : index
    %1 = vector.load %arg2[%c0_1, %c0_2] : memref<1024x512xf32, #tpu.memory_space<vmem>>, vector<1024x512xf32>
    %cst = arith.constant dense<0.000000e+00> : vector<8x512xf32>
    %2 = tpu.matmul %0, %1, %cst {dimension_numbers = #tpu.dot_dimension_numbers<[1], [0], [0], [1], [0, 0, 1, 1], [], []>} : vector<8x1024xf32>, vector<1024x512xf32>, vector<8x512xf32> -> vector<8x512xf32>
    %cst_3 = arith.constant 0.000000e+00 : f32
    %3 = vector.broadcast %cst_3 : f32 to vector<8x512xf32>
    %4 = arith.maximumf %2, %3 : vector<8x512xf32>
    %c0_4 = arith.constant 0 : index
    %c0_5 = arith.constant 0 : index
    %5 = vector.load %arg4[%c0_4, %c0_5] : memref<8x512xf32, #tpu.memory_space<vmem>>, vector<8x512xf32>
    tpu.vector_store %arg4[%c0_4, %c0_5], %4 {strides = array<i32>} : memref<8x512xf32, #tpu.memory_space<vmem>>, vector<8x512xf32>,
    %c0_6 = arith.constant 0 : index
    %c0_7 = arith.constant 0 : index
    %6 = vector.load %arg3[%c0_6, %c0_7] : memref<512x1024xf32, #tpu.memory_space<vmem>>, vector<512x1024xf32>
    %cst_8 = arith.constant dense<0.000000e+00> : vector<8x1024xf32>
    %7 = tpu.matmul %4, %6, %cst_8 {dimension_numbers = #tpu.dot_dimension_numbers<[1], [0], [0], [1], [0, 0, 1, 1], [], []>} : vector<8x512xf32>, vector<512x1024xf32>, vector<8x1024xf32> -> vector<8x1024xf32>
    %cst_9 = arith.constant 0.000000e+00 : f32
    %8 = vector.broadcast %cst_9 : f32 to vector<8x1024xf32>
    %9 = arith.subf %8, %7 : vector<8x1024xf32>
    %10 = math.exp %9 : vector<8x1024xf32>
    %cst_10 = arith.constant 1.000000e+00 : f32
    %11 = vector.broadcast %cst_10 : f32 to vector<8x1024xf32>
    %12 = arith.addf %11, %10 : vector<8x1024xf32>
    %13 = tpu.reciprocal %12 {approx = true} : vector<8x1024xf32> -> vector<8x1024xf32>
    %14 = arith.mulf %12, %13 : vector<8x1024xf32>
    %cst_11 = arith.constant 2.000000e+00 : f32
    %15 = vector.broadcast %cst_11 : f32 to vector<8x1024xf32>
    %16 = arith.subf %15, %14 : vector<8x1024xf32>
    %17 = arith.mulf %13, %16 : vector<8x1024xf32>
    %c0_12 = arith.constant 0 : index
    %c0_13 = arith.constant 0 : index
    %18 = vector.load %arg5[%c0_12, %c0_13] : memref<8x1024xf32, #tpu.memory_space<vmem>>, vector<8x1024xf32>
    tpu.vector_store %arg5[%c0_12, %c0_13], %17 {strides = array<i32>} : memref<8x1024xf32, #tpu.memory_space<vmem>>, vector<8x1024xf32>,
    return
  }
  func.func @transform_0(%arg0: i32) -> (i32, i32) {
    %c0_i32 = arith.constant 0 : i32
    %c0_i32_0 = arith.constant 0 : i32
    return %arg0, %c0_i32 : i32, i32
  }
  func.func @transform_1(%arg0: i32) -> (i32, i32) {
    %c0_i32 = arith.constant 0 : i32
    %c0_i32_0 = arith.constant 0 : i32
    %c0_i32_1 = arith.constant 0 : i32
    return %c0_i32, %c0_i32_0 : i32, i32
  }
  func.func @transform_2(%arg0: i32) -> (i32, i32) {
    %c0_i32 = arith.constant 0 : i32
    %c0_i32_0 = arith.constant 0 : i32
    %c0_i32_1 = arith.constant 0 : i32
    return %c0_i32, %c0_i32_0 : i32, i32
  }
  func.func @transform_3(%arg0: i32) -> (i32, i32) {
    %c0_i32 = arith.constant 0 : i32
    %c0_i32_0 = arith.constant 0 : i32
    return %arg0, %c0_i32 : i32, i32
  }
  func.func @transform_4(%arg0: i32) -> (i32, i32) {
    %c0_i32 = arith.constant 0 : i32
    %c0_i32_0 = arith.constant 0 : i32
    return %arg0, %c0_i32 : i32, i32
  }
}

</mosaic_0001>

<bundles_post_ra>
// kernel: tpu_custom_call.1
= control target key start
LH: loop header
LB: loop body
LE: loop exit
PB: predicated region body
PF: predicated region fallthrough
CT: control target
= control target key end

     0   :  { %10 = vsyncpa [#allocation3], 0  ;;  %s3647_s0 = inlined_call_operand.hbm [shape: f32[8,1024], index: 0, kind: input, shape index: {}]   ;;  %s3648_s1 = inlined_call_operand.hbm [shape: f32[1024,512], index: 1, kind: input, shape index: {}]   ;;  %s3649_s2 = inlined_call_operand.hbm [shape: f32[512,1024], index: 2, kind: input, shape index: {}]   ;;  %s3650_s3 = inlined_call_operand.hbm [shape: f32[8,512], index: 3, kind: output, shape index: {0}]   ;;  %s3651_s4 = inlined_call_operand.hbm [shape: f32[8,1024], index: 4, kind: output, shape index: {1}]  }
   0x1   :  { %11 = vsyncpa [#allocation6], 0 }
   0x2   :  { %12 = vsyncpa [#allocation4], 0 }
   0x3   :  { %13 = vsyncpa [#allocation10], 0  ;;  %s3541_s15 = smov [#allocation5]   ;;  %s3423_s19 = scalar_lea.hbm %s3648_s1, 65536 }
   0x4   :  { %s29_s16 = sshll.u32 %s3541_s15, 4  ;;  %p3424_p0 = scmp.ne.s32.totalorder %s3648_s1, %s3423_s19  ;;  %s30_s16 = int_to_ptr.vmem [resolvable:$true] %s29_s16 }
   0x5   :  { %p3427_p1 = scmp.lt.u32.totalorder %s3423_s19, %s3648_s1 }
   0x7   :  { %p3429_p2 = pnand %p3427_p1, %p3424_p0 }
   0x9   :  { %3432 = shalt.err (!%p3429_p2)
}
   0xa   :  { %s3433_s24 = scalar_lea.vmem %s30_s16, 65536  ;;  %p3438_p4 = scmp.lt.s32.totalorder %s30_s16, %s30_s16 }
   0xb   :  { %p3434_p3 = scmp.ne.s32.totalorder %s30_s16, %s3433_s24  ;;  %p3439_p5 = scmp.lt.s32.totalorder %s3433_s24, %s3433_s24 }
   0xd   :  { %p3440_p6 = por %p3439_p5, %p3438_p4 }
   0xf   :  { %p3441_p7 = pnand %p3440_p6, %p3434_p3 }
  0x11   :  { %3444 = shalt.err (!%p3441_p7)
}
  0x12   :  { %s3542_s25 = smov 512   ;;  %s3543_s26 = smov 32  }
  0x13   :  { %35 = dma.hbm_to_vmem [thread:$0]  %s3648_s1, 65536, %s30_s16, [#allocation6], %s3542_s25, %s3542_s25, %s3543_s26  }
  0x14   :  { %s3544_s29 = smov [#allocation2]   ;;  %s3545_s5 = smov [#allocation7]  }
  0x15   :  { %s20_s30 = sshll.u32 %s3544_s29, 4  ;;  %s41_s6 = sshll.u32 %s3545_s5, 4  ;;  %s21_s30 = int_to_ptr.vmem [resolvable:$true] %s20_s30  ;;  %s42_s6 = int_to_ptr.vmem [resolvable:$true] %s41_s6 }
  0x16   :  { %s3445_s9 = scalar_lea.hbm %s3647_s0, 1024 }
  0x17   :  { %p3446_p8 = scmp.ne.s32.totalorder %s3647_s0, %s3445_s9  ;;  %p3449_p9 = scmp.lt.u32.totalorder %s3445_s9, %s3647_s0 }
  0x19   :  { %p3451_p10 = pnand %p3449_p9, %p3446_p8 }
  0x1b   :  { %3454 = shalt.err (!%p3451_p10)
}
  0x1c   :  { %s3455_s1 = scalar_lea.vmem %s21_s30, 1024  ;;  %p3460_p12 = scmp.lt.s32.totalorder %s21_s30, %s21_s30 }
  0x1d   :  { %p3456_p11 = scmp.ne.s32.totalorder %s21_s30, %s3455_s1  ;;  %p3461_p13 = scmp.lt.s32.totalorder %s3455_s1, %s3455_s1 }
  0x1f   :  { %p3462_p0 = por %p3461_p13, %p3460_p12 }
  0x21   :  { %p3463_p1 = pnand %p3462_p0, %p3456_p11 }
  0x23   :  { %3466 = shalt.err (!%p3463_p1)
}
  0x24   :  { %23 = dma.hbm_to_vmem [thread:$0]  %s3647_s0, 1024, %s21_s30, [#allocation3]  }
  0x25   :  { %s3467_s18 = scalar_lea.hbm %s3649_s2, 65536 }
  0x26   :  { %p3468_p2 = scmp.ne.s32.totalorder %s3649_s2, %s3467_s18  ;;  %p3471_p3 = scmp.lt.u32.totalorder %s3467_s18, %s3649_s2 }
  0x28   :  { %p3473_p4 = pnand %p3471_p3, %p3468_p2 }
  0x2a   :  { %3476 = shalt.err (!%p3473_p4)
}
  0x2b   :  { %s3477_s23 = scalar_lea.vmem %s42_s6, 65536  ;;  %p3482_p6 = scmp.lt.s32.totalorder %s42_s6, %s42_s6 }
  0x2c   :  { %p3478_p5 = scmp.ne.s32.totalorder %s42_s6, %s3477_s23  ;;  %p3483_p7 = scmp.lt.s32.totalorder %s3477_s23, %s3477_s23 }
  0x2e   :  { %p3484_p8 = por %p3483_p7, %p3482_p6 }
  0x30   :  { %p3485_p9 = pnand %p3484_p8, %p3478_p5 }
  0x32   :  { %3488 = shalt.err (!%p3485_p9)
}
  0x33   :  { %s3546_s0 = smov 1024   ;;  %s3547_s24 = smov 64  }
  0x34   :  { %47 = dma.hbm_to_vmem [thread:$0]  %s3649_s2, 65536, %s42_s6, [#allocation6], %s3546_s0, %s3546_s0, %s3547_s24  }
  0x35   :  { %3533 = dma.done.wait [#allocation3], 1024  }
  0x36   :  { %3534 = vsyncadd [#allocation3], 4294966272 }
  0x37   :  { %3535 = dma.done.wait [#allocation6], 131072  }
  0x38   :  { %3536 = vsyncadd [#allocation6], 4294836224  ;;  %v66_v0 = vld [vmem:[#allocation5 + $0x8] sm:$0xff]  ;;  %v68_v2 = vld [vmem:[#allocation5 + $0x18] sm:$0xff]  ;;  %s3548_s2 = smov [#allocation8]  }
  0x39   :  { %v70_v1 = vld [vmem:[#allocation5 + $0x28] sm:$0xff]  ;;  %v72_v4 = vld [vmem:[#allocation5 + $0x38] sm:$0xff]  ;;  %v65_v5 = vld [vmem:[#allocation5] sm:$0xff]  ;;  %s2311_s27 = sshll.u32 %s3548_s2, 4  ;;  %s2312_s27 = int_to_ptr.vmem [resolvable:$true] %s2311_s27 }
  0x3a   :  { %v2335_v3 = vpack.c.bf16 %v70_v1, %v66_v0  ;;  %v69_v6 = vld [vmem:[#allocation5 + $0x20] sm:$0xff]  ;;  %v2591_v7 = vpack.c.bf16 %v72_v4, %v68_v2  ;;  %v67_v9 = vld [vmem:[#allocation5 + $0x10] sm:$0xff]  ;;  %v74_v11 = vld [vmem:[#allocation5 + $0x48] sm:$0xff]  ;;  %s3489_s28 = scalar_lea.vmem %s2312_s27, 512  ;;  %p3494_p11 = scmp.lt.s32.totalorder %s2312_s27, %s2312_s27 }
  0x3b   :  { %v2337_v8 = vpack.c.bf16 %v69_v6, %v65_v5  ;;  %v71_v10 = vld [vmem:[#allocation5 + $0x30] sm:$0xff]  ;;  %v78_v13 = vld [vmem:[#allocation5 + $0x68] sm:$0xff]  ;;  %v76_v14 = vld [vmem:[#allocation5 + $0x58] sm:$0xff]  ;;  %p3490_p10 = scmp.ne.s32.totalorder %s2312_s27, %s3489_s28  ;;  %p3495_p12 = scmp.lt.s32.totalorder %s3489_s28, %s3489_s28 }
  0x3c   :  { %2336 = vmatprep.subr.bf16.mxu0 %v2335_v3  ;;  %v2593_v12 = vpack.c.bf16 %v71_v10, %v67_v9  ;;  %v80_v15 = vld [vmem:[#allocation5 + $0x78] sm:$0xff]  ;;  %2592 = vmatprep.subr.bf16.mxu1 %v2591_v7  ;;  %v2339_v16 = vpack.c.bf16 %v78_v13, %v74_v11  ;;  %v73_v18 = vld [vmem:[#allocation5 + $0x40] sm:$0xff]  ;;  %v75_v20 = vld [vmem:[#allocation5 + $0x50] sm:$0xff] }
  0x3d   :  { %2338 = vmatpush1.bf16.msra.mxu0 %v2337_v8  ;;  %v2595_v17 = vpack.c.bf16 %v80_v15, %v76_v14  ;;  %v77_v19 = vld [vmem:[#allocation5 + $0x60] sm:$0xff]  ;;  %v79_v22 = vld [vmem:[#allocation5 + $0x70] sm:$0xff]  ;;  %v82_v23 = vld [vmem:[#allocation5 + $0x88] sm:$0xff]  ;;  %p3496_p13 = por %p3495_p12, %p3494_p11 }
  0x3e   :  { %2594 = vmatpush1.bf16.msra.mxu1 %v2593_v12  ;;  %v2341_v21 = vpack.c.bf16 %v77_v19, %v73_v18  ;;  %v86_v24 = vld [vmem:[#allocation5 + $0xa8] sm:$0xff]  ;;  %2340 = vmatprep.subr.bf16.mxu0 %v2339_v16  ;;  %v2597_v25 = vpack.c.bf16 %v79_v22, %v75_v20  ;;  %v84_v27 = vld [vmem:[#allocation5 + $0x98] sm:$0xff]  ;;  %v81_v29 = vld [vmem:[#allocation5 + $0x80] sm:$0xff] }
  0x3f   :  { %2596 = vmatprep.subr.bf16.mxu1 %v2595_v17  ;;  %v2343_v26 = vpack.c.bf16 %v86_v24, %v82_v23  ;;  %v88_v28 = vld [vmem:[#allocation5 + $0xb8] sm:$0xff]  ;;  %v85_v31 = vld [vmem:[#allocation5 + $0xa0] sm:$0xff]  ;;  %v83_v32 = vld [vmem:[#allocation5 + $0x90] sm:$0xff]  ;;  %p3497_p0 = pnand %p3496_p13, %p3490_p10 }
  0x40   :  { %v2599_v30 = vpack.c.bf16 %v88_v28, %v84_v27  ;;  %v87_v33 = vld [vmem:[#allocation5 + $0xb0] sm:$0xff]  ;;  %v2345_v34 = vpack.c.bf16 %v85_v31, %v81_v29  ;;  %v90_v35 = vld [vmem:[#allocation5 + $0xc8] sm:$0xff]  ;;  %v92_v37 = vld [vmem:[#allocation5 + $0xd8] sm:$0xff] }
  0x41   :  { %2342 = vmatpush1.bf16.msra.mxu0 %v2341_v21  ;;  %v94_v36 = vld [vmem:[#allocation5 + $0xe8] sm:$0xff]  ;;  %v2601_v38 = vpack.c.bf16 %v87_v33, %v83_v32  ;;  %v96_v40 = vld [vmem:[#allocation5 + $0xf8] sm:$0xff]  ;;  %v89_v41 = vld [vmem:[#allocation5 + $0xc0] sm:$0xff] }
  0x42   :  { %2598 = vmatpush1.bf16.msra.mxu1 %v2597_v25  ;;  %2344 = vmatprep.subr.bf16.mxu0 %v2343_v26  ;;  %v2347_v39 = vpack.c.bf16 %v94_v36, %v90_v35  ;;  %v93_v42 = vld [vmem:[#allocation5 + $0xe0] sm:$0xff]  ;;  %v2603_v43 = vpack.c.bf16 %v96_v40, %v92_v37  ;;  %v91_v44 = vld [vmem:[#allocation5 + $0xd0] sm:$0xff]  ;;  %v98_v46 = vld [vmem:[#allocation5 + $0x108] sm:$0xff] }
  0x43   :  { %2600 = vmatprep.subr.bf16.mxu1 %v2599_v30  ;;  %v95_v45 = vld [vmem:[#allocation5 + $0xf0] sm:$0xff]  ;;  %v102_v47 = vld [vmem:[#allocation5 + $0x128] sm:$0xff]  ;;  %v100_v48 = vld [vmem:[#allocation5 + $0x118] sm:$0xff]  ;;  %v2349_v50 = vpack.c.bf16 %v93_v42, %v89_v41 }
  0x44   :  { %v104_v49 = vld [vmem:[#allocation5 + $0x138] sm:$0xff]  ;;  %v2605_v51 = vpack.c.bf16 %v95_v45, %v91_v44  ;;  %v2351_v52 = vpack.c.bf16 %v102_v47, %v98_v46  ;;  %v97_v53 = vld [vmem:[#allocation5 + $0x100] sm:$0xff]  ;;  %v99_v55 = vld [vmem:[#allocation5 + $0x110] sm:$0xff] }
  0x45   :  { %2346 = vmatpush1.bf16.msra.mxu0 %v2345_v34  ;;  %v101_v54 = vld [vmem:[#allocation5 + $0x120] sm:$0xff]  ;;  %v2607_v56 = vpack.c.bf16 %v104_v49, %v100_v48  ;;  %v103_v57 = vld [vmem:[#allocation5 + $0x130] sm:$0xff]  ;;  %v106_v58 = vld [vmem:[#allocation5 + $0x148] sm:$0xff] }
  0x46   :  { %2602 = vmatpush1.bf16.msra.mxu1 %v2601_v38  ;;  %2348 = vmatprep.subr.bf16.mxu0 %v2347_v39  ;;  %v110_v59 = vld [vmem:[#allocation5 + $0x168] sm:$0xff]  ;;  %v108_v60 = vld [vmem:[#allocation5 + $0x158] sm:$0xff]  ;;  %v2353_v62 = vpack.c.bf16 %v101_v54, %v97_v53  ;;  %v2609_v63 = vpack.c.bf16 %v103_v57, %v99_v55  ;;  %v105_v1 = vld [vmem:[#allocation5 + $0x140] sm:$0xff] }
  0x47   :  { %2604 = vmatprep.subr.bf16.mxu1 %v2603_v43  ;;  %v112_v61 = vld [vmem:[#allocation5 + $0x178] sm:$0xff]  ;;  %v2355_v0 = vpack.c.bf16 %v110_v59, %v106_v58  ;;  %v109_v2 = vld [vmem:[#allocation5 + $0x160] sm:$0xff]  ;;  %v107_v3 = vld [vmem:[#allocation5 + $0x150] sm:$0xff] }
  0x48   :  { %v2611_v4 = vpack.c.bf16 %v112_v61, %v108_v60  ;;  %v111_v5 = vld [vmem:[#allocation5 + $0x170] sm:$0xff]  ;;  %v114_v6 = vld [vmem:[#allocation5 + $0x188] sm:$0xff]  ;;  %v116_v8 = vld [vmem:[#allocation5 + $0x198] sm:$0xff]  ;;  %v2357_v10 = vpack.c.bf16 %v109_v2, %v105_v1 }
  0x49   :  { %2350 = vmatpush1.bf16.msra.mxu0 %v2349_v50  ;;  %v118_v7 = vld [vmem:[#allocation5 + $0x1a8] sm:$0xff]  ;;  %v120_v9 = vld [vmem:[#allocation5 + $0x1b8] sm:$0xff]  ;;  %v2613_v11 = vpack.c.bf16 %v111_v5, %v107_v3  ;;  %v113_v13 = vld [vmem:[#allocation5 + $0x180] sm:$0xff] }
  0x4a   :  { %2606 = vmatpush1.bf16.msra.mxu1 %v2605_v51  ;;  %2352 = vmatprep.subr.bf16.mxu0 %v2351_v52  ;;  %v2359_v12 = vpack.c.bf16 %v118_v7, %v114_v6  ;;  %v117_v14 = vld [vmem:[#allocation5 + $0x1a0] sm:$0xff]  ;;  %v115_v15 = vld [vmem:[#allocation5 + $0x190] sm:$0xff]  ;;  %v2615_v16 = vpack.c.bf16 %v120_v9, %v116_v8  ;;  %v122_v18 = vld [vmem:[#allocation5 + $0x1c8] sm:$0xff] }
  0x4b   :  { %2608 = vmatprep.subr.bf16.mxu1 %v2607_v56  ;;  %v119_v17 = vld [vmem:[#allocation5 + $0x1b0] sm:$0xff]  ;;  %v126_v19 = vld [vmem:[#allocation5 + $0x1e8] sm:$0xff]  ;;  %v124_v20 = vld [vmem:[#allocation5 + $0x1d8] sm:$0xff]  ;;  %v2361_v22 = vpack.c.bf16 %v117_v14, %v113_v13 }
  0x4c   :  { %v128_v21 = vld [vmem:[#allocation5 + $0x1f8] sm:$0xff]  ;;  %v2617_v23 = vpack.c.bf16 %v119_v17, %v115_v15  ;;  %v2363_v24 = vpack.c.bf16 %v126_v19, %v122_v18  ;;  %v121_v25 = vld [vmem:[#allocation5 + $0x1c0] sm:$0xff]  ;;  %v123_v27 = vld [vmem:[#allocation5 + $0x1d0] sm:$0xff] }
  0x4d   :  { %2354 = vmatpush1.bf16.msra.mxu0 %v2353_v62  ;;  %v125_v26 = vld [vmem:[#allocation5 + $0x1e0] sm:$0xff]  ;;  %v2619_v28 = vpack.c.bf16 %v128_v21, %v124_v20  ;;  %v127_v29 = vld [vmem:[#allocation5 + $0x1f0] sm:$0xff]  ;;  %v130_v30 = vld [vmem:[#allocation5 + $0x208] sm:$0xff] }
  0x4e   :  { %2610 = vmatpush1.bf16.msra.mxu1 %v2609_v63  ;;  %2356 = vmatprep.subr.bf16.mxu0 %v2355_v0  ;;  %v134_v31 = vld [vmem:[#allocation5 + $0x228] sm:$0xff]  ;;  %v132_v32 = vld [vmem:[#allocation5 + $0x218] sm:$0xff]  ;;  %v2365_v34 = vpack.c.bf16 %v125_v26, %v121_v25  ;;  %v2621_v35 = vpack.c.bf16 %v127_v29, %v123_v27  ;;  %v129_v37 = vld [vmem:[#allocation5 + $0x200] sm:$0xff] }
  0x4f   :  { %2612 = vmatprep.subr.bf16.mxu1 %v2611_v4  ;;  %v136_v33 = vld [vmem:[#allocation5 + $0x238] sm:$0xff]  ;;  %v2367_v36 = vpack.c.bf16 %v134_v31, %v130_v30  ;;  %v133_v38 = vld [vmem:[#allocation5 + $0x220] sm:$0xff]  ;;  %v131_v39 = vld [vmem:[#allocation5 + $0x210] sm:$0xff] }
  0x50   :  { %v2623_v40 = vpack.c.bf16 %v136_v33, %v132_v32  ;;  %v135_v41 = vld [vmem:[#allocation5 + $0x230] sm:$0xff]  ;;  %v138_v42 = vld [vmem:[#allocation5 + $0x248] sm:$0xff]  ;;  %v140_v44 = vld [vmem:[#allocation5 + $0x258] sm:$0xff]  ;;  %v2369_v46 = vpack.c.bf16 %v133_v38, %v129_v37 }
  0x51   :  { %2358 = vmatpush1.bf16.msra.mxu0 %v2357_v10  ;;  %v142_v43 = vld [vmem:[#allocation5 + $0x268] sm:$0xff]  ;;  %v144_v45 = vld [vmem:[#allocation5 + $0x278] sm:$0xff]  ;;  %v2625_v47 = vpack.c.bf16 %v135_v41, %v131_v39  ;;  %v137_v49 = vld [vmem:[#allocation5 + $0x240] sm:$0xff] }
  0x52   :  { %2614 = vmatpush1.bf16.msra.mxu1 %v2613_v11  ;;  %2360 = vmatprep.subr.bf16.mxu0 %v2359_v12  ;;  %v2371_v48 = vpack.c.bf16 %v142_v43, %v138_v42  ;;  %v141_v50 = vld [vmem:[#allocation5 + $0x260] sm:$0xff]  ;;  %v139_v51 = vld [vmem:[#allocation5 + $0x250] sm:$0xff]  ;;  %v2627_v52 = vpack.c.bf16 %v144_v45, %v140_v44  ;;  %v146_v54 = vld [vmem:[#allocation5 + $0x288] sm:$0xff] }
  0x53   :  { %2616 = vmatprep.subr.bf16.mxu1 %v2615_v16  ;;  %v143_v53 = vld [vmem:[#allocation5 + $0x270] sm:$0xff]  ;;  %v150_v55 = vld [vmem:[#allocation5 + $0x2a8] sm:$0xff]  ;;  %v148_v56 = vld [vmem:[#allocation5 + $0x298] sm:$0xff]  ;;  %v2373_v58 = vpack.c.bf16 %v141_v50, %v137_v49 }
  0x54   :  { %v152_v57 = vld [vmem:[#allocation5 + $0x2b8] sm:$0xff]  ;;  %v2629_v59 = vpack.c.bf16 %v143_v53, %v139_v51  ;;  %v2375_v60 = vpack.c.bf16 %v150_v55, %v146_v54  ;;  %v145_v61 = vld [vmem:[#allocation5 + $0x280] sm:$0xff]  ;;  %v147_v63 = vld [vmem:[#allocation5 + $0x290] sm:$0xff] }
  0x55   :  { %2362 = vmatpush1.bf16.msra.mxu0 %v2361_v22  ;;  %v149_v62 = vld [vmem:[#allocation5 + $0x2a0] sm:$0xff]  ;;  %v2631_v0 = vpack.c.bf16 %v152_v57, %v148_v56  ;;  %v151_v1 = vld [vmem:[#allocation5 + $0x2b0] sm:$0xff]  ;;  %v154_v2 = vld [vmem:[#allocation5 + $0x2c8] sm:$0xff] }
  0x56   :  { %2618 = vmatpush1.bf16.msra.mxu1 %v2617_v23  ;;  %2364 = vmatprep.subr.bf16.mxu0 %v2363_v24  ;;  %v158_v3 = vld [vmem:[#allocation5 + $0x2e8] sm:$0xff]  ;;  %v156_v4 = vld [vmem:[#allocation5 + $0x2d8] sm:$0xff]  ;;  %v2377_v6 = vpack.c.bf16 %v149_v62, %v145_v61  ;;  %v153_v7 = vld [vmem:[#allocation5 + $0x2c0] sm:$0xff]  ;;  %v2633_v8 = vpack.c.bf16 %v151_v1, %v147_v63 }
  0x57   :  { %2620 = vmatprep.subr.bf16.mxu1 %v2619_v28  ;;  %v160_v5 = vld [vmem:[#allocation5 + $0x2f8] sm:$0xff]  ;;  %v2379_v9 = vpack.c.bf16 %v158_v3, %v154_v2  ;;  %v157_v10 = vld [vmem:[#allocation5 + $0x2e0] sm:$0xff]  ;;  %v155_v11 = vld [vmem:[#allocation5 + $0x2d0] sm:$0xff] }
  0x58   :  { %v159_v12 = vld [vmem:[#allocation5 + $0x2f0] sm:$0xff]  ;;  %v2635_v13 = vpack.c.bf16 %v160_v5, %v156_v4  ;;  %v162_v14 = vld [vmem:[#allocation5 + $0x308] sm:$0xff]  ;;  %v164_v17 = vld [vmem:[#allocation5 + $0x318] sm:$0xff]  ;;  %v2381_v19 = vpack.c.bf16 %v157_v10, %v153_v7 }
  0x59   :  { %2366 = vmatpush1.bf16.msra.mxu0 %v2365_v34  ;;  %v166_v15 = vld [vmem:[#allocation5 + $0x328] sm:$0xff]  ;;  %v168_v18 = vld [vmem:[#allocation5 + $0x338] sm:$0xff]  ;;  %v2637_v20 = vpack.c.bf16 %v159_v12, %v155_v11  ;;  %v161_v22 = vld [vmem:[#allocation5 + $0x300] sm:$0xff] }
  0x5a   :  { %2622 = vmatpush1.bf16.msra.mxu1 %v2621_v35  ;;  %2368 = vmatprep.subr.bf16.mxu0 %v2367_v36  ;;  %v58_v16 = vld [vmem:[#allocation2 + $0x8] sm:$0xff]  ;;  %v2383_v21 = vpack.c.bf16 %v166_v15, %v162_v14  ;;  %v165_v23 = vld [vmem:[#allocation5 + $0x320] sm:$0xff]  ;;  %v163_v24 = vld [vmem:[#allocation5 + $0x310] sm:$0xff]  ;;  %v2639_v25 = vpack.c.bf16 %v168_v18, %v164_v17 }
  0x5b   :  { %2624 = vmatprep.subr.bf16.mxu1 %v2623_v40  ;;  %641 = vmatprep.mubr.f32.mxu0 %v58_v16  ;;  %v167_v26 = vld [vmem:[#allocation5 + $0x330] sm:$0xff]  ;;  %v170_v27 = vld [vmem:[#allocation5 + $0x348] sm:$0xff]  ;;  %v172_v29 = vld [vmem:[#allocation5 + $0x358] sm:$0xff]  ;;  %v2385_v31 = vpack.c.bf16 %v165_v23, %v161_v22 }
  0x5c   :  { %925 = vmatprep.mubr.f32.mxu1 %v58_v16  ;;  %v174_v28 = vld [vmem:[#allocation5 + $0x368] sm:$0xff]  ;;  %v176_v30 = vld [vmem:[#allocation5 + $0x378] sm:$0xff]  ;;  %v2641_v32 = vpack.c.bf16 %v167_v26, %v163_v24  ;;  %v169_v34 = vld [vmem:[#allocation5 + $0x340] sm:$0xff] }
  0x5d   :  { %2370 = vmatpush1.bf16.msra.mxu0 %v2369_v46  ;;  %v2387_v33 = vpack.c.bf16 %v174_v28, %v170_v27  ;;  %v173_v35 = vld [vmem:[#allocation5 + $0x360] sm:$0xff]  ;;  %v171_v36 = vld [vmem:[#allocation5 + $0x350] sm:$0xff]  ;;  %v2643_v37 = vpack.c.bf16 %v176_v30, %v172_v29  ;;  %v178_v39 = vld [vmem:[#allocation5 + $0x388] sm:$0xff] }
  0x5e   :  { %2626 = vmatpush1.bf16.msra.mxu1 %v2625_v47  ;;  %2372 = vmatprep.subr.bf16.mxu0 %v2371_v48  ;;  %v175_v38 = vld [vmem:[#allocation5 + $0x370] sm:$0xff]  ;;  %v182_v40 = vld [vmem:[#allocation5 + $0x3a8] sm:$0xff]  ;;  %v180_v41 = vld [vmem:[#allocation5 + $0x398] sm:$0xff]  ;;  %v2389_v43 = vpack.c.bf16 %v173_v35, %v169_v34 }
  0x5f   :  { %2628 = vmatprep.subr.bf16.mxu1 %v2627_v52  ;;  %v184_v42 = vld [vmem:[#allocation5 + $0x3b8] sm:$0xff]  ;;  %v2645_v44 = vpack.c.bf16 %v175_v38, %v171_v36  ;;  %v2391_v45 = vpack.c.bf16 %v182_v40, %v178_v39  ;;  %v177_v46 = vld [vmem:[#allocation5 + $0x380] sm:$0xff]  ;;  %v179_v48 = vld [vmem:[#allocation5 + $0x390] sm:$0xff] }
  0x60   :  { %v181_v47 = vld [vmem:[#allocation5 + $0x3a0] sm:$0xff]  ;;  %v2647_v49 = vpack.c.bf16 %v184_v42, %v180_v41  ;;  %v183_v50 = vld [vmem:[#allocation5 + $0x3b0] sm:$0xff]  ;;  %v186_v51 = vld [vmem:[#allocation5 + $0x3c8] sm:$0xff] }
  0x61   :  { %2374 = vmatpush1.bf16.msra.mxu0 %v2373_v58  ;;  %v190_v52 = vld [vmem:[#allocation5 + $0x3e8] sm:$0xff]  ;;  %v188_v53 = vld [vmem:[#allocation5 + $0x3d8] sm:$0xff]  ;;  %v2393_v55 = vpack.c.bf16 %v181_v47, %v177_v46  ;;  %v2649_v56 = vpack.c.bf16 %v183_v50, %v179_v48  ;;  %v185_v58 = vld [vmem:[#allocation5 + $0x3c0] sm:$0xff] }
  0x62   :  { %2630 = vmatpush1.bf16.msra.mxu1 %v2629_v59  ;;  %2376 = vmatprep.subr.bf16.mxu0 %v2375_v60  ;;  %v192_v54 = vld [vmem:[#allocation5 + $0x3f8] sm:$0xff]  ;;  %v2395_v57 = vpack.c.bf16 %v190_v52, %v186_v51  ;;  %v189_v59 = vld [vmem:[#allocation5 + $0x3e0] sm:$0xff]  ;;  %v187_v60 = vld [vmem:[#allocation5 + $0x3d0] sm:$0xff] }
  0x63   :  { %2632 = vmatprep.subr.bf16.mxu1 %v2631_v0  ;;  %v2651_v61 = vpack.c.bf16 %v192_v54, %v188_v53  ;;  %v191_v62 = vld [vmem:[#allocation5 + $0x3f0] sm:$0xff]  ;;  %v194_v63 = vld [vmem:[#allocation5 + $0x408] sm:$0xff]  ;;  %v196_v1 = vld [vmem:[#allocation5 + $0x418] sm:$0xff]  ;;  %v2397_v3 = vpack.c.bf16 %v189_v59, %v185_v58 }
  0x64   :  { %v198_v0 = vld [vmem:[#allocation5 + $0x428] sm:$0xff]  ;;  %v200_v2 = vld [vmem:[#allocation5 + $0x438] sm:$0xff]  ;;  %v2653_v4 = vpack.c.bf16 %v191_v62, %v187_v60  ;;  %v197_v7 = vld [vmem:[#allocation5 + $0x420] sm:$0xff] }
  0x65   :  { %2378 = vmatpush1.bf16.msra.mxu0 %v2377_v6  ;;  %v2399_v5 = vpack.c.bf16 %v198_v0, %v194_v63  ;;  %v193_v6 = vld [vmem:[#allocation5 + $0x400] sm:$0xff]  ;;  %v199_v10 = vld [vmem:[#allocation5 + $0x430] sm:$0xff]  ;;  %v202_v11 = vld [vmem:[#allocation5 + $0x448] sm:$0xff] }
  0x66   :  { %2634 = vmatpush1.bf16.msra.mxu1 %v2633_v8  ;;  %2380 = vmatprep.subr.bf16.mxu0 %v2379_v9  ;;  %v195_v8 = vld [vmem:[#allocation5 + $0x410] sm:$0xff]  ;;  %v2655_v9 = vpack.c.bf16 %v200_v2, %v196_v1  ;;  %v206_v12 = vld [vmem:[#allocation5 + $0x468] sm:$0xff]  ;;  %v208_v14 = vld [vmem:[#allocation5 + $0x478] sm:$0xff]  ;;  %v2401_v16 = vpack.c.bf16 %v197_v7, %v193_v6 }
  0x67   :  { %2636 = vmatprep.subr.bf16.mxu1 %v2635_v13  ;;  %v204_v13 = vld [vmem:[#allocation5 + $0x458] sm:$0xff]  ;;  %v57_v15 = vld [vmem:[#allocation2] sm:$0xff]  ;;  %v2657_v17 = vpack.c.bf16 %v199_v10, %v195_v8  ;;  %v2403_v18 = vpack.c.bf16 %v206_v12, %v202_v11  ;;  %v207_v23 = vld [vmem:[#allocation5 + $0x470] sm:$0xff] }
  0x68   :  { %v2659_v22 = vpack.c.bf16 %v208_v14, %v204_v13  ;;  %v210_v24 = vld [vmem:[#allocation5 + $0x488] sm:$0xff]  ;;  %v212_v26 = vld [vmem:[#allocation5 + $0x498] sm:$0xff]  ;;  %v215_v35 = vld [vmem:[#allocation5 + $0x4b0] sm:$0xff] }
  0x69   :  { %2382 = vmatpush1.bf16.msra.mxu0 %v2381_v19  ;;  %v201_v19 = vld [vmem:[#allocation5 + $0x440] sm:$0xff]  ;;  %v216_v27 = vld [vmem:[#allocation5 + $0x4b8] sm:$0xff]  ;;  %v218_v36 = vld [vmem:[#allocation5 + $0x4c8] sm:$0xff] }
  0x6a   :  { %2638 = vmatpush1.bf16.msra.mxu1 %v2637_v20  ;;  %2384 = vmatprep.subr.bf16.mxu0 %v2383_v21  ;;  %v205_v20 = vld [vmem:[#allocation5 + $0x460] sm:$0xff]  ;;  %v203_v21 = vld [vmem:[#allocation5 + $0x450] sm:$0xff]  ;;  %v2663_v34 = vpack.c.bf16 %v216_v27, %v212_v26  ;;  %v220_v38 = vld [vmem:[#allocation5 + $0x4d8] sm:$0xff] }
  0x6b   :  { %2640 = vmatprep.subr.bf16.mxu1 %v2639_v25  ;;  %v214_v25 = vld [vmem:[#allocation5 + $0x4a8] sm:$0xff]  ;;  %v2405_v28 = vpack.c.bf16 %v205_v20, %v201_v19  ;;  %v2661_v29 = vpack.c.bf16 %v207_v23, %v203_v21  ;;  %v224_v39 = vld [vmem:[#allocation5 + $0x4f8] sm:$0xff]  ;;  %v223_v47 = vld [vmem:[#allocation5 + $0x4f0] sm:$0xff] }
  0x6c   :  { %v2407_v30 = vpack.c.bf16 %v214_v25, %v210_v24  ;;  %v2667_v46 = vpack.c.bf16 %v224_v39, %v220_v38  ;;  %v226_v48 = vld [vmem:[#allocation5 + $0x508] sm:$0xff]  ;;  %v228_v50 = vld [vmem:[#allocation5 + $0x518] sm:$0xff]  ;;  %v231_v59 = vld [vmem:[#allocation5 + $0x530] sm:$0xff] }
  0x6d   :  { %2386 = vmatpush1.bf16.msra.mxu0 %v2385_v31  ;;  %v209_v31 = vld [vmem:[#allocation5 + $0x480] sm:$0xff]  ;;  %v232_v51 = vld [vmem:[#allocation5 + $0x538] sm:$0xff]  ;;  %v234_v60 = vld [vmem:[#allocation5 + $0x548] sm:$0xff] }
  0x6e   :  { %2642 = vmatpush1.bf16.msra.mxu1 %v2641_v32  ;;  %2388 = vmatprep.subr.bf16.mxu0 %v2387_v33  ;;  %v213_v32 = vld [vmem:[#allocation5 + $0x4a0] sm:$0xff]  ;;  %v211_v33 = vld [vmem:[#allocation5 + $0x490] sm:$0xff]  ;;  %v2671_v58 = vpack.c.bf16 %v232_v51, %v228_v50  ;;  %v236_v62 = vld [vmem:[#allocation5 + $0x558] sm:$0xff] }
  0x6f   :  { %2644 = vmatprep.subr.bf16.mxu1 %v2643_v37  ;;  %v222_v37 = vld [vmem:[#allocation5 + $0x4e8] sm:$0xff]  ;;  %v2409_v40 = vpack.c.bf16 %v213_v32, %v209_v31  ;;  %v2665_v41 = vpack.c.bf16 %v215_v35, %v211_v33  ;;  %v240_v63 = vld [vmem:[#allocation5 + $0x578] sm:$0xff]  ;;  %v239_v7 = vld [vmem:[#allocation5 + $0x570] sm:$0xff] }
  0x70   :  { %v2411_v42 = vpack.c.bf16 %v222_v37, %v218_v36  ;;  %v2675_v6 = vpack.c.bf16 %v240_v63, %v236_v62  ;;  %v242_v8 = vld [vmem:[#allocation5 + $0x588] sm:$0xff]  ;;  %v244_v10 = vld [vmem:[#allocation5 + $0x598] sm:$0xff]  ;;  %v241_v13 = vld [vmem:[#allocation5 + $0x580] sm:$0xff] }
  0x71   :  { %2390 = vmatpush1.bf16.msra.mxu0 %v2389_v43  ;;  %v217_v43 = vld [vmem:[#allocation5 + $0x4c0] sm:$0xff]  ;;  %v248_v11 = vld [vmem:[#allocation5 + $0x5b8] sm:$0xff]  ;;  %v250_v20 = vld [vmem:[#allocation5 + $0x5c8] sm:$0xff] }
  0x72   :  { %2646 = vmatpush1.bf16.msra.mxu1 %v2645_v44  ;;  %2392 = vmatprep.subr.bf16.mxu0 %v2391_v45  ;;  %v221_v44 = vld [vmem:[#allocation5 + $0x4e0] sm:$0xff]  ;;  %v219_v45 = vld [vmem:[#allocation5 + $0x4d0] sm:$0xff]  ;;  %v2679_v19 = vpack.c.bf16 %v248_v11, %v244_v10  ;;  %v254_v21 = vld [vmem:[#allocation5 + $0x5e8] sm:$0xff] }
  0x73   :  { %2648 = vmatprep.subr.bf16.mxu1 %v2647_v49  ;;  %v230_v49 = vld [vmem:[#allocation5 + $0x528] sm:$0xff]  ;;  %v2413_v52 = vpack.c.bf16 %v221_v44, %v217_v43  ;;  %v2669_v53 = vpack.c.bf16 %v223_v47, %v219_v45  ;;  %v252_v23 = vld [vmem:[#allocation5 + $0x5d8] sm:$0xff]  ;;  %v2427_v27 = vpack.c.bf16 %v254_v21, %v250_v20  ;;  %v255_v32 = vld [vmem:[#allocation5 + $0x5f0] sm:$0xff] }
  0x74   :  { %v2415_v54 = vpack.c.bf16 %v230_v49, %v226_v48  ;;  %v256_v24 = vld [vmem:[#allocation5 + $0x5f8] sm:$0xff]  ;;  %v258_v33 = vld [vmem:[#allocation5 + $0x608] sm:$0xff]  ;;  %v263_v44 = vld [vmem:[#allocation5 + $0x630] sm:$0xff] }
  0x75   :  { %2394 = vmatpush1.bf16.msra.mxu0 %v2393_v55  ;;  %v225_v55 = vld [vmem:[#allocation5 + $0x500] sm:$0xff]  ;;  %v2683_v31 = vpack.c.bf16 %v256_v24, %v252_v23  ;;  %v260_v35 = vld [vmem:[#allocation5 + $0x618] sm:$0xff]  ;;  %v266_v45 = vld [vmem:[#allocation5 + $0x648] sm:$0xff] }
  0x76   :  { %2650 = vmatpush1.bf16.msra.mxu1 %v2649_v56  ;;  %2396 = vmatprep.subr.bf16.mxu0 %v2395_v57  ;;  %v229_v56 = vld [vmem:[#allocation5 + $0x520] sm:$0xff]  ;;  %v227_v57 = vld [vmem:[#allocation5 + $0x510] sm:$0xff]  ;;  %v264_v36 = vld [vmem:[#allocation5 + $0x638] sm:$0xff] }
  0x77   :  { %2652 = vmatprep.subr.bf16.mxu1 %v2651_v61  ;;  %v238_v61 = vld [vmem:[#allocation5 + $0x568] sm:$0xff]  ;;  %v2417_v0 = vpack.c.bf16 %v229_v56, %v225_v55  ;;  %v2673_v1 = vpack.c.bf16 %v231_v59, %v227_v57  ;;  %v2687_v43 = vpack.c.bf16 %v264_v36, %v260_v35  ;;  %v268_v47 = vld [vmem:[#allocation5 + $0x658] sm:$0xff]  ;;  %v271_v56 = vld [vmem:[#allocation5 + $0x670] sm:$0xff] }
  0x78   :  { %v2419_v2 = vpack.c.bf16 %v238_v61, %v234_v60  ;;  %v272_v48 = vld [vmem:[#allocation5 + $0x678] sm:$0xff]  ;;  %v274_v57 = vld [vmem:[#allocation5 + $0x688] sm:$0xff]  ;;  %v289_v24 = vld [vmem:[#allocation5 + $0x700] sm:$0xff] }
  0x79   :  { %2398 = vmatpush1.bf16.msra.mxu0 %v2397_v3  ;;  %v233_v3 = vld [vmem:[#allocation5 + $0x540] sm:$0xff]  ;;  %v2691_v55 = vpack.c.bf16 %v272_v48, %v268_v47  ;;  %v276_v59 = vld [vmem:[#allocation5 + $0x698] sm:$0xff] }
  0x7a   :  { %2654 = vmatpush1.bf16.msra.mxu1 %v2653_v4  ;;  %2400 = vmatprep.subr.bf16.mxu0 %v2399_v5  ;;  %v237_v4 = vld [vmem:[#allocation5 + $0x560] sm:$0xff]  ;;  %v235_v5 = vld [vmem:[#allocation5 + $0x550] sm:$0xff]  ;;  %v280_v60 = vld [vmem:[#allocation5 + $0x6b8] sm:$0xff] }
  0x7b   :  { %2656 = vmatprep.subr.bf16.mxu1 %v2655_v9  ;;  %v246_v9 = vld [vmem:[#allocation5 + $0x5a8] sm:$0xff]  ;;  %v2421_v12 = vpack.c.bf16 %v237_v4, %v233_v3  ;;  %v2677_v14 = vpack.c.bf16 %v239_v7, %v235_v5  ;;  %v2695_v3 = vpack.c.bf16 %v280_v60, %v276_v59  ;;  %v279_v4 = vld [vmem:[#allocation5 + $0x6b0] sm:$0xff]  ;;  %v284_v7 = vld [vmem:[#allocation5 + $0x6d8] sm:$0xff] }
  0x7c   :  { %642 = vmatmul.mubr.f32.vlgmr.msra.gmra.mrb[0].mxu0 %v57_v15  ;;  %v282_v5 = vld [vmem:[#allocation5 + $0x6c8] sm:$0xff]  ;;  %v296_v20 = vld [vmem:[#allocation5 + $0x738] sm:$0xff]  ;;  %v297_v36 = vld [vmem:[#allocation5 + $0x740] sm:$0xff] }
  0x7d   :  { %2402 = vmatpush1.bf16.msra.mxu0 %v2401_v16  ;;  %926 = vmatmul.mubr.f32.vlgmr.msra.gmra.mrb[0].mxu1 %v57_v15  ;;  %v2423_v15 = vpack.c.bf16 %v246_v9, %v242_v8  ;;  %v245_v16 = vld [vmem:[#allocation5 + $0x5a0] sm:$0xff]  ;;  %v288_v8 = vld [vmem:[#allocation5 + $0x6f8] sm:$0xff] }
  0x7e   :  { %2658 = vmatpush1.bf16.msra.mxu1 %v2657_v17  ;;  %2404 = vmatprep.subr.bf16.mxu0 %v2403_v18  ;;  %v243_v17 = vld [vmem:[#allocation5 + $0x590] sm:$0xff]  ;;  %v2425_v25 = vpack.c.bf16 %v245_v16, %v241_v13  ;;  %v285_v13 = vld [vmem:[#allocation5 + $0x6e0] sm:$0xff] }
  0x7f   :  { %2660 = vmatprep.subr.bf16.mxu1 %v2659_v22  ;;  %v247_v18 = vld [vmem:[#allocation5 + $0x5b0] sm:$0xff]  ;;  %v60_v22 = vld [vmem:[#allocation2 + $0x18] sm:$0xff]  ;;  %v305_v48 = vld [vmem:[#allocation5 + $0x780] sm:$0xff] }
  0x80   :  { %712 = vmatprep.mubr.f32.mxu0 %v60_v22  ;;  %996 = vmatprep.mubr.f32.mxu1 %v60_v22  ;;  %v2681_v26 = vpack.c.bf16 %v247_v18, %v243_v17  ;;  %v287_v16 = vld [vmem:[#allocation5 + $0x6f0] sm:$0xff]  ;;  %v290_v17 = vld [vmem:[#allocation5 + $0x708] sm:$0xff]  ;;  %v313_v60 = vld [vmem:[#allocation5 + $0x7c0] sm:$0xff] }
  0x81   :  { %2406 = vmatpush1.bf16.msra.mxu0 %v2405_v28  ;;  %v249_v28 = vld [vmem:[#allocation5 + $0x5c0] sm:$0xff]  ;;  %v294_v18 = vld [vmem:[#allocation5 + $0x728] sm:$0xff] }
  0x82   :  { %2662 = vmatpush1.bf16.msra.mxu1 %v2661_v29  ;;  %2408 = vmatprep.subr.bf16.mxu0 %v2407_v30  ;;  %v253_v29 = vld [vmem:[#allocation5 + $0x5e0] sm:$0xff]  ;;  %v251_v30 = vld [vmem:[#allocation5 + $0x5d0] sm:$0xff]  ;;  %v2447_v23 = vpack.c.bf16 %v294_v18, %v290_v17 }
  0x83   :  { %2664 = vmatprep.subr.bf16.mxu1 %v2663_v34  ;;  %v262_v34 = vld [vmem:[#allocation5 + $0x628] sm:$0xff]  ;;  %v2429_v37 = vpack.c.bf16 %v253_v29, %v249_v28  ;;  %v2685_v38 = vpack.c.bf16 %v255_v32, %v251_v30  ;;  %v295_v28 = vld [vmem:[#allocation5 + $0x730] sm:$0xff]  ;;  %v304_v32 = vld [vmem:[#allocation5 + $0x778] sm:$0xff] }
  0x84   :  { %v2431_v39 = vpack.c.bf16 %v262_v34, %v258_v33  ;;  %v298_v29 = vld [vmem:[#allocation5 + $0x748] sm:$0xff]  ;;  %v59_v17 = vld [vmem:[#allocation2 + $0x10] sm:$0xff] }
  0x85   :  { %2410 = vmatpush1.bf16.msra.mxu0 %v2409_v40  ;;  %v257_v40 = vld [vmem:[#allocation5 + $0x600] sm:$0xff]  ;;  %v302_v30 = vld [vmem:[#allocation5 + $0x768] sm:$0xff] }
  0x86   :  { %2666 = vmatpush1.bf16.msra.mxu1 %v2665_v41  ;;  %2412 = vmatprep.subr.bf16.mxu0 %v2411_v42  ;;  %v261_v41 = vld [vmem:[#allocation5 + $0x620] sm:$0xff]  ;;  %v259_v42 = vld [vmem:[#allocation5 + $0x610] sm:$0xff]  ;;  %v2451_v35 = vpack.c.bf16 %v302_v30, %v298_v29  ;;  %v344_v29 = vld [vmem:[#allocation5 + $0x8b8] sm:$0xff] }
  0x87   :  { %2668 = vmatprep.subr.bf16.mxu1 %v2667_v46  ;;  %v270_v46 = vld [vmem:[#allocation5 + $0x668] sm:$0xff]  ;;  %v2433_v49 = vpack.c.bf16 %v261_v41, %v257_v40  ;;  %v2689_v50 = vpack.c.bf16 %v263_v44, %v259_v42  ;;  %v303_v40 = vld [vmem:[#allocation5 + $0x770] sm:$0xff]  ;;  %v312_v44 = vld [vmem:[#allocation5 + $0x7b8] sm:$0xff] }
  0x88   :  { %v2435_v51 = vpack.c.bf16 %v270_v46, %v266_v45  ;;  %v306_v41 = vld [vmem:[#allocation5 + $0x788] sm:$0xff] }
  0x89   :  { %2414 = vmatpush1.bf16.msra.mxu0 %v2413_v52  ;;  %v265_v52 = vld [vmem:[#allocation5 + $0x640] sm:$0xff]  ;;  %v310_v42 = vld [vmem:[#allocation5 + $0x7a8] sm:$0xff] }
  0x8a   :  { %2670 = vmatpush1.bf16.msra.mxu1 %v2669_v53  ;;  %2416 = vmatprep.subr.bf16.mxu0 %v2415_v54  ;;  %v269_v53 = vld [vmem:[#allocation5 + $0x660] sm:$0xff]  ;;  %v267_v54 = vld [vmem:[#allocation5 + $0x650] sm:$0xff]  ;;  %v2455_v47 = vpack.c.bf16 %v310_v42, %v306_v41  ;;  %v62_v30 = vld [vmem:[#allocation2 + $0x28] sm:$0xff] }
  0x8b   :  { %2672 = vmatprep.subr.bf16.mxu1 %v2671_v58  ;;  %v278_v58 = vld [vmem:[#allocation5 + $0x6a8] sm:$0xff]  ;;  %v2437_v61 = vpack.c.bf16 %v269_v53, %v265_v52  ;;  %v2693_v62 = vpack.c.bf16 %v271_v56, %v267_v54  ;;  %v311_v52 = vld [vmem:[#allocation5 + $0x7b0] sm:$0xff]  ;;  %v320_v56 = vld [vmem:[#allocation5 + $0x7f8] sm:$0xff] }
  0x8c   :  { %v2439_v63 = vpack.c.bf16 %v278_v58, %v274_v57  ;;  %v314_v53 = vld [vmem:[#allocation5 + $0x7c8] sm:$0xff]  ;;  %v348_v41 = vld [vmem:[#allocation5 + $0x8d8] sm:$0xff] }
  0x8d   :  { %2418 = vmatpush1.bf16.msra.mxu0 %v2417_v0  ;;  %v273_v0 = vld [vmem:[#allocation5 + $0x680] sm:$0xff]  ;;  %v318_v54 = vld [vmem:[#allocation5 + $0x7e8] sm:$0xff]  ;;  %v352_v42 = vld [vmem:[#allocation5 + $0x8f8] sm:$0xff] }
  0x8e   :  { %2674 = vmatpush1.bf16.msra.mxu1 %v2673_v1  ;;  %2420 = vmatprep.subr.bf16.mxu0 %v2419_v2  ;;  %v277_v1 = vld [vmem:[#allocation5 + $0x6a0] sm:$0xff]  ;;  %v275_v2 = vld [vmem:[#allocation5 + $0x690] sm:$0xff]  ;;  %v2459_v59 = vpack.c.bf16 %v318_v54, %v314_v53  ;;  %v356_v53 = vld [vmem:[#allocation5 + $0x918] sm:$0xff] }
  0x8f   :  { %2676 = vmatprep.subr.bf16.mxu1 %v2675_v6  ;;  %v286_v6 = vld [vmem:[#allocation5 + $0x6e8] sm:$0xff]  ;;  %v2441_v9 = vpack.c.bf16 %v277_v1, %v273_v0  ;;  %v2697_v10 = vpack.c.bf16 %v279_v4, %v275_v2  ;;  %v319_v0 = vld [vmem:[#allocation5 + $0x7f0] sm:$0xff]  ;;  %v328_v4 = vld [vmem:[#allocation5 + $0x838] sm:$0xff] }
  0x90   :  { %v2443_v11 = vpack.c.bf16 %v286_v6, %v282_v5  ;;  %v322_v1 = vld [vmem:[#allocation5 + $0x808] sm:$0xff]  ;;  %v360_v54 = vld [vmem:[#allocation5 + $0x938] sm:$0xff] }
  0x91   :  { %2422 = vmatpush1.bf16.msra.mxu0 %v2421_v12  ;;  %v281_v12 = vld [vmem:[#allocation5 + $0x6c0] sm:$0xff]  ;;  %v326_v2 = vld [vmem:[#allocation5 + $0x828] sm:$0xff] }
  0x92   :  { %2678 = vmatpush1.bf16.msra.mxu1 %v2677_v14  ;;  %2424 = vmatprep.subr.bf16.mxu0 %v2423_v15  ;;  %v283_v14 = vld [vmem:[#allocation5 + $0x6d0] sm:$0xff]  ;;  %v2699_v15 = vpack.c.bf16 %v288_v8, %v284_v7  ;;  %v2445_v21 = vpack.c.bf16 %v285_v13, %v281_v12  ;;  %v2463_v7 = vpack.c.bf16 %v326_v2, %v322_v1  ;;  %v321_v8 = vld [vmem:[#allocation5 + $0x800] sm:$0xff]  ;;  %v330_v13 = vld [vmem:[#allocation5 + $0x848] sm:$0xff] }
  0x93   :  { %2680 = vmatprep.subr.bf16.mxu1 %v2679_v19  ;;  %v292_v19 = vld [vmem:[#allocation5 + $0x718] sm:$0xff]  ;;  %v2701_v22 = vpack.c.bf16 %v287_v16, %v283_v14  ;;  %v327_v12 = vld [vmem:[#allocation5 + $0x830] sm:$0xff]  ;;  %v334_v14 = vld [vmem:[#allocation5 + $0x868] sm:$0xff] }
  0x94   :  { %v336_v16 = vld [vmem:[#allocation5 + $0x878] sm:$0xff] }
  0x95   :  { %2426 = vmatpush1.bf16.msra.mxu0 %v2425_v25  ;;  %v293_v25 = vld [vmem:[#allocation5 + $0x720] sm:$0xff]  ;;  %v364_v1 = vld [vmem:[#allocation5 + $0x958] sm:$0xff] }
  0x96   :  { %2682 = vmatpush1.bf16.msra.mxu1 %v2681_v26  ;;  %2428 = vmatprep.subr.bf16.mxu0 %v2427_v27  ;;  %v291_v26 = vld [vmem:[#allocation5 + $0x710] sm:$0xff]  ;;  %v2703_v27 = vpack.c.bf16 %v296_v20, %v292_v19  ;;  %v2449_v33 = vpack.c.bf16 %v293_v25, %v289_v24  ;;  %v2467_v20 = vpack.c.bf16 %v334_v14, %v330_v13  ;;  %v368_v2 = vld [vmem:[#allocation5 + $0x978] sm:$0xff] }
  0x97   :  { %2684 = vmatprep.subr.bf16.mxu1 %v2683_v31  ;;  %v300_v31 = vld [vmem:[#allocation5 + $0x758] sm:$0xff]  ;;  %v2705_v34 = vpack.c.bf16 %v295_v28, %v291_v26  ;;  %v335_v25 = vld [vmem:[#allocation5 + $0x870] sm:$0xff]  ;;  %v338_v26 = vld [vmem:[#allocation5 + $0x888] sm:$0xff] }
  0x98   :  { %v340_v28 = vld [vmem:[#allocation5 + $0x898] sm:$0xff] }
  0x99   :  { %2430 = vmatpush1.bf16.msra.mxu0 %v2429_v37  ;;  %v301_v37 = vld [vmem:[#allocation5 + $0x760] sm:$0xff]  ;;  %v372_v13 = vld [vmem:[#allocation5 + $0x998] sm:$0xff] }
  0x9a   :  { %2686 = vmatpush1.bf16.msra.mxu1 %v2685_v38  ;;  %2432 = vmatprep.subr.bf16.mxu0 %v2431_v39  ;;  %v299_v38 = vld [vmem:[#allocation5 + $0x750] sm:$0xff]  ;;  %v2707_v39 = vpack.c.bf16 %v304_v32, %v300_v31  ;;  %v2453_v45 = vpack.c.bf16 %v301_v37, %v297_v36  ;;  %v2727_v37 = vpack.c.bf16 %v344_v29, %v340_v28  ;;  %v376_v14 = vld [vmem:[#allocation5 + $0x9b8] sm:$0xff] }
  0x9b   :  { %2688 = vmatprep.subr.bf16.mxu1 %v2687_v43  ;;  %v308_v43 = vld [vmem:[#allocation5 + $0x798] sm:$0xff]  ;;  %v2709_v46 = vpack.c.bf16 %v303_v40, %v299_v38  ;;  %v339_v36 = vld [vmem:[#allocation5 + $0x890] sm:$0xff]  ;;  %v350_v40 = vld [vmem:[#allocation5 + $0x8e8] sm:$0xff] }
  0x9c   :  { %v343_v38 = vld [vmem:[#allocation5 + $0x8b0] sm:$0xff] }
  0x9d   :  { %2434 = vmatpush1.bf16.msra.mxu0 %v2433_v49  ;;  %v309_v49 = vld [vmem:[#allocation5 + $0x7a0] sm:$0xff] }
  0x9e   :  { %2690 = vmatpush1.bf16.msra.mxu1 %v2689_v50  ;;  %2436 = vmatprep.subr.bf16.mxu0 %v2435_v51  ;;  %v307_v50 = vld [vmem:[#allocation5 + $0x790] sm:$0xff]  ;;  %v2711_v51 = vpack.c.bf16 %v312_v44, %v308_v43  ;;  %v2457_v57 = vpack.c.bf16 %v309_v49, %v305_v48  ;;  %v2729_v44 = vpack.c.bf16 %v343_v38, %v339_v36  ;;  %v390_v36 = vld [vmem:[#allocation5 + $0xa28] sm:$0xff]  ;;  %v392_v38 = vld [vmem:[#allocation5 + $0xa38] sm:$0xff] }
  0x9f   :  { %2692 = vmatprep.subr.bf16.mxu1 %v2691_v55  ;;  %v316_v55 = vld [vmem:[#allocation5 + $0x7d8] sm:$0xff]  ;;  %v2713_v58 = vpack.c.bf16 %v311_v52, %v307_v50  ;;  %v347_v48 = vld [vmem:[#allocation5 + $0x8d0] sm:$0xff]  ;;  %v2731_v49 = vpack.c.bf16 %v352_v42, %v348_v41  ;;  %v358_v52 = vld [vmem:[#allocation5 + $0x928] sm:$0xff] }
  0xa0   :  { %v351_v50 = vld [vmem:[#allocation5 + $0x8f0] sm:$0xff]  ;;  %v385_v42 = vld [vmem:[#allocation5 + $0xa00] sm:$0xff] }
  0xa1   :  { %2438 = vmatpush1.bf16.msra.mxu0 %v2437_v61  ;;  %v317_v61 = vld [vmem:[#allocation5 + $0x7e0] sm:$0xff] }
  0xa2   :  { %2694 = vmatpush1.bf16.msra.mxu1 %v2693_v62  ;;  %2440 = vmatprep.subr.bf16.mxu0 %v2439_v63  ;;  %v315_v62 = vld [vmem:[#allocation5 + $0x7d0] sm:$0xff]  ;;  %v2715_v63 = vpack.c.bf16 %v320_v56, %v316_v55  ;;  %v2461_v5 = vpack.c.bf16 %v317_v61, %v313_v60  ;;  %v2733_v56 = vpack.c.bf16 %v351_v50, %v347_v48  ;;  %v398_v48 = vld [vmem:[#allocation5 + $0xa68] sm:$0xff]  ;;  %v400_v50 = vld [vmem:[#allocation5 + $0xa78] sm:$0xff] }
  0xa3   :  { %2696 = vmatprep.subr.bf16.mxu1 %v2695_v3  ;;  %v324_v3 = vld [vmem:[#allocation5 + $0x818] sm:$0xff]  ;;  %v2717_v6 = vpack.c.bf16 %v319_v0, %v315_v62  ;;  %v355_v60 = vld [vmem:[#allocation5 + $0x910] sm:$0xff]  ;;  %v2735_v61 = vpack.c.bf16 %v360_v54, %v356_v53  ;;  %v366_v0 = vld [vmem:[#allocation5 + $0x968] sm:$0xff] }
  0xa4   :  { %v359_v62 = vld [vmem:[#allocation5 + $0x930] sm:$0xff]  ;;  %v393_v54 = vld [vmem:[#allocation5 + $0xa40] sm:$0xff] }
  0xa5   :  { %2442 = vmatpush1.bf16.msra.mxu0 %v2441_v9  ;;  %v325_v9 = vld [vmem:[#allocation5 + $0x820] sm:$0xff] }
  0xa6   :  { %2698 = vmatpush1.bf16.msra.mxu1 %v2697_v10  ;;  %2444 = vmatprep.subr.bf16.mxu0 %v2443_v11  ;;  %v323_v10 = vld [vmem:[#allocation5 + $0x810] sm:$0xff]  ;;  %v2719_v11 = vpack.c.bf16 %v328_v4, %v324_v3  ;;  %v2465_v18 = vpack.c.bf16 %v325_v9, %v321_v8  ;;  %v2737_v4 = vpack.c.bf16 %v359_v62, %v355_v60  ;;  %v406_v60 = vld [vmem:[#allocation5 + $0xaa8] sm:$0xff]  ;;  %v408_v62 = vld [vmem:[#allocation5 + $0xab8] sm:$0xff] }
  0xa7   :  { %2700 = vmatprep.subr.bf16.mxu1 %v2699_v15  ;;  %v332_v15 = vld [vmem:[#allocation5 + $0x858] sm:$0xff]  ;;  %v2721_v19 = vpack.c.bf16 %v327_v12, %v323_v10  ;;  %v363_v8 = vld [vmem:[#allocation5 + $0x950] sm:$0xff]  ;;  %v2739_v9 = vpack.c.bf16 %v368_v2, %v364_v1  ;;  %v374_v12 = vld [vmem:[#allocation5 + $0x9a8] sm:$0xff] }
  0xa8   :  { %v2723_v24 = vpack.c.bf16 %v336_v16, %v332_v15  ;;  %v367_v10 = vld [vmem:[#allocation5 + $0x970] sm:$0xff]  ;;  %v401_v2 = vld [vmem:[#allocation5 + $0xa80] sm:$0xff] }
  0xa9   :  { %2446 = vmatpush1.bf16.msra.mxu0 %v2445_v21  ;;  %v329_v21 = vld [vmem:[#allocation5 + $0x840] sm:$0xff]  ;;  %v2741_v16 = vpack.c.bf16 %v367_v10, %v363_v8  ;;  %v414_v8 = vld [vmem:[#allocation5 + $0xae8] sm:$0xff]  ;;  %v416_v10 = vld [vmem:[#allocation5 + $0xaf8] sm:$0xff] }
  0xaa   :  { %2702 = vmatpush1.bf16.msra.mxu1 %v2701_v22  ;;  %2448 = vmatprep.subr.bf16.mxu0 %v2447_v23  ;;  %v333_v22 = vld [vmem:[#allocation5 + $0x860] sm:$0xff]  ;;  %v331_v23 = vld [vmem:[#allocation5 + $0x850] sm:$0xff] }
  0xab   :  { %2704 = vmatprep.subr.bf16.mxu1 %v2703_v27  ;;  %v342_v27 = vld [vmem:[#allocation5 + $0x8a8] sm:$0xff]  ;;  %v2469_v31 = vpack.c.bf16 %v333_v22, %v329_v21  ;;  %v2725_v32 = vpack.c.bf16 %v335_v25, %v331_v23  ;;  %v2743_v21 = vpack.c.bf16 %v376_v14, %v372_v13  ;;  %v375_v22 = vld [vmem:[#allocation5 + $0x9b0] sm:$0xff]  ;;  %v380_v25 = vld [vmem:[#allocation5 + $0x9d8] sm:$0xff] }
  0xac   :  { %v378_v23 = vld [vmem:[#allocation5 + $0x9c8] sm:$0xff]  ;;  %v409_v14 = vld [vmem:[#allocation5 + $0xac0] sm:$0xff] }
  0xad   :  { %2450 = vmatpush1.bf16.msra.mxu0 %v2449_v33  ;;  %v2471_v33 = vpack.c.bf16 %v342_v27, %v338_v26  ;;  %v384_v26 = vld [vmem:[#allocation5 + $0x9f8] sm:$0xff] }
  0xae   :  { %2706 = vmatpush1.bf16.msra.mxu1 %v2705_v34  ;;  %2452 = vmatprep.subr.bf16.mxu0 %v2451_v35  ;;  %v337_v34 = vld [vmem:[#allocation5 + $0x880] sm:$0xff] }
  0xaf   :  { %2708 = vmatprep.subr.bf16.mxu1 %v2707_v39  ;;  %v341_v35 = vld [vmem:[#allocation5 + $0x8a0] sm:$0xff]  ;;  %v346_v39 = vld [vmem:[#allocation5 + $0x8c8] sm:$0xff] }
  0xb0   :  { %v2473_v43 = vpack.c.bf16 %v341_v35, %v337_v34  ;;  %v383_v34 = vld [vmem:[#allocation5 + $0x9f0] sm:$0xff]  ;;  %v386_v35 = vld [vmem:[#allocation5 + $0xa08] sm:$0xff] }
  0xb1   :  { %2454 = vmatpush1.bf16.msra.mxu0 %v2453_v45  ;;  %v2475_v45 = vpack.c.bf16 %v350_v40, %v346_v39  ;;  %v2495_v41 = vpack.c.bf16 %v390_v36, %v386_v35 }
  0xb2   :  { %2710 = vmatpush1.bf16.msra.mxu1 %v2709_v46  ;;  %2456 = vmatprep.subr.bf16.mxu0 %v2455_v47  ;;  %v345_v46 = vld [vmem:[#allocation5 + $0x8c0] sm:$0xff] }
  0xb3   :  { %2712 = vmatprep.subr.bf16.mxu1 %v2711_v51  ;;  %v349_v47 = vld [vmem:[#allocation5 + $0x8e0] sm:$0xff]  ;;  %v354_v51 = vld [vmem:[#allocation5 + $0x908] sm:$0xff] }
  0xb4   :  { %v2477_v55 = vpack.c.bf16 %v349_v47, %v345_v46  ;;  %v391_v46 = vld [vmem:[#allocation5 + $0xa30] sm:$0xff]  ;;  %v394_v47 = vld [vmem:[#allocation5 + $0xa48] sm:$0xff] }
  0xb5   :  { %2458 = vmatpush1.bf16.msra.mxu0 %v2457_v57  ;;  %v2479_v57 = vpack.c.bf16 %v358_v52, %v354_v51  ;;  %v2499_v53 = vpack.c.bf16 %v398_v48, %v394_v47 }
  0xb6   :  { %2714 = vmatpush1.bf16.msra.mxu1 %v2713_v58  ;;  %2460 = vmatprep.subr.bf16.mxu0 %v2459_v59  ;;  %v353_v58 = vld [vmem:[#allocation5 + $0x900] sm:$0xff] }
  0xb7   :  { %2716 = vmatprep.subr.bf16.mxu1 %v2715_v63  ;;  %v357_v59 = vld [vmem:[#allocation5 + $0x920] sm:$0xff]  ;;  %v362_v63 = vld [vmem:[#allocation5 + $0x948] sm:$0xff] }
  0xb8   :  { %v2481_v3 = vpack.c.bf16 %v357_v59, %v353_v58  ;;  %v399_v58 = vld [vmem:[#allocation5 + $0xa70] sm:$0xff]  ;;  %v402_v59 = vld [vmem:[#allocation5 + $0xa88] sm:$0xff] }
  0xb9   :  { %2462 = vmatpush1.bf16.msra.mxu0 %v2461_v5  ;;  %v2483_v5 = vpack.c.bf16 %v366_v0, %v362_v63  ;;  %v2503_v1 = vpack.c.bf16 %v406_v60, %v402_v59 }
  0xba   :  { %2718 = vmatpush1.bf16.msra.mxu1 %v2717_v6  ;;  %2464 = vmatprep.subr.bf16.mxu0 %v2463_v7  ;;  %v361_v6 = vld [vmem:[#allocation5 + $0x940] sm:$0xff] }
  0xbb   :  { %2720 = vmatprep.subr.bf16.mxu1 %v2719_v11  ;;  %v365_v7 = vld [vmem:[#allocation5 + $0x960] sm:$0xff]  ;;  %v370_v11 = vld [vmem:[#allocation5 + $0x988] sm:$0xff] }
  0xbc   :  { %713 = vmatmul.mubr.f32.vlgmr.msra.gmra.mrb[0].mxu0 %v59_v17  ;;  %v2485_v15 = vpack.c.bf16 %v365_v7, %v361_v6  ;;  %v407_v6 = vld [vmem:[#allocation5 + $0xab0] sm:$0xff]  ;;  %v410_v7 = vld [vmem:[#allocation5 + $0xac8] sm:$0xff] }
  0xbd   :  { %2466 = vmatpush1.bf16.msra.mxu0 %v2465_v18  ;;  %997 = vmatmul.mubr.f32.vlgmr.msra.gmra.mrb[0].mxu1 %v59_v17  ;;  %v2487_v17 = vpack.c.bf16 %v374_v12, %v370_v11  ;;  %v369_v18 = vld [vmem:[#allocation5 + $0x980] sm:$0xff]  ;;  %v2507_v13 = vpack.c.bf16 %v414_v8, %v410_v7 }
  0xbe   :  { %2722 = vmatpush1.bf16.msra.mxu1 %v2721_v19  ;;  %2468 = vmatprep.subr.bf16.mxu0 %v2467_v20  ;;  %v373_v19 = vld [vmem:[#allocation5 + $0x9a0] sm:$0xff]  ;;  %v371_v20 = vld [vmem:[#allocation5 + $0x990] sm:$0xff] }
  0xbf   :  { %2724 = vmatprep.subr.bf16.mxu1 %v2723_v24  ;;  %783 = vmatprep.mubr.f32.mxu0 %v62_v30  ;;  %v382_v24 = vld [vmem:[#allocation5 + $0x9e8] sm:$0xff]  ;;  %v2489_v27 = vpack.c.bf16 %v373_v19, %v369_v18  ;;  %v2745_v28 = vpack.c.bf16 %v375_v22, %v371_v20  ;;  %v415_v18 = vld [vmem:[#allocation5 + $0xaf0] sm:$0xff]  ;;  %v424_v22 = vld [vmem:[#allocation5 + $0xb38] sm:$0xff] }
  0xc0   :  { %1067 = vmatprep.mubr.f32.mxu1 %v62_v30  ;;  %v2491_v29 = vpack.c.bf16 %v382_v24, %v378_v23  ;;  %v377_v30 = vld [vmem:[#allocation5 + $0x9c0] sm:$0xff]  ;;  %v418_v19 = vld [vmem:[#allocation5 + $0xb08] sm:$0xff] }
  0xc1   :  { %2470 = vmatpush1.bf16.msra.mxu0 %v2469_v31  ;;  %v381_v31 = vld [vmem:[#allocation5 + $0x9e0] sm:$0xff]  ;;  %v422_v20 = vld [vmem:[#allocation5 + $0xb28] sm:$0xff] }
  0xc2   :  { %2726 = vmatpush1.bf16.msra.mxu1 %v2725_v32  ;;  %2472 = vmatprep.subr.bf16.mxu0 %v2471_v33  ;;  %v379_v32 = vld [vmem:[#allocation5 + $0x9d0] sm:$0xff]  ;;  %v2747_v33 = vpack.c.bf16 %v384_v26, %v380_v25  ;;  %v2493_v39 = vpack.c.bf16 %v381_v31, %v377_v30  ;;  %v2511_v25 = vpack.c.bf16 %v422_v20, %v418_v19  ;;  %v417_v26 = vld [vmem:[#allocation5 + $0xb00] sm:$0xff]  ;;  %v426_v31 = vld [vmem:[#allocation5 + $0xb48] sm:$0xff] }
  0xc3   :  { %2728 = vmatprep.subr.bf16.mxu1 %v2727_v37  ;;  %v388_v37 = vld [vmem:[#allocation5 + $0xa18] sm:$0xff]  ;;  %v2749_v40 = vpack.c.bf16 %v383_v34, %v379_v32  ;;  %v423_v30 = vld [vmem:[#allocation5 + $0xb30] sm:$0xff]  ;;  %v430_v32 = vld [vmem:[#allocation5 + $0xb68] sm:$0xff] }
  0xc4   :  { %v432_v34 = vld [vmem:[#allocation5 + $0xb78] sm:$0xff]  ;;  %v61_v19 = vld [vmem:[#allocation2 + $0x20] sm:$0xff] }
  0xc5   :  { %2474 = vmatpush1.bf16.msra.mxu0 %v2473_v43  ;;  %v389_v43 = vld [vmem:[#allocation5 + $0xa20] sm:$0xff] }
  0xc6   :  { %2730 = vmatpush1.bf16.msra.mxu1 %v2729_v44  ;;  %2476 = vmatprep.subr.bf16.mxu0 %v2475_v45  ;;  %v387_v44 = vld [vmem:[#allocation5 + $0xa10] sm:$0xff]  ;;  %v2751_v45 = vpack.c.bf16 %v392_v38, %v388_v37  ;;  %v2497_v51 = vpack.c.bf16 %v389_v43, %v385_v42  ;;  %v2515_v37 = vpack.c.bf16 %v430_v32, %v426_v31  ;;  %v425_v38 = vld [vmem:[#allocation5 + $0xb40] sm:$0xff]  ;;  %v434_v43 = vld [vmem:[#allocation5 + $0xb88] sm:$0xff] }
  0xc7   :  { %2732 = vmatprep.subr.bf16.mxu1 %v2731_v49  ;;  %v396_v49 = vld [vmem:[#allocation5 + $0xa58] sm:$0xff]  ;;  %v2753_v52 = vpack.c.bf16 %v391_v46, %v387_v44  ;;  %v431_v42 = vld [vmem:[#allocation5 + $0xb70] sm:$0xff]  ;;  %v438_v44 = vld [vmem:[#allocation5 + $0xba8] sm:$0xff] }
  0xc8   :  { %v440_v46 = vld [vmem:[#allocation5 + $0xbb8] sm:$0xff] }
  0xc9   :  { %2478 = vmatpush1.bf16.msra.mxu0 %v2477_v55  ;;  %v397_v55 = vld [vmem:[#allocation5 + $0xa60] sm:$0xff]  ;;  %v472_v31 = vld [vmem:[#allocation5 + $0xcb8] sm:$0xff] }
  0xca   :  { %2734 = vmatpush1.bf16.msra.mxu1 %v2733_v56  ;;  %2480 = vmatprep.subr.bf16.mxu0 %v2479_v57  ;;  %v395_v56 = vld [vmem:[#allocation5 + $0xa50] sm:$0xff]  ;;  %v2755_v57 = vpack.c.bf16 %v400_v50, %v396_v49  ;;  %v2501_v63 = vpack.c.bf16 %v397_v55, %v393_v54  ;;  %v2519_v49 = vpack.c.bf16 %v438_v44, %v434_v43  ;;  %v433_v50 = vld [vmem:[#allocation5 + $0xb80] sm:$0xff]  ;;  %v442_v55 = vld [vmem:[#allocation5 + $0xbc8] sm:$0xff] }
  0xcb   :  { %2736 = vmatprep.subr.bf16.mxu1 %v2735_v61  ;;  %v404_v61 = vld [vmem:[#allocation5 + $0xa98] sm:$0xff]  ;;  %v2757_v0 = vpack.c.bf16 %v399_v58, %v395_v56  ;;  %v439_v54 = vld [vmem:[#allocation5 + $0xbb0] sm:$0xff]  ;;  %v446_v56 = vld [vmem:[#allocation5 + $0xbe8] sm:$0xff] }
  0xcc   :  { %v448_v58 = vld [vmem:[#allocation5 + $0xbf8] sm:$0xff] }
  0xcd   :  { %2482 = vmatpush1.bf16.msra.mxu0 %v2481_v3  ;;  %v405_v3 = vld [vmem:[#allocation5 + $0xaa0] sm:$0xff]  ;;  %v64_v32 = vld [vmem:[#allocation2 + $0x38] sm:$0xff] }
  0xce   :  { %2738 = vmatpush1.bf16.msra.mxu1 %v2737_v4  ;;  %2484 = vmatprep.subr.bf16.mxu0 %v2483_v5  ;;  %v403_v4 = vld [vmem:[#allocation5 + $0xa90] sm:$0xff]  ;;  %v2759_v5 = vpack.c.bf16 %v408_v62, %v404_v61  ;;  %v2505_v11 = vpack.c.bf16 %v405_v3, %v401_v2  ;;  %v2523_v61 = vpack.c.bf16 %v446_v56, %v442_v55  ;;  %v441_v62 = vld [vmem:[#allocation5 + $0xbc0] sm:$0xff]  ;;  %v450_v3 = vld [vmem:[#allocation5 + $0xc08] sm:$0xff] }
  0xcf   :  { %2740 = vmatprep.subr.bf16.mxu1 %v2739_v9  ;;  %v412_v9 = vld [vmem:[#allocation5 + $0xad8] sm:$0xff]  ;;  %v2761_v12 = vpack.c.bf16 %v407_v6, %v403_v4  ;;  %v447_v2 = vld [vmem:[#allocation5 + $0xbf0] sm:$0xff]  ;;  %v454_v4 = vld [vmem:[#allocation5 + $0xc28] sm:$0xff] }
  0xd0   :  { %v456_v6 = vld [vmem:[#allocation5 + $0xc38] sm:$0xff] }
  0xd1   :  { %2486 = vmatpush1.bf16.msra.mxu0 %v2485_v15  ;;  %v413_v15 = vld [vmem:[#allocation5 + $0xae0] sm:$0xff]  ;;  %v476_v43 = vld [vmem:[#allocation5 + $0xcd8] sm:$0xff] }
  0xd2   :  { %2742 = vmatpush1.bf16.msra.mxu1 %v2741_v16  ;;  %2488 = vmatprep.subr.bf16.mxu0 %v2487_v17  ;;  %v411_v16 = vld [vmem:[#allocation5 + $0xad0] sm:$0xff]  ;;  %v2763_v17 = vpack.c.bf16 %v416_v10, %v412_v9  ;;  %v2509_v23 = vpack.c.bf16 %v413_v15, %v409_v14  ;;  %v2527_v9 = vpack.c.bf16 %v454_v4, %v450_v3  ;;  %v449_v10 = vld [vmem:[#allocation5 + $0xc00] sm:$0xff]  ;;  %v458_v15 = vld [vmem:[#allocation5 + $0xc48] sm:$0xff] }
  0xd3   :  { %2744 = vmatprep.subr.bf16.mxu1 %v2743_v21  ;;  %v420_v21 = vld [vmem:[#allocation5 + $0xb18] sm:$0xff]  ;;  %v2765_v24 = vpack.c.bf16 %v415_v18, %v411_v16  ;;  %v455_v14 = vld [vmem:[#allocation5 + $0xc30] sm:$0xff]  ;;  %v462_v16 = vld [vmem:[#allocation5 + $0xc68] sm:$0xff] }
  0xd4   :  { %v464_v18 = vld [vmem:[#allocation5 + $0xc78] sm:$0xff] }
  0xd5   :  { %2490 = vmatpush1.bf16.msra.mxu0 %v2489_v27  ;;  %v421_v27 = vld [vmem:[#allocation5 + $0xb20] sm:$0xff]  ;;  %v480_v44 = vld [vmem:[#allocation5 + $0xcf8] sm:$0xff] }
  0xd6   :  { %2746 = vmatpush1.bf16.msra.mxu1 %v2745_v28  ;;  %2492 = vmatprep.subr.bf16.mxu0 %v2491_v29  ;;  %v419_v28 = vld [vmem:[#allocation5 + $0xb10] sm:$0xff]  ;;  %v2767_v29 = vpack.c.bf16 %v424_v22, %v420_v21  ;;  %v2513_v35 = vpack.c.bf16 %v421_v27, %v417_v26  ;;  %v2531_v22 = vpack.c.bf16 %v462_v16, %v458_v15  ;;  %v484_v55 = vld [vmem:[#allocation5 + $0xd18] sm:$0xff] }
  0xd7   :  { %2748 = vmatprep.subr.bf16.mxu1 %v2747_v33  ;;  %v428_v33 = vld [vmem:[#allocation5 + $0xb58] sm:$0xff]  ;;  %v2769_v36 = vpack.c.bf16 %v423_v30, %v419_v28  ;;  %v463_v27 = vld [vmem:[#allocation5 + $0xc70] sm:$0xff]  ;;  %v466_v28 = vld [vmem:[#allocation5 + $0xc88] sm:$0xff] }
  0xd8   :  { %v468_v30 = vld [vmem:[#allocation5 + $0xc98] sm:$0xff] }
  0xd9   :  { %2494 = vmatpush1.bf16.msra.mxu0 %v2493_v39  ;;  %v429_v39 = vld [vmem:[#allocation5 + $0xb60] sm:$0xff]  ;;  %v488_v56 = vld [vmem:[#allocation5 + $0xd38] sm:$0xff] }
  0xda   :  { %2750 = vmatpush1.bf16.msra.mxu1 %v2749_v40  ;;  %2496 = vmatprep.subr.bf16.mxu0 %v2495_v41  ;;  %v427_v40 = vld [vmem:[#allocation5 + $0xb50] sm:$0xff]  ;;  %v2771_v41 = vpack.c.bf16 %v432_v34, %v428_v33  ;;  %v2517_v47 = vpack.c.bf16 %v429_v39, %v425_v38  ;;  %v2791_v39 = vpack.c.bf16 %v472_v31, %v468_v30  ;;  %v492_v3 = vld [vmem:[#allocation5 + $0xd58] sm:$0xff] }
  0xdb   :  { %2752 = vmatprep.subr.bf16.mxu1 %v2751_v45  ;;  %v436_v45 = vld [vmem:[#allocation5 + $0xb98] sm:$0xff]  ;;  %v2773_v48 = vpack.c.bf16 %v431_v42, %v427_v40  ;;  %v467_v38 = vld [vmem:[#allocation5 + $0xc90] sm:$0xff]  ;;  %v478_v42 = vld [vmem:[#allocation5 + $0xce8] sm:$0xff] }
  0xdc   :  { %v471_v40 = vld [vmem:[#allocation5 + $0xcb0] sm:$0xff]  ;;  %v496_v4 = vld [vmem:[#allocation5 + $0xd78] sm:$0xff] }
  0xdd   :  { %2498 = vmatpush1.bf16.msra.mxu0 %v2497_v51  ;;  %v437_v51 = vld [vmem:[#allocation5 + $0xba0] sm:$0xff]  ;;  %v500_v15 = vld [vmem:[#allocation5 + $0xd98] sm:$0xff] }
  0xde   :  { %2754 = vmatpush1.bf16.msra.mxu1 %v2753_v52  ;;  %2500 = vmatprep.subr.bf16.mxu0 %v2499_v53  ;;  %v435_v52 = vld [vmem:[#allocation5 + $0xb90] sm:$0xff]  ;;  %v2775_v53 = vpack.c.bf16 %v440_v46, %v436_v45  ;;  %v2521_v59 = vpack.c.bf16 %v437_v51, %v433_v50  ;;  %v2793_v46 = vpack.c.bf16 %v471_v40, %v467_v38  ;;  %v504_v16 = vld [vmem:[#allocation5 + $0xdb8] sm:$0xff]  ;;  %v518_v38 = vld [vmem:[#allocation5 + $0xe28] sm:$0xff] }
  0xdf   :  { %2756 = vmatprep.subr.bf16.mxu1 %v2755_v57  ;;  %v444_v57 = vld [vmem:[#allocation5 + $0xbd8] sm:$0xff]  ;;  %v2777_v60 = vpack.c.bf16 %v439_v54, %v435_v52  ;;  %v475_v50 = vld [vmem:[#allocation5 + $0xcd0] sm:$0xff]  ;;  %v2795_v51 = vpack.c.bf16 %v480_v44, %v476_v43  ;;  %v486_v54 = vld [vmem:[#allocation5 + $0xd28] sm:$0xff] }
  0xe0   :  { %v479_v52 = vld [vmem:[#allocation5 + $0xcf0] sm:$0xff]  ;;  %v520_v40 = vld [vmem:[#allocation5 + $0xe38] sm:$0xff]  ;;  %v513_v44 = vld [vmem:[#allocation5 + $0xe00] sm:$0xff] }
  0xe1   :  { %2502 = vmatpush1.bf16.msra.mxu0 %v2501_v63  ;;  %v445_v63 = vld [vmem:[#allocation5 + $0xbe0] sm:$0xff] }
  0xe2   :  { %2758 = vmatpush1.bf16.msra.mxu1 %v2757_v0  ;;  %2504 = vmatprep.subr.bf16.mxu0 %v2503_v1  ;;  %v443_v0 = vld [vmem:[#allocation5 + $0xbd0] sm:$0xff]  ;;  %v2779_v1 = vpack.c.bf16 %v448_v58, %v444_v57  ;;  %v2525_v7 = vpack.c.bf16 %v445_v63, %v441_v62  ;;  %v2797_v58 = vpack.c.bf16 %v479_v52, %v475_v50  ;;  %v526_v50 = vld [vmem:[#allocation5 + $0xe68] sm:$0xff]  ;;  %v528_v52 = vld [vmem:[#allocation5 + $0xe78] sm:$0xff] }
  0xe3   :  { %2760 = vmatprep.subr.bf16.mxu1 %v2759_v5  ;;  %v452_v5 = vld [vmem:[#allocation5 + $0xc18] sm:$0xff]  ;;  %v2781_v8 = vpack.c.bf16 %v447_v2, %v443_v0  ;;  %v483_v62 = vld [vmem:[#allocation5 + $0xd10] sm:$0xff]  ;;  %v2799_v63 = vpack.c.bf16 %v488_v56, %v484_v55  ;;  %v494_v2 = vld [vmem:[#allocation5 + $0xd68] sm:$0xff] }
  0xe4   :  { %v487_v0 = vld [vmem:[#allocation5 + $0xd30] sm:$0xff]  ;;  %v521_v56 = vld [vmem:[#allocation5 + $0xe40] sm:$0xff] }
  0xe5   :  { %2506 = vmatpush1.bf16.msra.mxu0 %v2505_v11  ;;  %v453_v11 = vld [vmem:[#allocation5 + $0xc20] sm:$0xff] }
  0xe6   :  { %2762 = vmatpush1.bf16.msra.mxu1 %v2761_v12  ;;  %2508 = vmatprep.subr.bf16.mxu0 %v2507_v13  ;;  %v451_v12 = vld [vmem:[#allocation5 + $0xc10] sm:$0xff]  ;;  %v2783_v13 = vpack.c.bf16 %v456_v6, %v452_v5  ;;  %v2529_v20 = vpack.c.bf16 %v453_v11, %v449_v10  ;;  %v2801_v6 = vpack.c.bf16 %v487_v0, %v483_v62  ;;  %v534_v62 = vld [vmem:[#allocation5 + $0xea8] sm:$0xff]  ;;  %v536_v0 = vld [vmem:[#allocation5 + $0xeb8] sm:$0xff] }
  0xe7   :  { %2764 = vmatprep.subr.bf16.mxu1 %v2763_v17  ;;  %v460_v17 = vld [vmem:[#allocation5 + $0xc58] sm:$0xff]  ;;  %v2785_v21 = vpack.c.bf16 %v455_v14, %v451_v12  ;;  %v491_v10 = vld [vmem:[#allocation5 + $0xd50] sm:$0xff]  ;;  %v2803_v11 = vpack.c.bf16 %v496_v4, %v492_v3  ;;  %v502_v14 = vld [vmem:[#allocation5 + $0xda8] sm:$0xff] }
  0xe8   :  { %v2787_v26 = vpack.c.bf16 %v464_v18, %v460_v17  ;;  %v495_v12 = vld [vmem:[#allocation5 + $0xd70] sm:$0xff]  ;;  %v529_v4 = vld [vmem:[#allocation5 + $0xe80] sm:$0xff] }
  0xe9   :  { %2510 = vmatpush1.bf16.msra.mxu0 %v2509_v23  ;;  %v457_v23 = vld [vmem:[#allocation5 + $0xc40] sm:$0xff]  ;;  %v2805_v18 = vpack.c.bf16 %v495_v12, %v491_v10  ;;  %v542_v10 = vld [vmem:[#allocation5 + $0xee8] sm:$0xff]  ;;  %v544_v12 = vld [vmem:[#allocation5 + $0xef8] sm:$0xff] }
  0xea   :  { %2766 = vmatpush1.bf16.msra.mxu1 %v2765_v24  ;;  %2512 = vmatprep.subr.bf16.mxu0 %v2511_v25  ;;  %v461_v24 = vld [vmem:[#allocation5 + $0xc60] sm:$0xff]  ;;  %v459_v25 = vld [vmem:[#allocation5 + $0xc50] sm:$0xff] }
  0xeb   :  { %2768 = vmatprep.subr.bf16.mxu1 %v2767_v29  ;;  %v470_v29 = vld [vmem:[#allocation5 + $0xca8] sm:$0xff]  ;;  %v2533_v33 = vpack.c.bf16 %v461_v24, %v457_v23  ;;  %v2789_v34 = vpack.c.bf16 %v463_v27, %v459_v25  ;;  %v2807_v23 = vpack.c.bf16 %v504_v16, %v500_v15  ;;  %v503_v24 = vld [vmem:[#allocation5 + $0xdb0] sm:$0xff]  ;;  %v508_v27 = vld [vmem:[#allocation5 + $0xdd8] sm:$0xff] }
  0xec   :  { %v506_v25 = vld [vmem:[#allocation5 + $0xdc8] sm:$0xff]  ;;  %v537_v16 = vld [vmem:[#allocation5 + $0xec0] sm:$0xff] }
  0xed   :  { %2514 = vmatpush1.bf16.msra.mxu0 %v2513_v35  ;;  %v2535_v35 = vpack.c.bf16 %v470_v29, %v466_v28  ;;  %v512_v28 = vld [vmem:[#allocation5 + $0xdf8] sm:$0xff] }
  0xee   :  { %2770 = vmatpush1.bf16.msra.mxu1 %v2769_v36  ;;  %2516 = vmatprep.subr.bf16.mxu0 %v2515_v37  ;;  %v465_v36 = vld [vmem:[#allocation5 + $0xc80] sm:$0xff] }
  0xef   :  { %2772 = vmatprep.subr.bf16.mxu1 %v2771_v41  ;;  %v469_v37 = vld [vmem:[#allocation5 + $0xca0] sm:$0xff]  ;;  %v474_v41 = vld [vmem:[#allocation5 + $0xcc8] sm:$0xff] }
  0xf0   :  { %v2537_v45 = vpack.c.bf16 %v469_v37, %v465_v36  ;;  %v511_v36 = vld [vmem:[#allocation5 + $0xdf0] sm:$0xff]  ;;  %v514_v37 = vld [vmem:[#allocation5 + $0xe08] sm:$0xff] }
  0xf1   :  { %2518 = vmatpush1.bf16.msra.mxu0 %v2517_v47  ;;  %v2539_v47 = vpack.c.bf16 %v478_v42, %v474_v41  ;;  %v2559_v43 = vpack.c.bf16 %v518_v38, %v514_v37 }
  0xf2   :  { %2774 = vmatpush1.bf16.msra.mxu1 %v2773_v48  ;;  %2520 = vmatprep.subr.bf16.mxu0 %v2519_v49  ;;  %v473_v48 = vld [vmem:[#allocation5 + $0xcc0] sm:$0xff] }
  0xf3   :  { %2776 = vmatprep.subr.bf16.mxu1 %v2775_v53  ;;  %v477_v49 = vld [vmem:[#allocation5 + $0xce0] sm:$0xff]  ;;  %v482_v53 = vld [vmem:[#allocation5 + $0xd08] sm:$0xff] }
  0xf4   :  { %v2541_v57 = vpack.c.bf16 %v477_v49, %v473_v48  ;;  %v519_v48 = vld [vmem:[#allocation5 + $0xe30] sm:$0xff]  ;;  %v522_v49 = vld [vmem:[#allocation5 + $0xe48] sm:$0xff] }
  0xf5   :  { %2522 = vmatpush1.bf16.msra.mxu0 %v2521_v59  ;;  %v2543_v59 = vpack.c.bf16 %v486_v54, %v482_v53  ;;  %v2563_v55 = vpack.c.bf16 %v526_v50, %v522_v49 }
  0xf6   :  { %2778 = vmatpush1.bf16.msra.mxu1 %v2777_v60  ;;  %2524 = vmatprep.subr.bf16.mxu0 %v2523_v61  ;;  %v481_v60 = vld [vmem:[#allocation5 + $0xd00] sm:$0xff] }
  0xf7   :  { %2780 = vmatprep.subr.bf16.mxu1 %v2779_v1  ;;  %v485_v61 = vld [vmem:[#allocation5 + $0xd20] sm:$0xff]  ;;  %v490_v1 = vld [vmem:[#allocation5 + $0xd48] sm:$0xff] }
  0xf8   :  { %v2545_v5 = vpack.c.bf16 %v485_v61, %v481_v60  ;;  %v527_v60 = vld [vmem:[#allocation5 + $0xe70] sm:$0xff]  ;;  %v530_v61 = vld [vmem:[#allocation5 + $0xe88] sm:$0xff] }
  0xf9   :  { %2526 = vmatpush1.bf16.msra.mxu0 %v2525_v7  ;;  %v2547_v7 = vpack.c.bf16 %v494_v2, %v490_v1  ;;  %v2567_v3 = vpack.c.bf16 %v534_v62, %v530_v61 }
  0xfa   :  { %2782 = vmatpush1.bf16.msra.mxu1 %v2781_v8  ;;  %2528 = vmatprep.subr.bf16.mxu0 %v2527_v9  ;;  %v489_v8 = vld [vmem:[#allocation5 + $0xd40] sm:$0xff] }
  0xfb   :  { %2784 = vmatprep.subr.bf16.mxu1 %v2783_v13  ;;  %v493_v9 = vld [vmem:[#allocation5 + $0xd60] sm:$0xff]  ;;  %v498_v13 = vld [vmem:[#allocation5 + $0xd88] sm:$0xff] }
  0xfc   :  { %784 = vmatmul.mubr.f32.vlgmr.msra.gmra.mrb[0].mxu0 %v61_v19  ;;  %v2549_v17 = vpack.c.bf16 %v493_v9, %v489_v8  ;;  %v535_v8 = vld [vmem:[#allocation5 + $0xeb0] sm:$0xff]  ;;  %v538_v9 = vld [vmem:[#allocation5 + $0xec8] sm:$0xff] }
  0xfd   :  { %2530 = vmatpush1.bf16.msra.mxu0 %v2529_v20  ;;  %1068 = vmatmul.mubr.f32.vlgmr.msra.gmra.mrb[0].mxu1 %v61_v19  ;;  %v2551_v19 = vpack.c.bf16 %v502_v14, %v498_v13  ;;  %v497_v20 = vld [vmem:[#allocation5 + $0xd80] sm:$0xff]  ;;  %v2571_v15 = vpack.c.bf16 %v542_v10, %v538_v9 }
  0xfe   :  { %2786 = vmatpush1.bf16.msra.mxu1 %v2785_v21  ;;  %2532 = vmatprep.subr.bf16.mxu0 %v2531_v22  ;;  %v501_v21 = vld [vmem:[#allocation5 + $0xda0] sm:$0xff]  ;;  %v499_v22 = vld [vmem:[#allocation5 + $0xd90] sm:$0xff] }
  0xff   :  { %2788 = vmatprep.subr.bf16.mxu1 %v2787_v26  ;;  %854 = vmatprep.mubr.f32.mxu0 %v64_v32  ;;  %v510_v26 = vld [vmem:[#allocation5 + $0xde8] sm:$0xff]  ;;  %v2553_v29 = vpack.c.bf16 %v501_v21, %v497_v20  ;;  %v2809_v30 = vpack.c.bf16 %v503_v24, %v499_v22  ;;  %v543_v20 = vld [vmem:[#allocation5 + $0xef0] sm:$0xff]  ;;  %v552_v24 = vld [vmem:[#allocation5 + $0xf38] sm:$0xff] }
 0x100   :  { %1138 = vmatprep.mubr.f32.mxu1 %v64_v32  ;;  %v2555_v31 = vpack.c.bf16 %v510_v26, %v506_v25  ;;  %v505_v32 = vld [vmem:[#allocation5 + $0xdc0] sm:$0xff]  ;;  %v546_v21 = vld [vmem:[#allocation5 + $0xf08] sm:$0xff] }
 0x101   :  { %2534 = vmatpush1.bf16.msra.mxu0 %v2533_v33  ;;  %v509_v33 = vld [vmem:[#allocation5 + $0xde0] sm:$0xff]  ;;  %v550_v22 = vld [vmem:[#allocation5 + $0xf28] sm:$0xff] }
 0x102   :  { %2790 = vmatpush1.bf16.msra.mxu1 %v2789_v34  ;;  %2536 = vmatprep.subr.bf16.mxu0 %v2535_v35  ;;  %v507_v34 = vld [vmem:[#allocation5 + $0xdd0] sm:$0xff]  ;;  %v2811_v35 = vpack.c.bf16 %v512_v28, %v508_v27  ;;  %v2557_v41 = vpack.c.bf16 %v509_v33, %v505_v32  ;;  %v2575_v27 = vpack.c.bf16 %v550_v22, %v546_v21  ;;  %v545_v28 = vld [vmem:[#allocation5 + $0xf00] sm:$0xff]  ;;  %v554_v33 = vld [vmem:[#allocation5 + $0xf48] sm:$0xff] }
 0x103   :  { %2792 = vmatprep.subr.bf16.mxu1 %v2791_v39  ;;  %v516_v39 = vld [vmem:[#allocation5 + $0xe18] sm:$0xff]  ;;  %v2813_v42 = vpack.c.bf16 %v511_v36, %v507_v34  ;;  %v551_v32 = vld [vmem:[#allocation5 + $0xf30] sm:$0xff]  ;;  %v558_v34 = vld [vmem:[#allocation5 + $0xf68] sm:$0xff] }
 0x104   :  { %v560_v36 = vld [vmem:[#allocation5 + $0xf78] sm:$0xff]  ;;  %v63_v21 = vld [vmem:[#allocation2 + $0x30] sm:$0xff] }
 0x105   :  { %2538 = vmatpush1.bf16.msra.mxu0 %v2537_v45  ;;  %v517_v45 = vld [vmem:[#allocation5 + $0xe20] sm:$0xff] }
 0x106   :  { %2794 = vmatpush1.bf16.msra.mxu1 %v2793_v46  ;;  %2540 = vmatprep.subr.bf16.mxu0 %v2539_v47  ;;  %v515_v46 = vld [vmem:[#allocation5 + $0xe10] sm:$0xff]  ;;  %v2815_v47 = vpack.c.bf16 %v520_v40, %v516_v39  ;;  %v2561_v53 = vpack.c.bf16 %v517_v45, %v513_v44  ;;  %v2579_v39 = vpack.c.bf16 %v558_v34, %v554_v33  ;;  %v553_v40 = vld [vmem:[#allocation5 + $0xf40] sm:$0xff]  ;;  %v562_v45 = vld [vmem:[#allocation5 + $0xf88] sm:$0xff] }
 0x107   :  { %2796 = vmatprep.subr.bf16.mxu1 %v2795_v51  ;;  %v524_v51 = vld [vmem:[#allocation5 + $0xe58] sm:$0xff]  ;;  %v2817_v54 = vpack.c.bf16 %v519_v48, %v515_v46  ;;  %v559_v44 = vld [vmem:[#allocation5 + $0xf70] sm:$0xff]  ;;  %v566_v46 = vld [vmem:[#allocation5 + $0xfa8] sm:$0xff] }
 0x108   :  { %v568_v48 = vld [vmem:[#allocation5 + $0xfb8] sm:$0xff] }
 0x109   :  { %2542 = vmatpush1.bf16.msra.mxu0 %v2541_v57  ;;  %v525_v57 = vld [vmem:[#allocation5 + $0xe60] sm:$0xff]  ;;  %v1196_v33 = vld [vmem:[#allocation7 + $0x158] sm:$0xff] }
 0x10a   :  { %2798 = vmatpush1.bf16.msra.mxu1 %v2797_v58  ;;  %2544 = vmatprep.subr.bf16.mxu0 %v2543_v59  ;;  %v523_v58 = vld [vmem:[#allocation5 + $0xe50] sm:$0xff]  ;;  %v2819_v59 = vpack.c.bf16 %v528_v52, %v524_v51  ;;  %v2565_v1 = vpack.c.bf16 %v525_v57, %v521_v56  ;;  %v2583_v51 = vpack.c.bf16 %v566_v46, %v562_v45  ;;  %v561_v52 = vld [vmem:[#allocation5 + $0xf80] sm:$0xff]  ;;  %v570_v57 = vld [vmem:[#allocation5 + $0xfc8] sm:$0xff] }
 0x10b   :  { %2800 = vmatprep.subr.bf16.mxu1 %v2799_v63  ;;  %v532_v63 = vld [vmem:[#allocation5 + $0xe98] sm:$0xff]  ;;  %v2821_v2 = vpack.c.bf16 %v527_v60, %v523_v58  ;;  %v567_v56 = vld [vmem:[#allocation5 + $0xfb0] sm:$0xff]  ;;  %v574_v58 = vld [vmem:[#allocation5 + $0xfe8] sm:$0xff] }
 0x10c   :  { %v576_v60 = vld [vmem:[#allocation5 + $0xff8] sm:$0xff] }
 0x10d   :  { %2546 = vmatpush1.bf16.msra.mxu0 %v2545_v5  ;;  %v533_v5 = vld [vmem:[#allocation5 + $0xea0] sm:$0xff]  ;;  %v1212_v45 = vld [vmem:[#allocation7 + $0x1d8] sm:$0xff] }
 0x10e   :  { %2802 = vmatpush1.bf16.msra.mxu1 %v2801_v6  ;;  %2548 = vmatprep.subr.bf16.mxu0 %v2547_v7  ;;  %v531_v6 = vld [vmem:[#allocation5 + $0xe90] sm:$0xff]  ;;  %v2823_v7 = vpack.c.bf16 %v536_v0, %v532_v63  ;;  %v2569_v13 = vpack.c.bf16 %v533_v5, %v529_v4  ;;  %v2587_v63 = vpack.c.bf16 %v574_v58, %v570_v57  ;;  %v569_v0 = vld [vmem:[#allocation5 + $0xfc0] sm:$0xff]  ;;  %v1154_v5 = vld [vmem:[#allocation7 + $0x8] sm:$0xff] }
 0x10f   :  { %2804 = vmatprep.subr.bf16.mxu1 %v2803_v11  ;;  %v540_v11 = vld [vmem:[#allocation5 + $0xed8] sm:$0xff]  ;;  %v2825_v14 = vpack.c.bf16 %v535_v8, %v531_v6  ;;  %v575_v4 = vld [vmem:[#allocation5 + $0xff0] sm:$0xff]  ;;  %v1162_v6 = vld [vmem:[#allocation7 + $0x48] sm:$0xff] }
 0x110   :  { %v1164_v8 = vld [vmem:[#allocation7 + $0x58] sm:$0xff] }
 0x111   :  { %2550 = vmatpush1.bf16.msra.mxu0 %v2549_v17  ;;  %v541_v17 = vld [vmem:[#allocation5 + $0xee0] sm:$0xff]  ;;  %v1228_v57 = vld [vmem:[#allocation7 + $0x258] sm:$0xff] }
 0x112   :  { %2806 = vmatpush1.bf16.msra.mxu1 %v2805_v18  ;;  %2552 = vmatprep.subr.bf16.mxu0 %v2551_v19  ;;  %v539_v18 = vld [vmem:[#allocation5 + $0xed0] sm:$0xff]  ;;  %v2827_v19 = vpack.c.bf16 %v544_v12, %v540_v11  ;;  %v2573_v25 = vpack.c.bf16 %v541_v17, %v537_v16  ;;  %v2847_v11 = vpack.c.bf16 %v1162_v6, %v1154_v5  ;;  %v1153_v12 = vld [vmem:[#allocation7] sm:$0xff]  ;;  %v1170_v17 = vld [vmem:[#allocation7 + $0x88] sm:$0xff] }
 0x113   :  { %2808 = vmatprep.subr.bf16.mxu1 %v2807_v23  ;;  %v548_v23 = vld [vmem:[#allocation5 + $0xf18] sm:$0xff]  ;;  %v2829_v26 = vpack.c.bf16 %v543_v20, %v539_v18  ;;  %v1163_v16 = vld [vmem:[#allocation7 + $0x50] sm:$0xff]  ;;  %v1178_v18 = vld [vmem:[#allocation7 + $0xc8] sm:$0xff] }
 0x114   :  { %v1180_v20 = vld [vmem:[#allocation7 + $0xd8] sm:$0xff] }
 0x115   :  { %2554 = vmatpush1.bf16.msra.mxu0 %v2553_v29  ;;  %v549_v29 = vld [vmem:[#allocation5 + $0xf20] sm:$0xff]  ;;  %v1244_v5 = vld [vmem:[#allocation7 + $0x2d8] sm:$0xff] }
 0x116   :  { %2810 = vmatpush1.bf16.msra.mxu1 %v2809_v30  ;;  %2556 = vmatprep.subr.bf16.mxu0 %v2555_v31  ;;  %v547_v30 = vld [vmem:[#allocation5 + $0xf10] sm:$0xff]  ;;  %v2831_v31 = vpack.c.bf16 %v552_v24, %v548_v23  ;;  %v2577_v37 = vpack.c.bf16 %v549_v29, %v545_v28  ;;  %v2851_v24 = vpack.c.bf16 %v1178_v18, %v1170_v17  ;;  %v1260_v17 = vld [vmem:[#allocation7 + $0x358] sm:$0xff] }
 0x117   :  { %2812 = vmatprep.subr.bf16.mxu1 %v2811_v35  ;;  %v556_v35 = vld [vmem:[#allocation5 + $0xf58] sm:$0xff]  ;;  %v2833_v38 = vpack.c.bf16 %v551_v32, %v547_v30  ;;  %v1179_v29 = vld [vmem:[#allocation7 + $0xd0] sm:$0xff]  ;;  %v1186_v30 = vld [vmem:[#allocation7 + $0x108] sm:$0xff] }
 0x118   :  { %v1188_v32 = vld [vmem:[#allocation7 + $0x118] sm:$0xff] }
 0x119   :  { %2558 = vmatpush1.bf16.msra.mxu0 %v2557_v41  ;;  %v557_v41 = vld [vmem:[#allocation5 + $0xf60] sm:$0xff] }
 0x11a   :  { %2814 = vmatpush1.bf16.msra.mxu1 %v2813_v42  ;;  %2560 = vmatprep.subr.bf16.mxu0 %v2559_v43  ;;  %v555_v42 = vld [vmem:[#allocation5 + $0xf50] sm:$0xff]  ;;  %v2835_v43 = vpack.c.bf16 %v560_v36, %v556_v35  ;;  %v2581_v49 = vpack.c.bf16 %v557_v41, %v553_v40  ;;  %v2983_v40 = vpack.c.bf16 %v1196_v33, %v1188_v32  ;;  %v1265_v33 = vld [vmem:[#allocation7 + $0x380] sm:$0xff] }
 0x11b   :  { %2816 = vmatprep.subr.bf16.mxu1 %v2815_v47  ;;  %v564_v47 = vld [vmem:[#allocation5 + $0xf98] sm:$0xff]  ;;  %v2837_v50 = vpack.c.bf16 %v559_v44, %v555_v42  ;;  %v1195_v41 = vld [vmem:[#allocation7 + $0x150] sm:$0xff]  ;;  %v1202_v42 = vld [vmem:[#allocation7 + $0x188] sm:$0xff] }
 0x11c   :  { %v1204_v44 = vld [vmem:[#allocation7 + $0x198] sm:$0xff] }
 0x11d   :  { %2562 = vmatpush1.bf16.msra.mxu0 %v2561_v53  ;;  %v565_v53 = vld [vmem:[#allocation5 + $0xfa0] sm:$0xff] }
 0x11e   :  { %2818 = vmatpush1.bf16.msra.mxu1 %v2817_v54  ;;  %2564 = vmatprep.subr.bf16.mxu0 %v2563_v55  ;;  %v563_v54 = vld [vmem:[#allocation5 + $0xf90] sm:$0xff]  ;;  %v2839_v55 = vpack.c.bf16 %v568_v48, %v564_v47  ;;  %v2585_v61 = vpack.c.bf16 %v565_v53, %v561_v52  ;;  %v2987_v52 = vpack.c.bf16 %v1212_v45, %v1204_v44  ;;  %v1281_v45 = vld [vmem:[#allocation7 + $0x400] sm:$0xff] }
 0x11f   :  { %2820 = vmatprep.subr.bf16.mxu1 %v2819_v59  ;;  %v572_v59 = vld [vmem:[#allocation5 + $0xfd8] sm:$0xff]  ;;  %v2841_v62 = vpack.c.bf16 %v567_v56, %v563_v54  ;;  %v1211_v53 = vld [vmem:[#allocation7 + $0x1d0] sm:$0xff]  ;;  %v1218_v54 = vld [vmem:[#allocation7 + $0x208] sm:$0xff] }
 0x120   :  { %v1220_v56 = vld [vmem:[#allocation7 + $0x218] sm:$0xff] }
 0x121   :  { %2566 = vmatpush1.bf16.msra.mxu0 %v2565_v1  ;;  %v573_v1 = vld [vmem:[#allocation5 + $0xfe0] sm:$0xff] }
 0x122   :  { %2822 = vmatpush1.bf16.msra.mxu1 %v2821_v2  ;;  %2568 = vmatprep.subr.bf16.mxu0 %v2567_v3  ;;  %v571_v2 = vld [vmem:[#allocation5 + $0xfd0] sm:$0xff]  ;;  %v2843_v3 = vpack.c.bf16 %v576_v60, %v572_v59  ;;  %v2589_v9 = vpack.c.bf16 %v573_v1, %v569_v0  ;;  %v2991_v0 = vpack.c.bf16 %v1228_v57, %v1220_v56  ;;  %v1297_v57 = vld [vmem:[#allocation7 + $0x480] sm:$0xff] }
 0x123   :  { %2824 = vmatprep.subr.bf16.mxu1 %v2823_v7  ;;  %v1156_v7 = vld [vmem:[#allocation7 + $0x18] sm:$0xff]  ;;  %v2845_v10 = vpack.c.bf16 %v575_v4, %v571_v2  ;;  %v1227_v1 = vld [vmem:[#allocation7 + $0x250] sm:$0xff]  ;;  %v1234_v2 = vld [vmem:[#allocation7 + $0x288] sm:$0xff] }
 0x124   :  { %v1236_v4 = vld [vmem:[#allocation7 + $0x298] sm:$0xff] }
 0x125   :  { %2570 = vmatpush1.bf16.msra.mxu0 %v2569_v13  ;;  %v1161_v13 = vld [vmem:[#allocation7 + $0x40] sm:$0xff] }
 0x126   :  { %2826 = vmatpush1.bf16.msra.mxu1 %v2825_v14  ;;  %2572 = vmatprep.subr.bf16.mxu0 %v2571_v15  ;;  %v1155_v14 = vld [vmem:[#allocation7 + $0x10] sm:$0xff]  ;;  %v2975_v15 = vpack.c.bf16 %v1164_v8, %v1156_v7  ;;  %v2849_v22 = vpack.c.bf16 %v1161_v13, %v1153_v12  ;;  %v2995_v12 = vpack.c.bf16 %v1244_v5, %v1236_v4  ;;  %v1313_v5 = vld [vmem:[#allocation7 + $0x500] sm:$0xff] }
 0x127   :  { %2828 = vmatprep.subr.bf16.mxu1 %v2827_v19  ;;  %v1172_v19 = vld [vmem:[#allocation7 + $0x98] sm:$0xff]  ;;  %v2977_v23 = vpack.c.bf16 %v1163_v16, %v1155_v14  ;;  %v1243_v13 = vld [vmem:[#allocation7 + $0x2d0] sm:$0xff]  ;;  %v1250_v14 = vld [vmem:[#allocation7 + $0x308] sm:$0xff] }
 0x128   :  { %v2979_v28 = vpack.c.bf16 %v1180_v20, %v1172_v19  ;;  %v1252_v16 = vld [vmem:[#allocation7 + $0x318] sm:$0xff] }
 0x129   :  { %2574 = vmatpush1.bf16.msra.mxu0 %v2573_v25  ;;  %v1169_v25 = vld [vmem:[#allocation7 + $0x80] sm:$0xff] }
 0x12a   :  { %2830 = vmatpush1.bf16.msra.mxu1 %v2829_v26  ;;  %2576 = vmatprep.subr.bf16.mxu0 %v2575_v27  ;;  %v1177_v26 = vld [vmem:[#allocation7 + $0xc0] sm:$0xff]  ;;  %v1171_v27 = vld [vmem:[#allocation7 + $0x90] sm:$0xff] }
 0x12b   :  { %2832 = vmatprep.subr.bf16.mxu1 %v2831_v31  ;;  %v1194_v31 = vld [vmem:[#allocation7 + $0x148] sm:$0xff]  ;;  %v2853_v34 = vpack.c.bf16 %v1177_v26, %v1169_v25  ;;  %v2981_v35 = vpack.c.bf16 %v1179_v29, %v1171_v27  ;;  %v1259_v25 = vld [vmem:[#allocation7 + $0x350] sm:$0xff]  ;;  %v1276_v29 = vld [vmem:[#allocation7 + $0x3d8] sm:$0xff] }
 0x12c   :  { %v2855_v36 = vpack.c.bf16 %v1194_v31, %v1186_v30  ;;  %v1266_v26 = vld [vmem:[#allocation7 + $0x388] sm:$0xff] }
 0x12d   :  { %2578 = vmatpush1.bf16.msra.mxu0 %v2577_v37  ;;  %v1185_v37 = vld [vmem:[#allocation7 + $0x100] sm:$0xff]  ;;  %v1274_v27 = vld [vmem:[#allocation7 + $0x3c8] sm:$0xff] }
 0x12e   :  { %2834 = vmatpush1.bf16.msra.mxu1 %v2833_v38  ;;  %2580 = vmatprep.subr.bf16.mxu0 %v2579_v39  ;;  %v1193_v38 = vld [vmem:[#allocation7 + $0x140] sm:$0xff]  ;;  %v1187_v39 = vld [vmem:[#allocation7 + $0x110] sm:$0xff]  ;;  %v2875_v32 = vpack.c.bf16 %v1274_v27, %v1266_v26 }
 0x12f   :  { %2836 = vmatprep.subr.bf16.mxu1 %v2835_v43  ;;  %v1210_v43 = vld [vmem:[#allocation7 + $0x1c8] sm:$0xff]  ;;  %v2857_v46 = vpack.c.bf16 %v1193_v38, %v1185_v37  ;;  %v2985_v47 = vpack.c.bf16 %v1195_v41, %v1187_v39  ;;  %v1275_v37 = vld [vmem:[#allocation7 + $0x3d0] sm:$0xff]  ;;  %v1292_v41 = vld [vmem:[#allocation7 + $0x458] sm:$0xff] }
 0x130   :  { %v2859_v48 = vpack.c.bf16 %v1210_v43, %v1202_v42  ;;  %v1282_v38 = vld [vmem:[#allocation7 + $0x408] sm:$0xff] }
 0x131   :  { %2582 = vmatpush1.bf16.msra.mxu0 %v2581_v49  ;;  %v1201_v49 = vld [vmem:[#allocation7 + $0x180] sm:$0xff]  ;;  %v1290_v39 = vld [vmem:[#allocation7 + $0x448] sm:$0xff] }
 0x132   :  { %2838 = vmatpush1.bf16.msra.mxu1 %v2837_v50  ;;  %2584 = vmatprep.subr.bf16.mxu0 %v2583_v51  ;;  %v1209_v50 = vld [vmem:[#allocation7 + $0x1c0] sm:$0xff]  ;;  %v1203_v51 = vld [vmem:[#allocation7 + $0x190] sm:$0xff]  ;;  %v2879_v44 = vpack.c.bf16 %v1290_v39, %v1282_v38 }
 0x133   :  { %2840 = vmatprep.subr.bf16.mxu1 %v2839_v55  ;;  %v1226_v55 = vld [vmem:[#allocation7 + $0x248] sm:$0xff]  ;;  %v2861_v58 = vpack.c.bf16 %v1209_v50, %v1201_v49  ;;  %v2989_v59 = vpack.c.bf16 %v1211_v53, %v1203_v51  ;;  %v1291_v49 = vld [vmem:[#allocation7 + $0x450] sm:$0xff]  ;;  %v1308_v53 = vld [vmem:[#allocation7 + $0x4d8] sm:$0xff] }
 0x134   :  { %v2863_v60 = vpack.c.bf16 %v1226_v55, %v1218_v54  ;;  %v1298_v50 = vld [vmem:[#allocation7 + $0x488] sm:$0xff] }
 0x135   :  { %2586 = vmatpush1.bf16.msra.mxu0 %v2585_v61  ;;  %v1217_v61 = vld [vmem:[#allocation7 + $0x200] sm:$0xff]  ;;  %v1306_v51 = vld [vmem:[#allocation7 + $0x4c8] sm:$0xff] }
 0x136   :  { %2842 = vmatpush1.bf16.msra.mxu1 %v2841_v62  ;;  %2588 = vmatprep.subr.bf16.mxu0 %v2587_v63  ;;  %v1225_v62 = vld [vmem:[#allocation7 + $0x240] sm:$0xff]  ;;  %v1219_v63 = vld [vmem:[#allocation7 + $0x210] sm:$0xff]  ;;  %v2883_v56 = vpack.c.bf16 %v1306_v51, %v1298_v50 }
 0x137   :  { %2844 = vmatprep.subr.bf16.mxu1 %v2843_v3  ;;  %v1242_v3 = vld [vmem:[#allocation7 + $0x2c8] sm:$0xff]  ;;  %v2865_v6 = vpack.c.bf16 %v1225_v62, %v1217_v61  ;;  %v2993_v7 = vpack.c.bf16 %v1227_v1, %v1219_v63  ;;  %v1307_v61 = vld [vmem:[#allocation7 + $0x4d0] sm:$0xff]  ;;  %v1324_v1 = vld [vmem:[#allocation7 + $0x558] sm:$0xff] }
 0x138   :  { %v2867_v8 = vpack.c.bf16 %v1242_v3, %v1234_v2  ;;  %v1314_v62 = vld [vmem:[#allocation7 + $0x508] sm:$0xff] }
 0x139   :  { %2590 = vmatpush1.bf16.msra.mxu0 %v2589_v9  ;;  %v1233_v9 = vld [vmem:[#allocation7 + $0x280] sm:$0xff]  ;;  %v1322_v63 = vld [vmem:[#allocation7 + $0x548] sm:$0xff] }
 0x13a   :  { %2846 = vmatpush1.bf16.msra.mxu1 %v2845_v10  ;;  %2848 = vmatprep.subr.bf16.mxu0 %v2847_v11  ;;  %v1241_v10 = vld [vmem:[#allocation7 + $0x2c0] sm:$0xff]  ;;  %v1235_v11 = vld [vmem:[#allocation7 + $0x290] sm:$0xff]  ;;  %v2887_v4 = vpack.c.bf16 %v1322_v63, %v1314_v62  ;;  %v1396_v62 = vld [vmem:[#allocation7 + $0x798] sm:$0xff] }
 0x13b   :  { %2976 = vmatprep.subr.bf16.mxu1 %v2975_v15  ;;  %v1258_v15 = vld [vmem:[#allocation7 + $0x348] sm:$0xff]  ;;  %v2869_v18 = vpack.c.bf16 %v1241_v10, %v1233_v9  ;;  %v2997_v19 = vpack.c.bf16 %v1243_v13, %v1235_v11  ;;  %v1323_v9 = vld [vmem:[#allocation7 + $0x550] sm:$0xff]  ;;  %v1340_v13 = vld [vmem:[#allocation7 + $0x5d8] sm:$0xff] }
 0x13c   :  { %855 = vmatmul.mubr.f32.vlgmr.msra.gmra.mrb[0].mxu0 %v63_v21  ;;  %v2871_v20 = vpack.c.bf16 %v1258_v15, %v1250_v14  ;;  %v1330_v10 = vld [vmem:[#allocation7 + $0x588] sm:$0xff] }
 0x13d   :  { %1139 = vmatmul.mubr.f32.vlgmr.msra.gmra.mrb[0].mxu1 %v63_v21  ;;  %2850 = vmatpush1.bf16.msra.mxu0 %v2849_v22  ;;  %v1249_v21 = vld [vmem:[#allocation7 + $0x300] sm:$0xff]  ;;  %v1338_v11 = vld [vmem:[#allocation7 + $0x5c8] sm:$0xff] }
 0x13e   :  { %2978 = vmatpush1.bf16.msra.mxu1 %v2977_v23  ;;  %2852 = vmatprep.subr.bf16.mxu0 %v2851_v24  ;;  %v1257_v22 = vld [vmem:[#allocation7 + $0x340] sm:$0xff]  ;;  %v1251_v23 = vld [vmem:[#allocation7 + $0x310] sm:$0xff]  ;;  %v2999_v24 = vpack.c.bf16 %v1260_v17, %v1252_v16  ;;  %v2891_v16 = vpack.c.bf16 %v1338_v11, %v1330_v10  ;;  %v1412_v10 = vld [vmem:[#allocation7 + $0x818] sm:$0xff] }
 0x13f   :  { %2980 = vmatprep.subr.bf16.mxu1 %v2979_v28  ;;  %v1268_v28 = vld [vmem:[#allocation7 + $0x398] sm:$0xff]  ;;  %v2873_v30 = vpack.c.bf16 %v1257_v22, %v1249_v21  ;;  %v3001_v31 = vpack.c.bf16 %v1259_v25, %v1251_v23  ;;  %v1329_v17 = vld [vmem:[#allocation7 + $0x580] sm:$0xff]  ;;  %v1339_v21 = vld [vmem:[#allocation7 + $0x5d0] sm:$0xff] }
 0x140   :  { %v1346_v22 = vld [vmem:[#allocation7 + $0x608] sm:$0xff]  ;;  %v1356_v25 = vld [vmem:[#allocation7 + $0x658] sm:$0xff] }
 0x141   :  { %2854 = vmatpush1.bf16.msra.mxu0 %v2853_v34  ;;  %v1273_v34 = vld [vmem:[#allocation7 + $0x3c0] sm:$0xff]  ;;  %v1354_v23 = vld [vmem:[#allocation7 + $0x648] sm:$0xff] }
 0x142   :  { %2982 = vmatpush1.bf16.msra.mxu1 %v2981_v35  ;;  %2856 = vmatprep.subr.bf16.mxu0 %v2855_v36  ;;  %v1267_v35 = vld [vmem:[#allocation7 + $0x390] sm:$0xff]  ;;  %v3003_v36 = vpack.c.bf16 %v1276_v29, %v1268_v28  ;;  %v2877_v42 = vpack.c.bf16 %v1273_v34, %v1265_v33  ;;  %v2895_v28 = vpack.c.bf16 %v1354_v23, %v1346_v22  ;;  %v1345_v29 = vld [vmem:[#allocation7 + $0x600] sm:$0xff]  ;;  %v1362_v34 = vld [vmem:[#allocation7 + $0x688] sm:$0xff] }
 0x143   :  { %2984 = vmatprep.subr.bf16.mxu1 %v2983_v40  ;;  %v1284_v40 = vld [vmem:[#allocation7 + $0x418] sm:$0xff]  ;;  %v3005_v43 = vpack.c.bf16 %v1275_v37, %v1267_v35  ;;  %v1355_v33 = vld [vmem:[#allocation7 + $0x650] sm:$0xff]  ;;  %v1370_v35 = vld [vmem:[#allocation7 + $0x6c8] sm:$0xff] }
 0x144   :  { %v1372_v37 = vld [vmem:[#allocation7 + $0x6d8] sm:$0xff]  ;;  %v1434_v23 = vld [vmem:[#allocation7 + $0x8c8] sm:$0xff] }
 0x145   :  { %2858 = vmatpush1.bf16.msra.mxu0 %v2857_v46  ;;  %v1289_v46 = vld [vmem:[#allocation7 + $0x440] sm:$0xff] }
 0x146   :  { %2986 = vmatpush1.bf16.msra.mxu1 %v2985_v47  ;;  %2860 = vmatprep.subr.bf16.mxu0 %v2859_v48  ;;  %v1283_v47 = vld [vmem:[#allocation7 + $0x410] sm:$0xff]  ;;  %v3007_v48 = vpack.c.bf16 %v1292_v41, %v1284_v40  ;;  %v2881_v54 = vpack.c.bf16 %v1289_v46, %v1281_v45  ;;  %v2899_v40 = vpack.c.bf16 %v1370_v35, %v1362_v34  ;;  %v1361_v41 = vld [vmem:[#allocation7 + $0x680] sm:$0xff]  ;;  %v1378_v46 = vld [vmem:[#allocation7 + $0x708] sm:$0xff] }
 0x147   :  { %2988 = vmatprep.subr.bf16.mxu1 %v2987_v52  ;;  %v1300_v52 = vld [vmem:[#allocation7 + $0x498] sm:$0xff]  ;;  %v3009_v55 = vpack.c.bf16 %v1291_v49, %v1283_v47  ;;  %v1371_v45 = vld [vmem:[#allocation7 + $0x6d0] sm:$0xff]  ;;  %v1386_v47 = vld [vmem:[#allocation7 + $0x748] sm:$0xff] }
 0x148   :  { %v1388_v49 = vld [vmem:[#allocation7 + $0x758] sm:$0xff]  ;;  %v1427_v34 = vld [vmem:[#allocation7 + $0x890] sm:$0xff] }
 0x149   :  { %2862 = vmatpush1.bf16.msra.mxu0 %v2861_v58  ;;  %v1305_v58 = vld [vmem:[#allocation7 + $0x4c0] sm:$0xff]  ;;  %v1435_v35 = vld [vmem:[#allocation7 + $0x8d0] sm:$0xff] }
 0x14a   :  { %2990 = vmatpush1.bf16.msra.mxu1 %v2989_v59  ;;  %2864 = vmatprep.subr.bf16.mxu0 %v2863_v60  ;;  %v1299_v59 = vld [vmem:[#allocation7 + $0x490] sm:$0xff]  ;;  %v3011_v60 = vpack.c.bf16 %v1308_v53, %v1300_v52  ;;  %v2885_v2 = vpack.c.bf16 %v1305_v58, %v1297_v57  ;;  %v2903_v52 = vpack.c.bf16 %v1386_v47, %v1378_v46  ;;  %v1377_v53 = vld [vmem:[#allocation7 + $0x700] sm:$0xff] }
 0x14b   :  { %2992 = vmatprep.subr.bf16.mxu1 %v2991_v0  ;;  %v1316_v0 = vld [vmem:[#allocation7 + $0x518] sm:$0xff]  ;;  %v3013_v3 = vpack.c.bf16 %v1307_v61, %v1299_v59  ;;  %v1387_v57 = vld [vmem:[#allocation7 + $0x750] sm:$0xff]  ;;  %v1402_v61 = vld [vmem:[#allocation7 + $0x7c8] sm:$0xff] }
 0x14d   :  { %2866 = vmatpush1.bf16.msra.mxu0 %v2865_v6  ;;  %v1321_v6 = vld [vmem:[#allocation7 + $0x540] sm:$0xff] }
 0x14e   :  { %2994 = vmatpush1.bf16.msra.mxu1 %v2993_v7  ;;  %2868 = vmatprep.subr.bf16.mxu0 %v2867_v8  ;;  %v1315_v7 = vld [vmem:[#allocation7 + $0x510] sm:$0xff]  ;;  %v3015_v8 = vpack.c.bf16 %v1324_v1, %v1316_v0  ;;  %v2889_v14 = vpack.c.bf16 %v1321_v6, %v1313_v5  ;;  %v1404_v0 = vld [vmem:[#allocation7 + $0x7d8] sm:$0xff]  ;;  %v1393_v1 = vld [vmem:[#allocation7 + $0x780] sm:$0xff] }
 0x14f   :  { %2996 = vmatprep.subr.bf16.mxu1 %v2995_v12  ;;  %v1332_v12 = vld [vmem:[#allocation7 + $0x598] sm:$0xff]  ;;  %v3017_v15 = vpack.c.bf16 %v1323_v9, %v1315_v7  ;;  %v1395_v5 = vld [vmem:[#allocation7 + $0x790] sm:$0xff]  ;;  %v1418_v9 = vld [vmem:[#allocation7 + $0x848] sm:$0xff] }
 0x150   :  { %v1403_v6 = vld [vmem:[#allocation7 + $0x7d0] sm:$0xff] }
 0x151   :  { %2870 = vmatpush1.bf16.msra.mxu0 %v2869_v18  ;;  %v1337_v18 = vld [vmem:[#allocation7 + $0x5c0] sm:$0xff]  ;;  %v3037_v7 = vpack.c.bf16 %v1403_v6, %v1395_v5 }
 0x152   :  { %2998 = vmatpush1.bf16.msra.mxu1 %v2997_v19  ;;  %2872 = vmatprep.subr.bf16.mxu0 %v2871_v20  ;;  %v1331_v19 = vld [vmem:[#allocation7 + $0x590] sm:$0xff]  ;;  %v3019_v20 = vpack.c.bf16 %v1340_v13, %v1332_v12  ;;  %v2893_v26 = vpack.c.bf16 %v1337_v18, %v1329_v17  ;;  %v1420_v12 = vld [vmem:[#allocation7 + $0x858] sm:$0xff]  ;;  %v1481_v5 = vld [vmem:[#allocation7 + $0xa40] sm:$0xff] }
 0x153   :  { %3000 = vmatprep.subr.bf16.mxu1 %v2999_v24  ;;  %v1348_v24 = vld [vmem:[#allocation7 + $0x618] sm:$0xff]  ;;  %v3021_v27 = vpack.c.bf16 %v1339_v21, %v1331_v19  ;;  %v3039_v13 = vpack.c.bf16 %v1420_v12, %v1412_v10  ;;  %v1419_v17 = vld [vmem:[#allocation7 + $0x850] sm:$0xff]  ;;  %v1426_v19 = vld [vmem:[#allocation7 + $0x888] sm:$0xff] }
 0x154   :  { %v1490_v10 = vld [vmem:[#allocation7 + $0xa88] sm:$0xff]  ;;  %v1492_v12 = vld [vmem:[#allocation7 + $0xa98] sm:$0xff] }
 0x155   :  { %2874 = vmatpush1.bf16.msra.mxu0 %v2873_v30  ;;  %v1353_v30 = vld [vmem:[#allocation7 + $0x640] sm:$0xff] }
 0x156   :  { %3002 = vmatpush1.bf16.msra.mxu1 %v3001_v31  ;;  %2876 = vmatprep.subr.bf16.mxu0 %v2875_v32  ;;  %v1347_v31 = vld [vmem:[#allocation7 + $0x610] sm:$0xff]  ;;  %v3023_v32 = vpack.c.bf16 %v1356_v25, %v1348_v24  ;;  %v2897_v38 = vpack.c.bf16 %v1353_v30, %v1345_v29  ;;  %v1428_v24 = vld [vmem:[#allocation7 + $0x898] sm:$0xff] }
 0x157   :  { %3004 = vmatprep.subr.bf16.mxu1 %v3003_v36  ;;  %v1364_v36 = vld [vmem:[#allocation7 + $0x698] sm:$0xff]  ;;  %v3025_v39 = vpack.c.bf16 %v1355_v33, %v1347_v31  ;;  %v1425_v31 = vld [vmem:[#allocation7 + $0x880] sm:$0xff] }
 0x158   :  { %v1436_v25 = vld [vmem:[#allocation7 + $0x8d8] sm:$0xff] }
 0x159   :  { %2878 = vmatpush1.bf16.msra.mxu0 %v2877_v42  ;;  %v1369_v42 = vld [vmem:[#allocation7 + $0x6c0] sm:$0xff] }
 0x15a   :  { %3006 = vmatpush1.bf16.msra.mxu1 %v3005_v43  ;;  %2880 = vmatprep.subr.bf16.mxu0 %v2879_v44  ;;  %v1363_v43 = vld [vmem:[#allocation7 + $0x690] sm:$0xff]  ;;  %v3027_v44 = vpack.c.bf16 %v1372_v37, %v1364_v36  ;;  %v2901_v50 = vpack.c.bf16 %v1369_v42, %v1361_v41  ;;  %v1442_v36 = vld [vmem:[#allocation7 + $0x908] sm:$0xff]  ;;  %v2915_v37 = vpack.c.bf16 %v1434_v23, %v1426_v19  ;;  %v1452_v41 = vld [vmem:[#allocation7 + $0x958] sm:$0xff] }
 0x15b   :  { %3008 = vmatprep.subr.bf16.mxu1 %v3007_v48  ;;  %v1380_v48 = vld [vmem:[#allocation7 + $0x718] sm:$0xff]  ;;  %v3029_v51 = vpack.c.bf16 %v1371_v45, %v1363_v43  ;;  %v3045_v43 = vpack.c.bf16 %v1435_v35, %v1427_v34  ;;  %v1449_v45 = vld [vmem:[#allocation7 + $0x940] sm:$0xff]  ;;  %v1514_v23 = vld [vmem:[#allocation7 + $0xb48] sm:$0xff] }
 0x15c   :  { %v1507_v34 = vld [vmem:[#allocation7 + $0xb10] sm:$0xff] }
 0x15d   :  { %2882 = vmatpush1.bf16.msra.mxu0 %v2881_v54  ;;  %v1385_v54 = vld [vmem:[#allocation7 + $0x740] sm:$0xff]  ;;  %v1515_v35 = vld [vmem:[#allocation7 + $0xb50] sm:$0xff] }
 0x15e   :  { %3010 = vmatpush1.bf16.msra.mxu1 %v3009_v55  ;;  %2884 = vmatprep.subr.bf16.mxu0 %v2883_v56  ;;  %v3031_v55 = vpack.c.bf16 %v1388_v49, %v1380_v48  ;;  %v1379_v56 = vld [vmem:[#allocation7 + $0x710] sm:$0xff]  ;;  %v2905_v58 = vpack.c.bf16 %v1385_v54, %v1377_v53  ;;  %v1468_v53 = vld [vmem:[#allocation7 + $0x9d8] sm:$0xff] }
 0x15f   :  { %3012 = vmatprep.subr.bf16.mxu1 %v3011_v60  ;;  %v3033_v59 = vpack.c.bf16 %v1387_v57, %v1379_v56  ;;  %v1394_v60 = vld [vmem:[#allocation7 + $0x788] sm:$0xff]  ;;  %v1443_v48 = vld [vmem:[#allocation7 + $0x910] sm:$0xff]  ;;  %v1457_v56 = vld [vmem:[#allocation7 + $0x980] sm:$0xff] }
 0x160   :  { %v2907_v63 = vpack.c.bf16 %v1402_v61, %v1394_v60  ;;  %v1451_v49 = vld [vmem:[#allocation7 + $0x950] sm:$0xff]  ;;  %v1465_v57 = vld [vmem:[#allocation7 + $0x9c0] sm:$0xff] }
 0x161   :  { %2886 = vmatpush1.bf16.msra.mxu0 %v2885_v2  ;;  %v1401_v2 = vld [vmem:[#allocation7 + $0x7c0] sm:$0xff]  ;;  %v1459_v60 = vld [vmem:[#allocation7 + $0x990] sm:$0xff] }
 0x162   :  { %3014 = vmatpush1.bf16.msra.mxu1 %v3013_v3  ;;  %2888 = vmatprep.subr.bf16.mxu0 %v2887_v4  ;;  %v3035_v3 = vpack.c.bf16 %v1404_v0, %v1396_v62  ;;  %v2909_v4 = vpack.c.bf16 %v1401_v2, %v1393_v1  ;;  %v1467_v61 = vld [vmem:[#allocation7 + $0x9d0] sm:$0xff]  ;;  %v1474_v62 = vld [vmem:[#allocation7 + $0xa08] sm:$0xff]  ;;  %v1476_v0 = vld [vmem:[#allocation7 + $0xa18] sm:$0xff]  ;;  %v2925_v2 = vpack.c.bf16 %v1465_v57, %v1457_v56 }
 0x163   :  { %3016 = vmatprep.subr.bf16.mxu1 %v3015_v8  ;;  %v1410_v8 = vld [vmem:[#allocation7 + $0x808] sm:$0xff]  ;;  %v1484_v1 = vld [vmem:[#allocation7 + $0xa58] sm:$0xff] }
 0x164   :  { %v2911_v11 = vpack.c.bf16 %v1418_v9, %v1410_v8  ;;  %v1475_v8 = vld [vmem:[#allocation7 + $0xa10] sm:$0xff] }
 0x165   :  { %2890 = vmatpush1.bf16.msra.mxu0 %v2889_v14  ;;  %v1409_v14 = vld [vmem:[#allocation7 + $0x800] sm:$0xff]  ;;  %v1483_v9 = vld [vmem:[#allocation7 + $0xa50] sm:$0xff] }
 0x166   :  { %3018 = vmatpush1.bf16.msra.mxu1 %v3017_v15  ;;  %2892 = vmatprep.subr.bf16.mxu0 %v2891_v16  ;;  %v1417_v15 = vld [vmem:[#allocation7 + $0x840] sm:$0xff]  ;;  %v1411_v16 = vld [vmem:[#allocation7 + $0x810] sm:$0xff] }
 0x167   :  { %3020 = vmatprep.subr.bf16.mxu1 %v3019_v20  ;;  %v2913_v29 = vpack.c.bf16 %v1417_v15, %v1409_v14  ;;  %v3041_v30 = vpack.c.bf16 %v1419_v17, %v1411_v16  ;;  %v3057_v15 = vpack.c.bf16 %v1483_v9, %v1475_v8  ;;  %v1489_v16 = vld [vmem:[#allocation7 + $0xa80] sm:$0xff]  ;;  %v1570_v8 = vld [vmem:[#allocation7 + $0xd08] sm:$0xff] }
 0x168   :  { %v1497_v17 = vld [vmem:[#allocation7 + $0xac0] sm:$0xff]  ;;  %v1578_v9 = vld [vmem:[#allocation7 + $0xd48] sm:$0xff] }
 0x169   :  { %2894 = vmatpush1.bf16.msra.mxu0 %v2893_v26 }
 0x16a   :  { %3022 = vmatpush1.bf16.msra.mxu1 %v3021_v27  ;;  %2896 = vmatprep.subr.bf16.mxu0 %v2895_v28 }
 0x16b   :  { %3024 = vmatprep.subr.bf16.mxu1 %v3023_v32  ;;  %v1433_v32 = vld [vmem:[#allocation7 + $0x8c0] sm:$0xff] }
 0x16c   :  { %v2917_v42 = vpack.c.bf16 %v1433_v32, %v1425_v31  ;;  %v1513_v31 = vld [vmem:[#allocation7 + $0xb40] sm:$0xff] }
 0x16d   :  { %2898 = vmatpush1.bf16.msra.mxu0 %v2897_v38  ;;  %v3043_v38 = vpack.c.bf16 %v1436_v25, %v1428_v24  ;;  %v1508_v24 = vld [vmem:[#allocation7 + $0xb18] sm:$0xff] }
 0x16e   :  { %3026 = vmatpush1.bf16.msra.mxu1 %v3025_v39  ;;  %2900 = vmatprep.subr.bf16.mxu0 %v2899_v40  ;;  %v1450_v39 = vld [vmem:[#allocation7 + $0x948] sm:$0xff]  ;;  %v1444_v40 = vld [vmem:[#allocation7 + $0x918] sm:$0xff] }
 0x16f   :  { %3028 = vmatprep.subr.bf16.mxu1 %v3027_v44  ;;  %v1441_v44 = vld [vmem:[#allocation7 + $0x900] sm:$0xff]  ;;  %v2919_v46 = vpack.c.bf16 %v1450_v39, %v1442_v36  ;;  %v3047_v47 = vpack.c.bf16 %v1452_v41, %v1444_v40  ;;  %v1516_v25 = vld [vmem:[#allocation7 + $0xb58] sm:$0xff]  ;;  %v1522_v36 = vld [vmem:[#allocation7 + $0xb88] sm:$0xff]  ;;  %v3065_v41 = vpack.c.bf16 %v1515_v35, %v1507_v34 }
 0x170   :  { %v2921_v54 = vpack.c.bf16 %v1449_v45, %v1441_v44  ;;  %v1532_v39 = vld [vmem:[#allocation7 + $0xbd8] sm:$0xff]  ;;  %v1602_v34 = vld [vmem:[#allocation7 + $0xe08] sm:$0xff] }
 0x171   :  { %2902 = vmatpush1.bf16.msra.mxu0 %v2901_v50  ;;  %v1458_v50 = vld [vmem:[#allocation7 + $0x988] sm:$0xff] }
 0x172   :  { %3030 = vmatpush1.bf16.msra.mxu1 %v3029_v51  ;;  %2904 = vmatprep.subr.bf16.mxu0 %v2903_v52  ;;  %v1466_v51 = vld [vmem:[#allocation7 + $0x9c8] sm:$0xff]  ;;  %v1460_v52 = vld [vmem:[#allocation7 + $0x998] sm:$0xff] }
 0x173   :  { %3032 = vmatprep.subr.bf16.mxu1 %v3031_v55  ;;  %v3049_v55 = vpack.c.bf16 %v1451_v49, %v1443_v48  ;;  %v1538_v48 = vld [vmem:[#allocation7 + $0xc08] sm:$0xff] }
 0x174   :  { %v1546_v49 = vld [vmem:[#allocation7 + $0xc48] sm:$0xff] }
 0x175   :  { %2906 = vmatpush1.bf16.msra.mxu0 %v2905_v58  ;;  %v2923_v58 = vpack.c.bf16 %v1466_v51, %v1458_v50  ;;  %v1540_v50 = vld [vmem:[#allocation7 + $0xc18] sm:$0xff]  ;;  %v2943_v56 = vpack.c.bf16 %v1546_v49, %v1538_v48  ;;  %v1610_v35 = vld [vmem:[#allocation7 + $0xe48] sm:$0xff] }
 0x176   :  { %3034 = vmatpush1.bf16.msra.mxu1 %v3033_v59  ;;  %2908 = vmatprep.subr.bf16.mxu0 %v2907_v63  ;;  %v3051_v59 = vpack.c.bf16 %v1468_v53, %v1460_v52  ;;  %v1482_v63 = vld [vmem:[#allocation7 + $0xa48] sm:$0xff]  ;;  %v1548_v51 = vld [vmem:[#allocation7 + $0xc58] sm:$0xff] }
 0x177   :  { %3036 = vmatprep.subr.bf16.mxu1 %v3035_v3  ;;  %v3053_v3 = vpack.c.bf16 %v1467_v61, %v1459_v60  ;;  %v2927_v6 = vpack.c.bf16 %v1482_v63, %v1474_v62  ;;  %v3071_v57 = vpack.c.bf16 %v1548_v51, %v1540_v50  ;;  %v1554_v60 = vld [vmem:[#allocation7 + $0xc88] sm:$0xff]  ;;  %v1556_v62 = vld [vmem:[#allocation7 + $0xc98] sm:$0xff] }
 0x178   :  { %v1562_v61 = vld [vmem:[#allocation7 + $0xcc8] sm:$0xff]  ;;  %v1564_v63 = vld [vmem:[#allocation7 + $0xcd8] sm:$0xff] }
 0x179   :  { %2910 = vmatpush1.bf16.msra.mxu0 %v2909_v4  ;;  %v1473_v4 = vld [vmem:[#allocation7 + $0xa00] sm:$0xff]  ;;  %v1620_v48 = vld [vmem:[#allocation7 + $0xe98] sm:$0xff] }
 0x17a   :  { %3038 = vmatpush1.bf16.msra.mxu1 %v3037_v7  ;;  %2912 = vmatprep.subr.bf16.mxu0 %v2911_v11  ;;  %v3055_v7 = vpack.c.bf16 %v1484_v1, %v1476_v0  ;;  %v1498_v11 = vld [vmem:[#allocation7 + $0xac8] sm:$0xff]  ;;  %v2929_v14 = vpack.c.bf16 %v1481_v5, %v1473_v4  ;;  %v2947_v4 = vpack.c.bf16 %v1562_v61, %v1554_v60  ;;  %v1628_v49 = vld [vmem:[#allocation7 + $0xed8] sm:$0xff] }
 0x17b   :  { %3040 = vmatprep.subr.bf16.mxu1 %v3039_v13  ;;  %v1500_v13 = vld [vmem:[#allocation7 + $0xad8] sm:$0xff]  ;;  %v3075_v5 = vpack.c.bf16 %v1564_v63, %v1556_v62 }
 0x17c   :  { %v3059_v19 = vpack.c.bf16 %v1500_v13, %v1492_v12  ;;  %v1636_v60 = vld [vmem:[#allocation7 + $0xf18] sm:$0xff] }
 0x17d   :  { %v1644_v61 = vld [vmem:[#allocation7 + $0xf58] sm:$0xff] }
 0x20f   :  { %v856_v18 = vpop.f32.mrb[0].mxu0 }
 0x210   :  { %v1145_v20 = vmax.f32 %v856_v18, 0.0  ;;  %v1140_v21 = vpop.f32.mrb[0].mxu1  ;;  %v858_v22 = vpop.f32.mrb[1].mxu0  ;;  %v2931_v18 = vpack.c.bf16 %v1498_v11, %v1490_v10  ;;  %v1572_v10 = vld [vmem:[#allocation7 + $0xd18] sm:$0xff] }
 0x211   :  { %v3611_v26 = vmax.f32 %v1140_v21, 0.0  ;;  %v3613_v27 = vmax.f32 %v858_v22, 0.0  ;;  %v1142_v28 = vpop.f32.mrb[1].mxu1  ;;  %v1499_v21 = vld [vmem:[#allocation7 + $0xad0] sm:$0xff]  ;;  %v1506_v22 = vld [vmem:[#allocation7 + $0xb08] sm:$0xff]  ;;  %v1580_v11 = vld [vmem:[#allocation7 + $0xd58] sm:$0xff] }
 0x212   :  { %1149 = vst [vmem:[#allocation8] sm:$0xff] %v1145_v20  ;;  %v1148_v33 = vmax.f32 %v1142_v28, 0.0  ;;  %v2933_v28 = vpack.c.bf16 %v1497_v17, %v1489_v16  ;;  %v2935_v32 = vpack.c.bf16 %v1514_v23, %v1506_v22  ;;  %v2951_v16 = vpack.c.bf16 %v1578_v9, %v1570_v8  ;;  %v1588_v22 = vld [vmem:[#allocation7 + $0xd98] sm:$0xff] }
 0x213   :  { %1151 = vst [vmem:[#allocation8 + $0x10] sm:$0xff] %v3611_v26  ;;  %1150 = vst [vmem:[#allocation8 + $0x8] sm:$0xff] %v3613_v27  ;;  %1729 = vmatprep.mubr.f32.mxu0 %v3613_v27  ;;  %1871 = vmatprep.mubr.f32.mxu1 %v3613_v27  ;;  %v3079_v17 = vpack.c.bf16 %v1580_v11, %v1572_v10  ;;  %v1596_v23 = vld [vmem:[#allocation7 + $0xdd8] sm:$0xff] }
 0x214   :  { %1152 = vst [vmem:[#allocation8 + $0x18] sm:$0xff] %v1148_v33  ;;  %1730 = vmatmul.mubr.f32.vlgmr.msra.gmra.mrb[2].mxu0 %v1145_v20  ;;  %1872 = vmatmul.mubr.f32.vlgmr.msra.gmra.mrb[2].mxu1 %v1145_v20  ;;  %v1491_v20 = vld [vmem:[#allocation7 + $0xa90] sm:$0xff]  ;;  %v1652_v8 = vld [vmem:[#allocation7 + $0xf98] sm:$0xff] }
 0x215   :  { %2914 = vmatpush1.bf16.msra.mxu0 %v2913_v29  ;;  %3042 = vmatpush1.bf16.msra.mxu1 %v3041_v30  ;;  %v3061_v29 = vpack.c.bf16 %v1499_v21, %v1491_v20  ;;  %v1505_v30 = vld [vmem:[#allocation7 + $0xb00] sm:$0xff]  ;;  %v1586_v20 = vld [vmem:[#allocation7 + $0xd88] sm:$0xff]  ;;  %v1660_v9 = vld [vmem:[#allocation7 + $0xfd8] sm:$0xff] }
 0x216   :  { %1800 = vmatprep.mubr.f32.mxu0 %v1148_v33  ;;  %1942 = vmatprep.mubr.f32.mxu1 %v1148_v33  ;;  %v3063_v33 = vpack.c.bf16 %v1516_v25, %v1508_v24  ;;  %v2937_v40 = vpack.c.bf16 %v1513_v31, %v1505_v30  ;;  %v1594_v21 = vld [vmem:[#allocation7 + $0xdc8] sm:$0xff]  ;;  %v3083_v31 = vpack.c.bf16 %v1596_v23, %v1588_v22 }
 0x217   :  { %2916 = vmatprep.subr.bf16.mxu0 %v2915_v37  ;;  %3044 = vmatprep.subr.bf16.mxu1 %v3043_v38  ;;  %v1530_v37 = vld [vmem:[#allocation7 + $0xbc8] sm:$0xff]  ;;  %v1524_v38 = vld [vmem:[#allocation7 + $0xb98] sm:$0xff]  ;;  %v2955_v30 = vpack.c.bf16 %v1594_v21, %v1586_v20 }
 0x218   :  { %v2939_v44 = vpack.c.bf16 %v1530_v37, %v1522_v36  ;;  %v3067_v45 = vpack.c.bf16 %v1532_v39, %v1524_v38  ;;  %v1604_v36 = vld [vmem:[#allocation7 + $0xe18] sm:$0xff] }
 0x219   :  { %2918 = vmatpush1.bf16.msra.mxu0 %v2917_v42  ;;  %3046 = vmatpush1.bf16.msra.mxu1 %v3045_v43  ;;  %v1521_v42 = vld [vmem:[#allocation7 + $0xb80] sm:$0xff]  ;;  %v1612_v37 = vld [vmem:[#allocation7 + $0xe58] sm:$0xff] }
 0x21a   :  { %2920 = vmatprep.subr.bf16.mxu0 %v2919_v46  ;;  %3048 = vmatprep.subr.bf16.mxu1 %v3047_v47  ;;  %v1529_v43 = vld [vmem:[#allocation7 + $0xbc0] sm:$0xff]  ;;  %v1523_v46 = vld [vmem:[#allocation7 + $0xb90] sm:$0xff]  ;;  %v1160_v20 = vld [vmem:[#allocation7 + $0x38] sm:$0xff] }
 0x21b   :  { %v1531_v47 = vld [vmem:[#allocation7 + $0xbd0] sm:$0xff]  ;;  %v2941_v52 = vpack.c.bf16 %v1529_v43, %v1521_v42  ;;  %v2959_v42 = vpack.c.bf16 %v1610_v35, %v1602_v34  ;;  %v3087_v43 = vpack.c.bf16 %v1612_v37, %v1604_v36  ;;  %v1168_v21 = vld [vmem:[#allocation7 + $0x78] sm:$0xff] }
 0x21c   :  { %v3069_v53 = vpack.c.bf16 %v1531_v47, %v1523_v46  ;;  %v1618_v46 = vld [vmem:[#allocation7 + $0xe88] sm:$0xff]  ;;  %v1176_v34 = vld [vmem:[#allocation7 + $0xb8] sm:$0xff] }
 0x21d   :  { %2922 = vmatpush1.bf16.msra.mxu0 %v2921_v54  ;;  %3050 = vmatpush1.bf16.msra.mxu1 %v3049_v55  ;;  %v1537_v54 = vld [vmem:[#allocation7 + $0xc00] sm:$0xff]  ;;  %v1626_v47 = vld [vmem:[#allocation7 + $0xec8] sm:$0xff]  ;;  %v1184_v35 = vld [vmem:[#allocation7 + $0xf8] sm:$0xff] }
 0x21e   :  { %2924 = vmatprep.subr.bf16.mxu0 %v2923_v58  ;;  %3052 = vmatprep.subr.bf16.mxu1 %v3051_v59  ;;  %v1545_v55 = vld [vmem:[#allocation7 + $0xc40] sm:$0xff]  ;;  %v1539_v58 = vld [vmem:[#allocation7 + $0xc10] sm:$0xff] }
 0x21f   :  { %v1547_v59 = vld [vmem:[#allocation7 + $0xc50] sm:$0xff]  ;;  %v2945_v0 = vpack.c.bf16 %v1545_v55, %v1537_v54  ;;  %v2963_v54 = vpack.c.bf16 %v1626_v47, %v1618_v46  ;;  %v3091_v55 = vpack.c.bf16 %v1628_v49, %v1620_v48  ;;  %v1192_v46 = vld [vmem:[#allocation7 + $0x138] sm:$0xff] }
 0x220   :  { %v3073_v1 = vpack.c.bf16 %v1547_v59, %v1539_v58  ;;  %v1634_v58 = vld [vmem:[#allocation7 + $0xf08] sm:$0xff]  ;;  %v1200_v47 = vld [vmem:[#allocation7 + $0x178] sm:$0xff] }
 0x221   :  { %2926 = vmatpush1.bf16.msra.mxu0 %v2925_v2  ;;  %3054 = vmatpush1.bf16.msra.mxu1 %v3053_v3  ;;  %v1553_v2 = vld [vmem:[#allocation7 + $0xc80] sm:$0xff]  ;;  %v1642_v59 = vld [vmem:[#allocation7 + $0xf48] sm:$0xff] }
 0x222   :  { %2928 = vmatprep.subr.bf16.mxu0 %v2927_v6  ;;  %3056 = vmatprep.subr.bf16.mxu1 %v3055_v7  ;;  %v1561_v3 = vld [vmem:[#allocation7 + $0xcc0] sm:$0xff]  ;;  %v1555_v6 = vld [vmem:[#allocation7 + $0xc90] sm:$0xff] }
 0x223   :  { %v1563_v7 = vld [vmem:[#allocation7 + $0xcd0] sm:$0xff]  ;;  %v2949_v12 = vpack.c.bf16 %v1561_v3, %v1553_v2  ;;  %v2967_v2 = vpack.c.bf16 %v1642_v59, %v1634_v58  ;;  %v3095_v3 = vpack.c.bf16 %v1644_v61, %v1636_v60  ;;  %v1216_v58 = vld [vmem:[#allocation7 + $0x1f8] sm:$0xff] }
 0x224   :  { %v3077_v13 = vpack.c.bf16 %v1563_v7, %v1555_v6  ;;  %v1650_v6 = vld [vmem:[#allocation7 + $0xf88] sm:$0xff] }
 0x225   :  { %2930 = vmatpush1.bf16.msra.mxu0 %v2929_v14  ;;  %3058 = vmatpush1.bf16.msra.mxu1 %v3057_v15  ;;  %v1569_v14 = vld [vmem:[#allocation7 + $0xd00] sm:$0xff]  ;;  %v1658_v7 = vld [vmem:[#allocation7 + $0xfc8] sm:$0xff] }
 0x226   :  { %2932 = vmatprep.subr.bf16.mxu0 %v2931_v18  ;;  %3060 = vmatprep.subr.bf16.mxu1 %v3059_v19  ;;  %v1577_v15 = vld [vmem:[#allocation7 + $0xd40] sm:$0xff]  ;;  %v1571_v18 = vld [vmem:[#allocation7 + $0xd10] sm:$0xff] }
 0x227   :  { %v1579_v19 = vld [vmem:[#allocation7 + $0xd50] sm:$0xff]  ;;  %v2953_v24 = vpack.c.bf16 %v1577_v15, %v1569_v14  ;;  %v2971_v14 = vpack.c.bf16 %v1658_v7, %v1650_v6  ;;  %v3099_v15 = vpack.c.bf16 %v1660_v9, %v1652_v8  ;;  %v1221_v9 = vld [vmem:[#allocation7 + $0x220] sm:$0xff] }
 0x228   :  { %v3081_v25 = vpack.c.bf16 %v1579_v19, %v1571_v18  ;;  %v1158_v18 = vld [vmem:[#allocation7 + $0x28] sm:$0xff] }
 0x229   :  { %2934 = vmatpush1.bf16.msra.mxu0 %v2933_v28  ;;  %3062 = vmatpush1.bf16.msra.mxu1 %v3061_v29  ;;  %v1585_v28 = vld [vmem:[#allocation7 + $0xd80] sm:$0xff]  ;;  %v1166_v19 = vld [vmem:[#allocation7 + $0x68] sm:$0xff] }
 0x22a   :  { %2936 = vmatprep.subr.bf16.mxu0 %v2935_v32  ;;  %3064 = vmatprep.subr.bf16.mxu1 %v3063_v33  ;;  %v1593_v29 = vld [vmem:[#allocation7 + $0xdc0] sm:$0xff]  ;;  %v1587_v32 = vld [vmem:[#allocation7 + $0xd90] sm:$0xff] }
 0x22b   :  { %v1595_v33 = vld [vmem:[#allocation7 + $0xdd0] sm:$0xff]  ;;  %v2957_v38 = vpack.c.bf16 %v1593_v29, %v1585_v28  ;;  %v1157_v28 = vld [vmem:[#allocation7 + $0x20] sm:$0xff] }
 0x22c   :  { %v3085_v39 = vpack.c.bf16 %v1595_v33, %v1587_v32  ;;  %v1165_v29 = vld [vmem:[#allocation7 + $0x60] sm:$0xff]  ;;  %v1174_v32 = vld [vmem:[#allocation7 + $0xa8] sm:$0xff] }
 0x22d   :  { %2938 = vmatpush1.bf16.msra.mxu0 %v2937_v40  ;;  %3066 = vmatpush1.bf16.msra.mxu1 %v3065_v41  ;;  %v1601_v40 = vld [vmem:[#allocation7 + $0xe00] sm:$0xff]  ;;  %v1182_v33 = vld [vmem:[#allocation7 + $0xe8] sm:$0xff]  ;;  %v3105_v36 = vpack.c.bf16 %v1165_v29, %v1157_v28 }
 0x22e   :  { %2940 = vmatprep.subr.bf16.mxu0 %v2939_v44  ;;  %3068 = vmatprep.subr.bf16.mxu1 %v3067_v45  ;;  %v1609_v41 = vld [vmem:[#allocation7 + $0xe40] sm:$0xff]  ;;  %v1603_v44 = vld [vmem:[#allocation7 + $0xe10] sm:$0xff]  ;;  %v1254_v28 = vld [vmem:[#allocation7 + $0x328] sm:$0xff] }
 0x22f   :  { %v1611_v45 = vld [vmem:[#allocation7 + $0xe50] sm:$0xff]  ;;  %v2961_v50 = vpack.c.bf16 %v1609_v41, %v1601_v40  ;;  %v3107_v41 = vpack.c.bf16 %v1182_v33, %v1174_v32  ;;  %v1262_v29 = vld [vmem:[#allocation7 + $0x368] sm:$0xff] }
 0x230   :  { %v3089_v51 = vpack.c.bf16 %v1611_v45, %v1603_v44  ;;  %v1175_v40 = vld [vmem:[#allocation7 + $0xb0] sm:$0xff]  ;;  %v1190_v44 = vld [vmem:[#allocation7 + $0x128] sm:$0xff] }
 0x231   :  { %2942 = vmatpush1.bf16.msra.mxu0 %v2941_v52  ;;  %3070 = vmatpush1.bf16.msra.mxu1 %v3069_v53  ;;  %v1617_v52 = vld [vmem:[#allocation7 + $0xe80] sm:$0xff]  ;;  %v1198_v45 = vld [vmem:[#allocation7 + $0x168] sm:$0xff] }
 0x232   :  { %2944 = vmatprep.subr.bf16.mxu0 %v2943_v56  ;;  %3072 = vmatprep.subr.bf16.mxu1 %v3071_v57  ;;  %v1625_v53 = vld [vmem:[#allocation7 + $0xec0] sm:$0xff]  ;;  %v1619_v56 = vld [vmem:[#allocation7 + $0xe90] sm:$0xff] }
 0x233   :  { %v1627_v57 = vld [vmem:[#allocation7 + $0xed0] sm:$0xff]  ;;  %v2965_v62 = vpack.c.bf16 %v1625_v53, %v1617_v52  ;;  %v1197_v52 = vld [vmem:[#allocation7 + $0x160] sm:$0xff] }
 0x234   :  { %v3093_v63 = vpack.c.bf16 %v1627_v57, %v1619_v56  ;;  %v1191_v53 = vld [vmem:[#allocation7 + $0x130] sm:$0xff]  ;;  %v1206_v56 = vld [vmem:[#allocation7 + $0x1a8] sm:$0xff]  ;;  %v1208_v57 = vld [vmem:[#allocation7 + $0x1b8] sm:$0xff] }
 0x235   :  { %2946 = vmatpush1.bf16.msra.mxu0 %v2945_v0  ;;  %3074 = vmatpush1.bf16.msra.mxu1 %v3073_v1  ;;  %v1633_v0 = vld [vmem:[#allocation7 + $0xf00] sm:$0xff] }
 0x236   :  { %2948 = vmatprep.subr.bf16.mxu0 %v2947_v4  ;;  %3076 = vmatprep.subr.bf16.mxu1 %v3075_v5  ;;  %v1641_v1 = vld [vmem:[#allocation7 + $0xf40] sm:$0xff]  ;;  %v1635_v4 = vld [vmem:[#allocation7 + $0xf10] sm:$0xff] }
 0x237   :  { %v1643_v5 = vld [vmem:[#allocation7 + $0xf50] sm:$0xff]  ;;  %v2969_v10 = vpack.c.bf16 %v1641_v1, %v1633_v0  ;;  %v3243_v0 = vpack.c.bf16 %v1216_v58, %v1208_v57  ;;  %v1285_v58 = vld [vmem:[#allocation7 + $0x420] sm:$0xff] }
 0x238   :  { %v3097_v11 = vpack.c.bf16 %v1643_v5, %v1635_v4  ;;  %v1215_v1 = vld [vmem:[#allocation7 + $0x1f0] sm:$0xff]  ;;  %v1224_v4 = vld [vmem:[#allocation7 + $0x238] sm:$0xff] }
 0x239   :  { %2950 = vmatpush1.bf16.msra.mxu0 %v2949_v12  ;;  %3078 = vmatpush1.bf16.msra.mxu1 %v3077_v13  ;;  %v1649_v12 = vld [vmem:[#allocation7 + $0xf80] sm:$0xff]  ;;  %v1232_v5 = vld [vmem:[#allocation7 + $0x278] sm:$0xff] }
 0x23a   :  { %2952 = vmatprep.subr.bf16.mxu0 %v2951_v16  ;;  %3080 = vmatprep.subr.bf16.mxu1 %v3079_v17  ;;  %v1657_v13 = vld [vmem:[#allocation7 + $0xfc0] sm:$0xff]  ;;  %v1651_v16 = vld [vmem:[#allocation7 + $0xf90] sm:$0xff] }
 0x23b   :  { %v1659_v17 = vld [vmem:[#allocation7 + $0xfd0] sm:$0xff]  ;;  %v2973_v22 = vpack.c.bf16 %v1657_v13, %v1649_v12  ;;  %v3247_v12 = vpack.c.bf16 %v1232_v5, %v1224_v4  ;;  %v1301_v5 = vld [vmem:[#allocation7 + $0x4a0] sm:$0xff] }
 0x23c   :  { %v3101_v23 = vpack.c.bf16 %v1659_v17, %v1651_v16  ;;  %v1231_v13 = vld [vmem:[#allocation7 + $0x270] sm:$0xff]  ;;  %v1240_v16 = vld [vmem:[#allocation7 + $0x2b8] sm:$0xff] }
 0x23d   :  { %2954 = vmatpush1.bf16.msra.mxu0 %v2953_v24  ;;  %3082 = vmatpush1.bf16.msra.mxu1 %v3081_v25  ;;  %v3103_v24 = vpack.c.bf16 %v1166_v19, %v1158_v18  ;;  %v3231_v25 = vpack.c.bf16 %v1168_v21, %v1160_v20  ;;  %v1248_v17 = vld [vmem:[#allocation7 + $0x2f8] sm:$0xff]  ;;  %v1237_v21 = vld [vmem:[#allocation7 + $0x2a0] sm:$0xff] }
 0x23e   :  { %2956 = vmatprep.subr.bf16.mxu0 %v2955_v30  ;;  %3084 = vmatprep.subr.bf16.mxu1 %v3083_v31  ;;  %v1159_v30 = vld [vmem:[#allocation7 + $0x30] sm:$0xff] }
 0x23f   :  { %v1167_v31 = vld [vmem:[#allocation7 + $0x70] sm:$0xff] }
 0x240   :  { %v3233_v37 = vpack.c.bf16 %v1167_v31, %v1159_v30  ;;  %v1256_v30 = vld [vmem:[#allocation7 + $0x338] sm:$0xff] }
 0x241   :  { %2958 = vmatpush1.bf16.msra.mxu0 %v2957_v38  ;;  %3086 = vmatpush1.bf16.msra.mxu1 %v3085_v39  ;;  %v1173_v38 = vld [vmem:[#allocation7 + $0xa0] sm:$0xff]  ;;  %v1264_v31 = vld [vmem:[#allocation7 + $0x378] sm:$0xff] }
 0x242   :  { %2960 = vmatprep.subr.bf16.mxu0 %v2959_v42  ;;  %3088 = vmatprep.subr.bf16.mxu1 %v3087_v43  ;;  %v1181_v39 = vld [vmem:[#allocation7 + $0xe0] sm:$0xff]  ;;  %v3235_v42 = vpack.c.bf16 %v1184_v35, %v1176_v34  ;;  %v1183_v43 = vld [vmem:[#allocation7 + $0xf0] sm:$0xff]  ;;  %v3127_v34 = vpack.c.bf16 %v1262_v29, %v1254_v28 }
 0x243   :  { %v3109_v48 = vpack.c.bf16 %v1181_v39, %v1173_v38  ;;  %v3237_v49 = vpack.c.bf16 %v1183_v43, %v1175_v40  ;;  %v1253_v35 = vld [vmem:[#allocation7 + $0x320] sm:$0xff]  ;;  %v3255_v38 = vpack.c.bf16 %v1264_v31, %v1256_v30  ;;  %v1263_v39 = vld [vmem:[#allocation7 + $0x370] sm:$0xff]  ;;  %v1270_v40 = vld [vmem:[#allocation7 + $0x3a8] sm:$0xff] }
 0x244   :  { %v1280_v43 = vld [vmem:[#allocation7 + $0x3f8] sm:$0xff]  ;;  %v1333_v31 = vld [vmem:[#allocation7 + $0x5a0] sm:$0xff] }
 0x245   :  { %2962 = vmatpush1.bf16.msra.mxu0 %v2961_v50  ;;  %3090 = vmatpush1.bf16.msra.mxu1 %v3089_v51  ;;  %v3111_v50 = vpack.c.bf16 %v1198_v45, %v1190_v44  ;;  %v1189_v51 = vld [vmem:[#allocation7 + $0x120] sm:$0xff] }
 0x246   :  { %2964 = vmatprep.subr.bf16.mxu0 %v2963_v54  ;;  %3092 = vmatprep.subr.bf16.mxu1 %v3091_v55  ;;  %v3239_v54 = vpack.c.bf16 %v1200_v47, %v1192_v46  ;;  %v1199_v55 = vld [vmem:[#allocation7 + $0x170] sm:$0xff]  ;;  %v3113_v59 = vpack.c.bf16 %v1197_v52, %v1189_v51  ;;  %v1269_v47 = vld [vmem:[#allocation7 + $0x3a0] sm:$0xff]  ;;  %v1286_v52 = vld [vmem:[#allocation7 + $0x428] sm:$0xff] }
 0x247   :  { %v3241_v60 = vpack.c.bf16 %v1199_v55, %v1191_v53  ;;  %v1279_v51 = vld [vmem:[#allocation7 + $0x3f0] sm:$0xff]  ;;  %v1294_v53 = vld [vmem:[#allocation7 + $0x468] sm:$0xff]  ;;  %v1296_v55 = vld [vmem:[#allocation7 + $0x478] sm:$0xff] }
 0x248   :  { %v3135_v57 = vpack.c.bf16 %v1294_v53, %v1286_v52 }
 0x249   :  { %2966 = vmatpush1.bf16.msra.mxu0 %v2965_v62  ;;  %3094 = vmatpush1.bf16.msra.mxu1 %v3093_v63  ;;  %v1213_v62 = vld [vmem:[#allocation7 + $0x1e0] sm:$0xff]  ;;  %v1207_v63 = vld [vmem:[#allocation7 + $0x1b0] sm:$0xff] }
 0x24a   :  { %2968 = vmatprep.subr.bf16.mxu0 %v2967_v2  ;;  %3096 = vmatprep.subr.bf16.mxu1 %v3095_v3  ;;  %v1222_v2 = vld [vmem:[#allocation7 + $0x228] sm:$0xff]  ;;  %v3245_v7 = vpack.c.bf16 %v1215_v1, %v1207_v63  ;;  %v1312_v1 = vld [vmem:[#allocation7 + $0x4f8] sm:$0xff] }
 0x24b   :  { %v1230_v3 = vld [vmem:[#allocation7 + $0x268] sm:$0xff] }
 0x24c   :  { %v3119_v8 = vpack.c.bf16 %v1230_v3, %v1222_v2  ;;  %v1310_v63 = vld [vmem:[#allocation7 + $0x4e8] sm:$0xff] }
 0x24d   :  { %2970 = vmatpush1.bf16.msra.mxu0 %v2969_v10  ;;  %3098 = vmatpush1.bf16.msra.mxu1 %v3097_v11  ;;  %v1229_v10 = vld [vmem:[#allocation7 + $0x260] sm:$0xff]  ;;  %v1223_v11 = vld [vmem:[#allocation7 + $0x230] sm:$0xff] }
 0x24e   :  { %2972 = vmatprep.subr.bf16.mxu0 %v2971_v14  ;;  %3100 = vmatprep.subr.bf16.mxu1 %v3099_v15  ;;  %v1238_v14 = vld [vmem:[#allocation7 + $0x2a8] sm:$0xff]  ;;  %v3121_v18 = vpack.c.bf16 %v1229_v10, %v1221_v9  ;;  %v3249_v19 = vpack.c.bf16 %v1231_v13, %v1223_v11  ;;  %v1311_v9 = vld [vmem:[#allocation7 + $0x4f0] sm:$0xff]  ;;  %v1328_v13 = vld [vmem:[#allocation7 + $0x578] sm:$0xff] }
 0x24f   :  { %v1246_v15 = vld [vmem:[#allocation7 + $0x2e8] sm:$0xff] }
 0x250   :  { %v3123_v20 = vpack.c.bf16 %v1246_v15, %v1238_v14  ;;  %v1318_v10 = vld [vmem:[#allocation7 + $0x528] sm:$0xff] }
 0x251   :  { %2974 = vmatpush1.bf16.msra.mxu0 %v2973_v22  ;;  %3102 = vmatpush1.bf16.msra.mxu1 %v3101_v23  ;;  %v1245_v22 = vld [vmem:[#allocation7 + $0x2e0] sm:$0xff]  ;;  %v1239_v23 = vld [vmem:[#allocation7 + $0x2b0] sm:$0xff]  ;;  %v1326_v11 = vld [vmem:[#allocation7 + $0x568] sm:$0xff] }
 0x252   :  { %3104 = vmatprep.subr.bf16.mxu0 %v3103_v24  ;;  %3232 = vmatprep.subr.bf16.mxu1 %v3231_v25  ;;  %v3251_v24 = vpack.c.bf16 %v1248_v17, %v1240_v16  ;;  %v1247_v25 = vld [vmem:[#allocation7 + $0x2f0] sm:$0xff]  ;;  %v3125_v32 = vpack.c.bf16 %v1245_v22, %v1237_v21  ;;  %v3143_v16 = vpack.c.bf16 %v1326_v11, %v1318_v10  ;;  %v1317_v17 = vld [vmem:[#allocation7 + $0x520] sm:$0xff]  ;;  %v1334_v22 = vld [vmem:[#allocation7 + $0x5a8] sm:$0xff] }
 0x253   :  { %v3253_v33 = vpack.c.bf16 %v1247_v25, %v1239_v23  ;;  %v1327_v21 = vld [vmem:[#allocation7 + $0x570] sm:$0xff]  ;;  %v1342_v23 = vld [vmem:[#allocation7 + $0x5e8] sm:$0xff]  ;;  %v1344_v25 = vld [vmem:[#allocation7 + $0x5f8] sm:$0xff] }
 0x254   :  { %1801 = vmatmul.mubr.f32.vlgmr.msra.gmra.mrb[2].mxu0 %v3611_v26  ;;  %1943 = vmatmul.mubr.f32.vlgmr.msra.gmra.mrb[2].mxu1 %v3611_v26  ;;  %v1214_v26 = vld [vmem:[#allocation7 + $0x1e8] sm:$0xff]  ;;  %v3147_v30 = vpack.c.bf16 %v1342_v23, %v1334_v22 }
 0x255   :  { %3106 = vmatpush1.bf16.msra.mxu0 %v3105_v36  ;;  %2013 = vmatprep.mubr.f32.mxu0 %v3613_v27  ;;  %v3115_v61 = vpack.c.bf16 %v1214_v26, %v1206_v56  ;;  %v1261_v36 = vld [vmem:[#allocation7 + $0x360] sm:$0xff] }
 0x256   :  { %3234 = vmatpush1.bf16.msra.mxu1 %v3233_v37  ;;  %2155 = vmatprep.mubr.f32.mxu1 %v3613_v27  ;;  %v1205_v27 = vld [vmem:[#allocation7 + $0x1a0] sm:$0xff]  ;;  %v1255_v37 = vld [vmem:[#allocation7 + $0x330] sm:$0xff]  ;;  %v3129_v44 = vpack.c.bf16 %v1261_v36, %v1253_v35  ;;  %v1350_v36 = vld [vmem:[#allocation7 + $0x628] sm:$0xff] }
 0x257   :  { %3108 = vmatprep.subr.bf16.mxu0 %v3107_v41  ;;  %3236 = vmatprep.subr.bf16.mxu1 %v3235_v42  ;;  %v3117_v6 = vpack.c.bf16 %v1213_v62, %v1205_v27  ;;  %v1278_v41 = vld [vmem:[#allocation7 + $0x3e8] sm:$0xff]  ;;  %v1272_v42 = vld [vmem:[#allocation7 + $0x3b8] sm:$0xff]  ;;  %v3257_v45 = vpack.c.bf16 %v1263_v39, %v1255_v37  ;;  %v1295_v27 = vld [vmem:[#allocation7 + $0x470] sm:$0xff] }
 0x258   :  { %v3131_v46 = vpack.c.bf16 %v1278_v41, %v1270_v40  ;;  %v1302_v62 = vld [vmem:[#allocation7 + $0x4a8] sm:$0xff]  ;;  %v1343_v35 = vld [vmem:[#allocation7 + $0x5f0] sm:$0xff]  ;;  %v1360_v39 = vld [vmem:[#allocation7 + $0x678] sm:$0xff] }
 0x259   :  { %3110 = vmatpush1.bf16.msra.mxu0 %v3109_v48  ;;  %v1277_v48 = vld [vmem:[#allocation7 + $0x3e0] sm:$0xff]  ;;  %v3139_v4 = vpack.c.bf16 %v1310_v63, %v1302_v62  ;;  %v1358_v37 = vld [vmem:[#allocation7 + $0x668] sm:$0xff] }
 0x25a   :  { %3238 = vmatpush1.bf16.msra.mxu1 %v3237_v49  ;;  %3112 = vmatprep.subr.bf16.mxu0 %v3111_v50  ;;  %v1271_v49 = vld [vmem:[#allocation7 + $0x3b0] sm:$0xff]  ;;  %v3259_v50 = vpack.c.bf16 %v1280_v43, %v1272_v42  ;;  %v3133_v56 = vpack.c.bf16 %v1277_v48, %v1269_v47  ;;  %v3151_v42 = vpack.c.bf16 %v1358_v37, %v1350_v36  ;;  %v1349_v43 = vld [vmem:[#allocation7 + $0x620] sm:$0xff]  ;;  %v1366_v48 = vld [vmem:[#allocation7 + $0x6a8] sm:$0xff] }
 0x25b   :  { %3240 = vmatprep.subr.bf16.mxu1 %v3239_v54  ;;  %v1288_v54 = vld [vmem:[#allocation7 + $0x438] sm:$0xff]  ;;  %v3261_v26 = vpack.c.bf16 %v1279_v51, %v1271_v49  ;;  %v1359_v47 = vld [vmem:[#allocation7 + $0x670] sm:$0xff]  ;;  %v1374_v49 = vld [vmem:[#allocation7 + $0x6e8] sm:$0xff] }
 0x25c   :  { %v1376_v51 = vld [vmem:[#allocation7 + $0x6f8] sm:$0xff] }
 0x25d   :  { %3114 = vmatpush1.bf16.msra.mxu0 %v3113_v59  ;;  %v1293_v59 = vld [vmem:[#allocation7 + $0x460] sm:$0xff]  ;;  %v1440_v36 = vld [vmem:[#allocation7 + $0x8f8] sm:$0xff] }
 0x25e   :  { %3242 = vmatpush1.bf16.msra.mxu1 %v3241_v60  ;;  %3116 = vmatprep.subr.bf16.mxu0 %v3115_v61  ;;  %v1287_v60 = vld [vmem:[#allocation7 + $0x430] sm:$0xff]  ;;  %v3263_v61 = vpack.c.bf16 %v1296_v55, %v1288_v54  ;;  %v3137_v2 = vpack.c.bf16 %v1293_v59, %v1285_v58  ;;  %v3155_v54 = vpack.c.bf16 %v1374_v49, %v1366_v48  ;;  %v1365_v55 = vld [vmem:[#allocation7 + $0x6a0] sm:$0xff]  ;;  %v1382_v59 = vld [vmem:[#allocation7 + $0x728] sm:$0xff] }
 0x25f   :  { %3244 = vmatprep.subr.bf16.mxu1 %v3243_v0  ;;  %v1304_v0 = vld [vmem:[#allocation7 + $0x4b8] sm:$0xff]  ;;  %v3265_v3 = vpack.c.bf16 %v1295_v27, %v1287_v60  ;;  %v1375_v58 = vld [vmem:[#allocation7 + $0x6f0] sm:$0xff]  ;;  %v1390_v60 = vld [vmem:[#allocation7 + $0x768] sm:$0xff] }
 0x260   :  { %v1392_v27 = vld [vmem:[#allocation7 + $0x778] sm:$0xff] }
 0x261   :  { %3118 = vmatpush1.bf16.msra.mxu0 %v3117_v6  ;;  %v1309_v6 = vld [vmem:[#allocation7 + $0x4e0] sm:$0xff]  ;;  %v1456_v48 = vld [vmem:[#allocation7 + $0x978] sm:$0xff] }
 0x262   :  { %3246 = vmatpush1.bf16.msra.mxu1 %v3245_v7  ;;  %3120 = vmatprep.subr.bf16.mxu0 %v3119_v8  ;;  %v1303_v7 = vld [vmem:[#allocation7 + $0x4b0] sm:$0xff]  ;;  %v3267_v8 = vpack.c.bf16 %v1312_v1, %v1304_v0  ;;  %v3141_v14 = vpack.c.bf16 %v1309_v6, %v1301_v5  ;;  %v3159_v0 = vpack.c.bf16 %v1390_v60, %v1382_v59  ;;  %v1381_v1 = vld [vmem:[#allocation7 + $0x720] sm:$0xff]  ;;  %v1398_v6 = vld [vmem:[#allocation7 + $0x7a8] sm:$0xff] }
 0x263   :  { %3248 = vmatprep.subr.bf16.mxu1 %v3247_v12  ;;  %v1320_v12 = vld [vmem:[#allocation7 + $0x538] sm:$0xff]  ;;  %v3269_v15 = vpack.c.bf16 %v1311_v9, %v1303_v7  ;;  %v1391_v5 = vld [vmem:[#allocation7 + $0x770] sm:$0xff]  ;;  %v1406_v7 = vld [vmem:[#allocation7 + $0x7e8] sm:$0xff] }
 0x264   :  { %v1408_v9 = vld [vmem:[#allocation7 + $0x7f8] sm:$0xff] }
 0x265   :  { %3122 = vmatpush1.bf16.msra.mxu0 %v3121_v18  ;;  %v1325_v18 = vld [vmem:[#allocation7 + $0x560] sm:$0xff]  ;;  %v1464_v59 = vld [vmem:[#allocation7 + $0x9b8] sm:$0xff] }
 0x266   :  { %3250 = vmatpush1.bf16.msra.mxu1 %v3249_v19  ;;  %3124 = vmatprep.subr.bf16.mxu0 %v3123_v20  ;;  %v1319_v19 = vld [vmem:[#allocation7 + $0x530] sm:$0xff]  ;;  %v3271_v20 = vpack.c.bf16 %v1328_v13, %v1320_v12  ;;  %v3145_v28 = vpack.c.bf16 %v1325_v18, %v1317_v17  ;;  %v3163_v12 = vpack.c.bf16 %v1406_v7, %v1398_v6  ;;  %v1397_v13 = vld [vmem:[#allocation7 + $0x7a0] sm:$0xff]  ;;  %v1414_v18 = vld [vmem:[#allocation7 + $0x828] sm:$0xff] }
 0x267   :  { %3252 = vmatprep.subr.bf16.mxu1 %v3251_v24  ;;  %v1336_v24 = vld [vmem:[#allocation7 + $0x5b8] sm:$0xff]  ;;  %v3273_v29 = vpack.c.bf16 %v1327_v21, %v1319_v19  ;;  %v1407_v17 = vld [vmem:[#allocation7 + $0x7f0] sm:$0xff]  ;;  %v1422_v19 = vld [vmem:[#allocation7 + $0x868] sm:$0xff] }
 0x268   :  { %v1424_v21 = vld [vmem:[#allocation7 + $0x878] sm:$0xff] }
 0x269   :  { %3126 = vmatpush1.bf16.msra.mxu0 %v3125_v32  ;;  %v1341_v32 = vld [vmem:[#allocation7 + $0x5e0] sm:$0xff]  ;;  %v1472_v60 = vld [vmem:[#allocation7 + $0x9f8] sm:$0xff] }
 0x26a   :  { %3254 = vmatpush1.bf16.msra.mxu1 %v3253_v33  ;;  %3128 = vmatprep.subr.bf16.mxu0 %v3127_v34  ;;  %v1335_v33 = vld [vmem:[#allocation7 + $0x5b0] sm:$0xff]  ;;  %v3275_v34 = vpack.c.bf16 %v1344_v25, %v1336_v24  ;;  %v3149_v40 = vpack.c.bf16 %v1341_v32, %v1333_v31  ;;  %v3167_v24 = vpack.c.bf16 %v1422_v19, %v1414_v18  ;;  %v1413_v25 = vld [vmem:[#allocation7 + $0x820] sm:$0xff]  ;;  %v1430_v32 = vld [vmem:[#allocation7 + $0x8a8] sm:$0xff] }
 0x26b   :  { %3256 = vmatprep.subr.bf16.mxu1 %v3255_v38  ;;  %v1352_v38 = vld [vmem:[#allocation7 + $0x638] sm:$0xff]  ;;  %v3277_v41 = vpack.c.bf16 %v1343_v35, %v1335_v33  ;;  %v1423_v31 = vld [vmem:[#allocation7 + $0x870] sm:$0xff]  ;;  %v1438_v33 = vld [vmem:[#allocation7 + $0x8e8] sm:$0xff] }
 0x26c   :  { %v1432_v35 = vld [vmem:[#allocation7 + $0x8b8] sm:$0xff] }
 0x26d   :  { %3130 = vmatpush1.bf16.msra.mxu0 %v3129_v44  ;;  %v1357_v44 = vld [vmem:[#allocation7 + $0x660] sm:$0xff]  ;;  %v1480_v6 = vld [vmem:[#allocation7 + $0xa38] sm:$0xff] }
 0x26e   :  { %3258 = vmatpush1.bf16.msra.mxu1 %v3257_v45  ;;  %3132 = vmatprep.subr.bf16.mxu0 %v3131_v46  ;;  %v1351_v45 = vld [vmem:[#allocation7 + $0x630] sm:$0xff]  ;;  %v3279_v46 = vpack.c.bf16 %v1360_v39, %v1352_v38  ;;  %v3153_v52 = vpack.c.bf16 %v1357_v44, %v1349_v43  ;;  %v1429_v38 = vld [vmem:[#allocation7 + $0x8a0] sm:$0xff]  ;;  %v1446_v43 = vld [vmem:[#allocation7 + $0x928] sm:$0xff] }
 0x26f   :  { %3260 = vmatprep.subr.bf16.mxu1 %v3259_v50  ;;  %v1368_v50 = vld [vmem:[#allocation7 + $0x6b8] sm:$0xff]  ;;  %v3281_v53 = vpack.c.bf16 %v1359_v47, %v1351_v45  ;;  %v1437_v39 = vld [vmem:[#allocation7 + $0x8e0] sm:$0xff]  ;;  %v1454_v44 = vld [vmem:[#allocation7 + $0x968] sm:$0xff] }
 0x270   :  { %v3420_v45 = vld [vmem:[#allocation8] sm:$0xff]  ;;  %v1448_v47 = vld [vmem:[#allocation7 + $0x938] sm:$0xff]  ;;  %v3173_v49 = vpack.c.bf16 %v1437_v39, %v1429_v38  ;;  %v1511_v39 = vld [vmem:[#allocation7 + $0xb30] sm:$0xff] }
 0x271   :  { %3134 = vmatpush1.bf16.msra.mxu0 %v3133_v56  ;;  %v1373_v56 = vld [vmem:[#allocation7 + $0x6e0] sm:$0xff]  ;;  %v1488_v7 = vld [vmem:[#allocation7 + $0xa78] sm:$0xff] }
 0x272   :  { %3262 = vmatpush1.bf16.msra.mxu1 %v3261_v26  ;;  %3136 = vmatprep.subr.bf16.mxu0 %v3135_v57  ;;  %v1367_v26 = vld [vmem:[#allocation7 + $0x6b0] sm:$0xff]  ;;  %v3283_v57 = vpack.c.bf16 %v1376_v51, %v1368_v50  ;;  %v3157_v62 = vpack.c.bf16 %v1373_v56, %v1365_v55  ;;  %v3421_v50 = vld [vmem:[#allocation8 + $0x18] sm:$0xff]  ;;  %v3303_v56 = vpack.c.bf16 %v1456_v48, %v1448_v47  ;;  %v1517_v38 = vld [vmem:[#allocation7 + $0xb60] sm:$0xff] }
 0x273   :  { %3264 = vmatprep.subr.bf16.mxu1 %v3263_v61  ;;  %v1384_v61 = vld [vmem:[#allocation7 + $0x738] sm:$0xff]  ;;  %v3285_v63 = vpack.c.bf16 %v1375_v58, %v1367_v26  ;;  %v1447_v55 = vld [vmem:[#allocation7 + $0x930] sm:$0xff]  ;;  %v1470_v58 = vld [vmem:[#allocation7 + $0x9e8] sm:$0xff] }
 0x274   :  { %v1455_v26 = vld [vmem:[#allocation7 + $0x970] sm:$0xff]  ;;  %v1496_v18 = vld [vmem:[#allocation7 + $0xab8] sm:$0xff] }
 0x275   :  { %3138 = vmatpush1.bf16.msra.mxu0 %v3137_v2  ;;  %v1389_v2 = vld [vmem:[#allocation7 + $0x760] sm:$0xff]  ;;  %v1504_v19 = vld [vmem:[#allocation7 + $0xaf8] sm:$0xff] }
 0x276   :  { %3266 = vmatpush1.bf16.msra.mxu1 %v3265_v3  ;;  %3140 = vmatprep.subr.bf16.mxu0 %v3139_v4  ;;  %v1383_v3 = vld [vmem:[#allocation7 + $0x730] sm:$0xff]  ;;  %v3287_v4 = vpack.c.bf16 %v1392_v27, %v1384_v61  ;;  %v3161_v10 = vpack.c.bf16 %v1389_v2, %v1381_v1  ;;  %v3305_v27 = vpack.c.bf16 %v1455_v26, %v1447_v55  ;;  %v1550_v55 = vld [vmem:[#allocation7 + $0xc68] sm:$0xff]  ;;  %v1552_v26 = vld [vmem:[#allocation7 + $0xc78] sm:$0xff] }
 0x277   :  { %3268 = vmatprep.subr.bf16.mxu1 %v3267_v8  ;;  %v1400_v8 = vld [vmem:[#allocation7 + $0x7b8] sm:$0xff]  ;;  %v3289_v11 = vpack.c.bf16 %v1391_v5, %v1383_v3  ;;  %v1463_v1 = vld [vmem:[#allocation7 + $0x9b0] sm:$0xff]  ;;  %v3307_v2 = vpack.c.bf16 %v1472_v60, %v1464_v59  ;;  %v1486_v5 = vld [vmem:[#allocation7 + $0xa68] sm:$0xff] }
 0x278   :  { %v1471_v3 = vld [vmem:[#allocation7 + $0x9f0] sm:$0xff]  ;;  %v1541_v60 = vld [vmem:[#allocation7 + $0xc20] sm:$0xff] }
 0x279   :  { %3142 = vmatpush1.bf16.msra.mxu0 %v3141_v14  ;;  %v1405_v14 = vld [vmem:[#allocation7 + $0x7e0] sm:$0xff] }
 0x27a   :  { %3270 = vmatpush1.bf16.msra.mxu1 %v3269_v15  ;;  %3144 = vmatprep.subr.bf16.mxu0 %v3143_v16  ;;  %v1399_v15 = vld [vmem:[#allocation7 + $0x7b0] sm:$0xff]  ;;  %v3291_v16 = vpack.c.bf16 %v1408_v9, %v1400_v8  ;;  %v3165_v22 = vpack.c.bf16 %v1405_v14, %v1397_v13  ;;  %v3309_v9 = vpack.c.bf16 %v1471_v3, %v1463_v1  ;;  %v1566_v1 = vld [vmem:[#allocation7 + $0xce8] sm:$0xff]  ;;  %v1568_v3 = vld [vmem:[#allocation7 + $0xcf8] sm:$0xff] }
 0x27b   :  { %3272 = vmatprep.subr.bf16.mxu1 %v3271_v20  ;;  %v1416_v20 = vld [vmem:[#allocation7 + $0x838] sm:$0xff]  ;;  %v3293_v23 = vpack.c.bf16 %v1407_v17, %v1399_v15  ;;  %v1479_v13 = vld [vmem:[#allocation7 + $0xa30] sm:$0xff]  ;;  %v3311_v14 = vpack.c.bf16 %v1488_v7, %v1480_v6  ;;  %v1502_v17 = vld [vmem:[#allocation7 + $0xae8] sm:$0xff] }
 0x27c   :  { %v1487_v15 = vld [vmem:[#allocation7 + $0xa70] sm:$0xff]  ;;  %v1557_v7 = vld [vmem:[#allocation7 + $0xca0] sm:$0xff] }
 0x27d   :  { %3146 = vmatpush1.bf16.msra.mxu0 %v3145_v28  ;;  %v1421_v28 = vld [vmem:[#allocation7 + $0x860] sm:$0xff] }
 0x27e   :  { %3274 = vmatpush1.bf16.msra.mxu1 %v3273_v29  ;;  %3148 = vmatprep.subr.bf16.mxu0 %v3147_v30  ;;  %v3295_v29 = vpack.c.bf16 %v1424_v21, %v1416_v20  ;;  %v1415_v30 = vld [vmem:[#allocation7 + $0x830] sm:$0xff]  ;;  %v3313_v21 = vpack.c.bf16 %v1487_v15, %v1479_v13  ;;  %v1582_v13 = vld [vmem:[#allocation7 + $0xd68] sm:$0xff]  ;;  %v1584_v15 = vld [vmem:[#allocation7 + $0xd78] sm:$0xff] }
 0x27f   :  { %3276 = vmatprep.subr.bf16.mxu1 %v3275_v34  ;;  %v3169_v34 = vpack.c.bf16 %v1421_v28, %v1413_v25  ;;  %v3297_v37 = vpack.c.bf16 %v1423_v31, %v1415_v30  ;;  %v1495_v25 = vld [vmem:[#allocation7 + $0xab0] sm:$0xff]  ;;  %v3315_v28 = vpack.c.bf16 %v1504_v19, %v1496_v18  ;;  %v1510_v30 = vld [vmem:[#allocation7 + $0xb28] sm:$0xff]  ;;  %v1573_v19 = vld [vmem:[#allocation7 + $0xd20] sm:$0xff] }
 0x280   :  { %v1518_v31 = vld [vmem:[#allocation7 + $0xb68] sm:$0xff] }
 0x281   :  { %3150 = vmatpush1.bf16.msra.mxu0 %v3149_v40  ;;  %v1431_v40 = vld [vmem:[#allocation7 + $0x8b0] sm:$0xff] }
 0x282   :  { %3278 = vmatpush1.bf16.msra.mxu1 %v3277_v41  ;;  %3152 = vmatprep.subr.bf16.mxu0 %v3151_v42  ;;  %v3171_v41 = vpack.c.bf16 %v1438_v33, %v1430_v32  ;;  %v1439_v42 = vld [vmem:[#allocation7 + $0x8f0] sm:$0xff]  ;;  %v1512_v32 = vld [vmem:[#allocation7 + $0xb38] sm:$0xff] }
 0x283   :  { %3280 = vmatprep.subr.bf16.mxu1 %v3279_v46  ;;  %v3299_v46 = vpack.c.bf16 %v1440_v36, %v1432_v35  ;;  %v3301_v51 = vpack.c.bf16 %v1439_v42, %v1431_v40  ;;  %v1520_v33 = vld [vmem:[#allocation7 + $0xb78] sm:$0xff]  ;;  %v3191_v36 = vpack.c.bf16 %v1518_v31, %v1510_v30  ;;  %v1526_v42 = vld [vmem:[#allocation7 + $0xba8] sm:$0xff] }
 0x284   :  { %v3319_v40 = vpack.c.bf16 %v1520_v33, %v1512_v32  ;;  %v1589_v33 = vld [vmem:[#allocation7 + $0xda0] sm:$0xff] }
 0x285   :  { %3154 = vmatpush1.bf16.msra.mxu0 %v3153_v52  ;;  %v3175_v52 = vpack.c.bf16 %v1454_v44, %v1446_v43  ;;  %v1534_v43 = vld [vmem:[#allocation7 + $0xbe8] sm:$0xff]  ;;  %v1528_v44 = vld [vmem:[#allocation7 + $0xbb8] sm:$0xff] }
 0x286   :  { %3282 = vmatpush1.bf16.msra.mxu1 %v3281_v53  ;;  %3156 = vmatprep.subr.bf16.mxu0 %v3155_v54  ;;  %v1445_v53 = vld [vmem:[#allocation7 + $0x920] sm:$0xff]  ;;  %v3195_v48 = vpack.c.bf16 %v1534_v43, %v1526_v42 }
 0x287   :  { %3284 = vmatprep.subr.bf16.mxu1 %v3283_v57  ;;  %v1453_v54 = vld [vmem:[#allocation7 + $0x960] sm:$0xff]  ;;  %v1462_v57 = vld [vmem:[#allocation7 + $0x9a8] sm:$0xff] }
 0x288   :  { %v3177_v61 = vpack.c.bf16 %v1453_v54, %v1445_v53  ;;  %v1535_v53 = vld [vmem:[#allocation7 + $0xbf0] sm:$0xff]  ;;  %v1542_v54 = vld [vmem:[#allocation7 + $0xc28] sm:$0xff] }
 0x289   :  { %3158 = vmatpush1.bf16.msra.mxu0 %v3157_v62  ;;  %v3179_v62 = vpack.c.bf16 %v1470_v58, %v1462_v57  ;;  %v3199_v59 = vpack.c.bf16 %v1550_v55, %v1542_v54 }
 0x28a   :  { %3286 = vmatpush1.bf16.msra.mxu1 %v3285_v63  ;;  %3160 = vmatprep.subr.bf16.mxu0 %v3159_v0  ;;  %v1461_v63 = vld [vmem:[#allocation7 + $0x9a0] sm:$0xff] }
 0x28b   :  { %3288 = vmatprep.subr.bf16.mxu1 %v3287_v4  ;;  %v1469_v0 = vld [vmem:[#allocation7 + $0x9e0] sm:$0xff]  ;;  %v1478_v4 = vld [vmem:[#allocation7 + $0xa28] sm:$0xff] }
 0x28c   :  { %v3181_v8 = vpack.c.bf16 %v1469_v0, %v1461_v63  ;;  %v1551_v63 = vld [vmem:[#allocation7 + $0xc70] sm:$0xff]  ;;  %v1558_v0 = vld [vmem:[#allocation7 + $0xca8] sm:$0xff] }
 0x28d   :  { %3162 = vmatpush1.bf16.msra.mxu0 %v3161_v10  ;;  %v3183_v10 = vpack.c.bf16 %v1486_v5, %v1478_v4  ;;  %v3203_v6 = vpack.c.bf16 %v1566_v1, %v1558_v0 }
 0x28e   :  { %3290 = vmatpush1.bf16.msra.mxu1 %v3289_v11  ;;  %3164 = vmatprep.subr.bf16.mxu0 %v3163_v12  ;;  %v1477_v11 = vld [vmem:[#allocation7 + $0xa20] sm:$0xff] }
 0x28f   :  { %3292 = vmatprep.subr.bf16.mxu1 %v3291_v16  ;;  %v1485_v12 = vld [vmem:[#allocation7 + $0xa60] sm:$0xff]  ;;  %v1494_v16 = vld [vmem:[#allocation7 + $0xaa8] sm:$0xff] }
 0x290   :  { %v3185_v20 = vpack.c.bf16 %v1485_v12, %v1477_v11  ;;  %v1567_v11 = vld [vmem:[#allocation7 + $0xcf0] sm:$0xff]  ;;  %v1574_v12 = vld [vmem:[#allocation7 + $0xd28] sm:$0xff] }
 0x291   :  { %3166 = vmatpush1.bf16.msra.mxu0 %v3165_v22  ;;  %v3187_v22 = vpack.c.bf16 %v1502_v17, %v1494_v16  ;;  %v3207_v18 = vpack.c.bf16 %v1582_v13, %v1574_v12 }
 0x292   :  { %3294 = vmatpush1.bf16.msra.mxu1 %v3293_v23  ;;  %3168 = vmatprep.subr.bf16.mxu0 %v3167_v24  ;;  %v1493_v23 = vld [vmem:[#allocation7 + $0xaa0] sm:$0xff] }
 0x293   :  { %3296 = vmatprep.subr.bf16.mxu1 %v3295_v29  ;;  %v1501_v24 = vld [vmem:[#allocation7 + $0xae0] sm:$0xff]  ;;  %v1503_v29 = vld [vmem:[#allocation7 + $0xaf0] sm:$0xff] }
 0x294   :  { %2014 = vmatmul.mubr.f32.vlgmr.msra.gmra.mrb[4].mxu0 %v3420_v45  ;;  %v3317_v35 = vpack.c.bf16 %v1503_v29, %v1495_v25  ;;  %v1598_v25 = vld [vmem:[#allocation7 + $0xde8] sm:$0xff]  ;;  %v1600_v29 = vld [vmem:[#allocation7 + $0xdf8] sm:$0xff] }
 0x295   :  { %2156 = vmatmul.mubr.f32.vlgmr.msra.gmra.mrb[4].mxu1 %v3420_v45  ;;  %3170 = vmatpush1.bf16.msra.mxu0 %v3169_v34  ;;  %v3189_v34 = vpack.c.bf16 %v1501_v24, %v1493_v23  ;;  %v1536_v45 = vld [vmem:[#allocation7 + $0xbf8] sm:$0xff]  ;;  %v1583_v23 = vld [vmem:[#allocation7 + $0xd70] sm:$0xff]  ;;  %v1590_v24 = vld [vmem:[#allocation7 + $0xda8] sm:$0xff] }
 0x296   :  { %2084 = vmatprep.mubr.f32.mxu0 %v3421_v50  ;;  %3298 = vmatpush1.bf16.msra.mxu1 %v3297_v37  ;;  %v1509_v37 = vld [vmem:[#allocation7 + $0xb20] sm:$0xff]  ;;  %v3211_v32 = vpack.c.bf16 %v1598_v25, %v1590_v24 }
 0x297   :  { %2226 = vmatprep.mubr.f32.mxu1 %v3421_v50  ;;  %3172 = vmatprep.subr.bf16.mxu0 %v3171_v41  ;;  %v1519_v41 = vld [vmem:[#allocation7 + $0xb70] sm:$0xff]  ;;  %v1533_v50 = vld [vmem:[#allocation7 + $0xbe0] sm:$0xff] }
 0x298   :  { %3300 = vmatprep.subr.bf16.mxu1 %v3299_v46  ;;  %v3193_v46 = vpack.c.bf16 %v1517_v38, %v1509_v37  ;;  %v3321_v47 = vpack.c.bf16 %v1519_v41, %v1511_v39  ;;  %v1599_v37 = vld [vmem:[#allocation7 + $0xdf0] sm:$0xff]  ;;  %v1606_v38 = vld [vmem:[#allocation7 + $0xe28] sm:$0xff]  ;;  %v1616_v41 = vld [vmem:[#allocation7 + $0xe78] sm:$0xff] }
 0x299   :  { %3174 = vmatpush1.bf16.msra.mxu0 %v3173_v49  ;;  %v1525_v49 = vld [vmem:[#allocation7 + $0xba0] sm:$0xff]  ;;  %v1614_v39 = vld [vmem:[#allocation7 + $0xe68] sm:$0xff] }
 0x29a   :  { %3302 = vmatpush1.bf16.msra.mxu1 %v3301_v51  ;;  %3176 = vmatprep.subr.bf16.mxu0 %v3175_v52  ;;  %v1527_v51 = vld [vmem:[#allocation7 + $0xbb0] sm:$0xff]  ;;  %v3323_v52 = vpack.c.bf16 %v1536_v45, %v1528_v44  ;;  %v3197_v57 = vpack.c.bf16 %v1533_v50, %v1525_v49  ;;  %v3215_v44 = vpack.c.bf16 %v1614_v39, %v1606_v38  ;;  %v1605_v45 = vld [vmem:[#allocation7 + $0xe20] sm:$0xff]  ;;  %v1622_v50 = vld [vmem:[#allocation7 + $0xea8] sm:$0xff] }
 0x29b   :  { %3304 = vmatprep.subr.bf16.mxu1 %v3303_v56  ;;  %v1544_v56 = vld [vmem:[#allocation7 + $0xc38] sm:$0xff]  ;;  %v3325_v58 = vpack.c.bf16 %v1535_v53, %v1527_v51  ;;  %v1615_v49 = vld [vmem:[#allocation7 + $0xe70] sm:$0xff]  ;;  %v1630_v51 = vld [vmem:[#allocation7 + $0xee8] sm:$0xff] }
 0x29c   :  { %v1632_v53 = vld [vmem:[#allocation7 + $0xef8] sm:$0xff] }
 0x29d   :  { %3178 = vmatpush1.bf16.msra.mxu0 %v3177_v61  ;;  %v1549_v61 = vld [vmem:[#allocation7 + $0xc60] sm:$0xff] }
 0x29e   :  { %3306 = vmatpush1.bf16.msra.mxu1 %v3305_v27  ;;  %3180 = vmatprep.subr.bf16.mxu0 %v3179_v62  ;;  %v1543_v27 = vld [vmem:[#allocation7 + $0xc30] sm:$0xff]  ;;  %v3327_v62 = vpack.c.bf16 %v1552_v26, %v1544_v56  ;;  %v3201_v4 = vpack.c.bf16 %v1549_v61, %v1541_v60  ;;  %v3219_v56 = vpack.c.bf16 %v1630_v51, %v1622_v50  ;;  %v1621_v26 = vld [vmem:[#allocation7 + $0xea0] sm:$0xff]  ;;  %v1638_v61 = vld [vmem:[#allocation7 + $0xf28] sm:$0xff] }
 0x29f   :  { %3308 = vmatprep.subr.bf16.mxu1 %v3307_v2  ;;  %v1560_v2 = vld [vmem:[#allocation7 + $0xcb8] sm:$0xff]  ;;  %v3329_v5 = vpack.c.bf16 %v1551_v63, %v1543_v27  ;;  %v1631_v60 = vld [vmem:[#allocation7 + $0xef0] sm:$0xff]  ;;  %v1646_v27 = vld [vmem:[#allocation7 + $0xf68] sm:$0xff] }
 0x2a0   :  { %v1648_v63 = vld [vmem:[#allocation7 + $0xf78] sm:$0xff] }
 0x2a1   :  { %3182 = vmatpush1.bf16.msra.mxu0 %v3181_v8  ;;  %v1565_v8 = vld [vmem:[#allocation7 + $0xce0] sm:$0xff] }
 0x2a2   :  { %3310 = vmatpush1.bf16.msra.mxu1 %v3309_v9  ;;  %3184 = vmatprep.subr.bf16.mxu0 %v3183_v10  ;;  %v1559_v9 = vld [vmem:[#allocation7 + $0xcb0] sm:$0xff]  ;;  %v3331_v10 = vpack.c.bf16 %v1568_v3, %v1560_v2  ;;  %v3205_v16 = vpack.c.bf16 %v1565_v8, %v1557_v7  ;;  %v3223_v2 = vpack.c.bf16 %v1646_v27, %v1638_v61  ;;  %v1637_v3 = vld [vmem:[#allocation7 + $0xf20] sm:$0xff]  ;;  %v1654_v8 = vld [vmem:[#allocation7 + $0xfa8] sm:$0xff] }
 0x2a3   :  { %3312 = vmatprep.subr.bf16.mxu1 %v3311_v14  ;;  %v1576_v14 = vld [vmem:[#allocation7 + $0xd38] sm:$0xff]  ;;  %v3333_v17 = vpack.c.bf16 %v1567_v11, %v1559_v9  ;;  %v1647_v7 = vld [vmem:[#allocation7 + $0xf70] sm:$0xff]  ;;  %v1662_v9 = vld [vmem:[#allocation7 + $0xfe8] sm:$0xff] }
 0x2a4   :  { %v1664_v11 = vld [vmem:[#allocation7 + $0xff8] sm:$0xff] }
 0x2a5   :  { %3186 = vmatpush1.bf16.msra.mxu0 %v3185_v20  ;;  %v1581_v20 = vld [vmem:[#allocation7 + $0xd60] sm:$0xff] }
 0x2a6   :  { %3314 = vmatpush1.bf16.msra.mxu1 %v3313_v21  ;;  %3188 = vmatprep.subr.bf16.mxu0 %v3187_v22  ;;  %v1575_v21 = vld [vmem:[#allocation7 + $0xd30] sm:$0xff]  ;;  %v3335_v22 = vpack.c.bf16 %v1584_v15, %v1576_v14  ;;  %v3209_v30 = vpack.c.bf16 %v1581_v20, %v1573_v19  ;;  %v3227_v14 = vpack.c.bf16 %v1662_v9, %v1654_v8  ;;  %v1653_v15 = vld [vmem:[#allocation7 + $0xfa0] sm:$0xff] }
 0x2a7   :  { %3316 = vmatprep.subr.bf16.mxu1 %v3315_v28  ;;  %v1592_v28 = vld [vmem:[#allocation7 + $0xdb8] sm:$0xff]  ;;  %v3337_v31 = vpack.c.bf16 %v1583_v23, %v1575_v21  ;;  %v1663_v19 = vld [vmem:[#allocation7 + $0xff0] sm:$0xff] }
 0x2a9   :  { %3190 = vmatpush1.bf16.msra.mxu0 %v3189_v34  ;;  %v1597_v34 = vld [vmem:[#allocation7 + $0xde0] sm:$0xff] }
 0x2aa   :  { %3318 = vmatpush1.bf16.msra.mxu1 %v3317_v35  ;;  %3192 = vmatprep.subr.bf16.mxu0 %v3191_v36  ;;  %v1591_v35 = vld [vmem:[#allocation7 + $0xdb0] sm:$0xff]  ;;  %v3339_v36 = vpack.c.bf16 %v1600_v29, %v1592_v28  ;;  %v3213_v42 = vpack.c.bf16 %v1597_v34, %v1589_v33 }
 0x2ab   :  { %3320 = vmatprep.subr.bf16.mxu1 %v3319_v40  ;;  %v1608_v40 = vld [vmem:[#allocation7 + $0xe38] sm:$0xff]  ;;  %v3341_v43 = vpack.c.bf16 %v1599_v37, %v1591_v35 }
 0x2ad   :  { %3194 = vmatpush1.bf16.msra.mxu0 %v3193_v46  ;;  %v1613_v46 = vld [vmem:[#allocation7 + $0xe60] sm:$0xff] }
 0x2ae   :  { %3322 = vmatpush1.bf16.msra.mxu1 %v3321_v47  ;;  %3196 = vmatprep.subr.bf16.mxu0 %v3195_v48  ;;  %v1607_v47 = vld [vmem:[#allocation7 + $0xe30] sm:$0xff]  ;;  %v3343_v48 = vpack.c.bf16 %v1616_v41, %v1608_v40  ;;  %v3217_v54 = vpack.c.bf16 %v1613_v46, %v1605_v45 }
 0x2af   :  { %3324 = vmatprep.subr.bf16.mxu1 %v3323_v52  ;;  %v1624_v52 = vld [vmem:[#allocation7 + $0xeb8] sm:$0xff]  ;;  %v3345_v55 = vpack.c.bf16 %v1615_v49, %v1607_v47 }
 0x2b1   :  { %3198 = vmatpush1.bf16.msra.mxu0 %v3197_v57  ;;  %v1629_v57 = vld [vmem:[#allocation7 + $0xee0] sm:$0xff] }
 0x2b2   :  { %3326 = vmatpush1.bf16.msra.mxu1 %v3325_v58  ;;  %3200 = vmatprep.subr.bf16.mxu0 %v3199_v59  ;;  %v1623_v58 = vld [vmem:[#allocation7 + $0xeb0] sm:$0xff]  ;;  %v3347_v59 = vpack.c.bf16 %v1632_v53, %v1624_v52  ;;  %v3221_v0 = vpack.c.bf16 %v1629_v57, %v1621_v26 }
 0x2b3   :  { %3328 = vmatprep.subr.bf16.mxu1 %v3327_v62  ;;  %v1640_v62 = vld [vmem:[#allocation7 + $0xf38] sm:$0xff]  ;;  %v3349_v1 = vpack.c.bf16 %v1631_v60, %v1623_v58 }
 0x2b5   :  { %3202 = vmatpush1.bf16.msra.mxu0 %v3201_v4  ;;  %v1645_v4 = vld [vmem:[#allocation7 + $0xf60] sm:$0xff] }
 0x2b6   :  { %3330 = vmatpush1.bf16.msra.mxu1 %v3329_v5  ;;  %3204 = vmatprep.subr.bf16.mxu0 %v3203_v6  ;;  %v1639_v5 = vld [vmem:[#allocation7 + $0xf30] sm:$0xff]  ;;  %v3351_v6 = vpack.c.bf16 %v1648_v63, %v1640_v62  ;;  %v3225_v12 = vpack.c.bf16 %v1645_v4, %v1637_v3 }
 0x2b7   :  { %3332 = vmatprep.subr.bf16.mxu1 %v3331_v10  ;;  %v1656_v10 = vld [vmem:[#allocation7 + $0xfb8] sm:$0xff]  ;;  %v3353_v13 = vpack.c.bf16 %v1647_v7, %v1639_v5 }
 0x2b9   :  { %3206 = vmatpush1.bf16.msra.mxu0 %v3205_v16  ;;  %v1661_v16 = vld [vmem:[#allocation7 + $0xfe0] sm:$0xff] }
 0x2ba   :  { %3334 = vmatpush1.bf16.msra.mxu1 %v3333_v17  ;;  %3208 = vmatprep.subr.bf16.mxu0 %v3207_v18  ;;  %v3355_v17 = vpack.c.bf16 %v1664_v11, %v1656_v10  ;;  %v1655_v18 = vld [vmem:[#allocation7 + $0xfb0] sm:$0xff]  ;;  %v3229_v20 = vpack.c.bf16 %v1661_v16, %v1653_v15 }
 0x2bb   :  { %3336 = vmatprep.subr.bf16.mxu1 %v3335_v22  ;;  %v3357_v21 = vpack.c.bf16 %v1663_v19, %v1655_v18  ;;  %v3422_v22 = vld [vmem:[#allocation8 + $0x10] sm:$0xff] }
 0x2bd   :  { %3210 = vmatpush1.bf16.msra.mxu0 %v3209_v30 }
 0x2be   :  { %3338 = vmatpush1.bf16.msra.mxu1 %v3337_v31  ;;  %3212 = vmatprep.subr.bf16.mxu0 %v3211_v32 }
 0x2bf   :  { %3340 = vmatprep.subr.bf16.mxu1 %v3339_v36 }
 0x2c1   :  { %3214 = vmatpush1.bf16.msra.mxu0 %v3213_v42 }
 0x2c2   :  { %3342 = vmatpush1.bf16.msra.mxu1 %v3341_v43  ;;  %3216 = vmatprep.subr.bf16.mxu0 %v3215_v44 }
 0x2c3   :  { %3344 = vmatprep.subr.bf16.mxu1 %v3343_v48 }
 0x2c5   :  { %3218 = vmatpush1.bf16.msra.mxu0 %v3217_v54 }
 0x2c6   :  { %3346 = vmatpush1.bf16.msra.mxu1 %v3345_v55  ;;  %3220 = vmatprep.subr.bf16.mxu0 %v3219_v56 }
 0x2c7   :  { %3348 = vmatprep.subr.bf16.mxu1 %v3347_v59 }
 0x2c9   :  { %3222 = vmatpush1.bf16.msra.mxu0 %v3221_v0 }
 0x2ca   :  { %3350 = vmatpush1.bf16.msra.mxu1 %v3349_v1  ;;  %3224 = vmatprep.subr.bf16.mxu0 %v3223_v2 }
 0x2cb   :  { %3352 = vmatprep.subr.bf16.mxu1 %v3351_v6 }
 0x2cd   :  { %3226 = vmatpush1.bf16.msra.mxu0 %v3225_v12 }
 0x2ce   :  { %3354 = vmatpush1.bf16.msra.mxu1 %v3353_v13  ;;  %3228 = vmatprep.subr.bf16.mxu0 %v3227_v14 }
 0x2cf   :  { %3356 = vmatprep.subr.bf16.mxu1 %v3355_v17 }
 0x2d1   :  { %3230 = vmatpush1.bf16.msra.mxu0 %v3229_v20 }
 0x2d2   :  { %3358 = vmatpush1.bf16.msra.mxu1 %v3357_v21 }
 0x2d4   :  { %2085 = vmatmul.mubr.f32.vlgmr.msra.gmra.mrb[4].mxu0 %v3422_v22 }
 0x2d5   :  { %2227 = vmatmul.mubr.f32.vlgmr.msra.gmra.mrb[4].mxu1 %v3422_v22 }
 0x327   :  { %v1802_v23 = vpop.f32.mrb[2].mxu0  ;;  %v1944_v24 = vpop.f32.mrb[2].mxu1 }
 0x328   :  { %v2233_v25 = vsub.f32 0.0, %v1802_v23  ;;  %v2235_v28 = vsub.f32 0.0, %v1944_v24  ;;  %v1804_v29 = vpop.f32.mrb[3].mxu0  ;;  %v1946_v30 = vpop.f32.mrb[3].mxu1 }
 0x329   :  { %v2234_v31 = vsub.f32 0.0, %v1804_v29  ;;  %v2236_v32 = vsub.f32 0.0, %v1946_v30 }
 0x32a   :  { %v2241_v33 = vmul.f32 1.442695, %v2233_v25  ;;  %v2245_v34 = vmul.f32 1.442695, %v2235_v28 }
 0x32b   :  { %v2243_v35 = vmul.f32 1.442695, %v2234_v31  ;;  %v2247_v36 = vmul.f32 1.442695, %v2236_v32 }
 0x32c   :  { %3388 = vpow2.f32 %v2241_v33 }
 0x32d   :  { %3390 = vpow2.f32 %v2245_v34 }
 0x32e   :  { %3392 = vpow2.f32 %v2243_v35 }
 0x32f   :  { %3394 = vpow2.f32 %v2247_v36 }
 0x336   :  { %v3389_v37 = vpop.eup %3388 }
 0x337   :  { %v3391_v38 = vpop.eup %3390  ;;  %v2257_v39 = vadd.f32 1.0, %v3389_v37 }
 0x338   :  { %v3393_v40 = vpop.eup %3392  ;;  %v2259_v41 = vadd.f32 1.0, %v3391_v38 }
 0x339   :  { %v3395_v42 = vpop.eup %3394  ;;  %3396 = vrcp.f32 %v2257_v39  ;;  %v2258_v43 = vadd.f32 1.0, %v3393_v40 }
 0x33a   :  { %3398 = vrcp.f32 %v2259_v41  ;;  %v2260_v44 = vadd.f32 1.0, %v3395_v42 }
 0x33b   :  { %3400 = vrcp.f32 %v2258_v43 }
 0x33c   :  { %3402 = vrcp.f32 %v2260_v44 }
 0x343   :  { %v3397_v45 = vpop.eup %3396 }
 0x344   :  { %v3399_v46 = vpop.eup %3398  ;;  %v2273_v47 = vmul.f32 %v3397_v45, %v2257_v39 }
 0x345   :  { %v3401_v48 = vpop.eup %3400  ;;  %v2275_v49 = vmul.f32 %v3399_v46, %v2259_v41 }
 0x346   :  { %v3403_v50 = vpop.eup %3402  ;;  %v2281_v51 = vsub.f32 2.0, %v2273_v47  ;;  %v2274_v52 = vmul.f32 %v3401_v48, %v2258_v43 }
 0x347   :  { %v2283_v53 = vsub.f32 2.0, %v2275_v49  ;;  %v2276_v54 = vmul.f32 %v3403_v50, %v2260_v44 }
 0x348   :  { %v2289_v55 = vmul.f32 %v3397_v45, %v2281_v51  ;;  %v2282_v56 = vsub.f32 2.0, %v2274_v52 }
 0x349   :  { %v2291_v26 = vmul.f32 %v3399_v46, %v2283_v53  ;;  %v2284_v57 = vsub.f32 2.0, %v2276_v54 }
 0x34a   :  { %2297 = vst [vmem:[#allocation9] sm:$0xff] %v2289_v55  ;;  %v2290_v58 = vmul.f32 %v3401_v48, %v2282_v56 }
 0x34b   :  { %2299 = vst [vmem:[#allocation9 + $0x10] sm:$0xff] %v2291_v26  ;;  %v2292_v59 = vmul.f32 %v3403_v50, %v2284_v57 }
 0x34c   :  { %2298 = vst [vmem:[#allocation9 + $0x8] sm:$0xff] %v2290_v58 }
 0x34d   :  { %2300 = vst [vmem:[#allocation9 + $0x18] sm:$0xff] %v2292_v59 }
 0x34e   :  { %3500 = shalt.err (!%p3497_p0)
}
 0x34f   :  { %s3501_s5 = scalar_lea.hbm %s3650_s3, 512 }
 0x350   :  { %p3502_p1 = scmp.ne.s32.totalorder %s3650_s3, %s3501_s5  ;;  %p3505_p2 = scmp.lt.u32.totalorder %s3501_s5, %s3650_s3 }
 0x352   :  { %p3507_p3 = pnand %p3505_p2, %p3502_p1 }
 0x354   :  { %3510 = shalt.err (!%p3507_p3)
}
 0x355   :  { %2314 = dma.vmem_to_hbm [thread:$0]  %s2312_s27, 512, %s3650_s3, [#allocation4]  }
 0x356   :  { %s3549_s3 = smov [#allocation9]  }
 0x357   :  { %s2321_s12 = sshll.u32 %s3549_s3, 4  ;;  %s2322_s12 = int_to_ptr.vmem [resolvable:$true] %s2321_s12 }
 0x358   :  { %s3511_s13 = scalar_lea.vmem %s2322_s12, 1024  ;;  %p3516_p5 = scmp.lt.s32.totalorder %s2322_s12, %s2322_s12 }
 0x359   :  { %p3512_p4 = scmp.ne.s32.totalorder %s2322_s12, %s3511_s13  ;;  %p3517_p6 = scmp.lt.s32.totalorder %s3511_s13, %s3511_s13 }
 0x35b   :  { %p3518_p7 = por %p3517_p6, %p3516_p5 }
 0x35d   :  { %p3519_p8 = pnand %p3518_p7, %p3512_p4 }
 0x3a7   :  { %v2086_v60 = vpop.f32.mrb[4].mxu0 }
 0x3a8   :  { %v2237_v61 = vsub.f32 0.0, %v2086_v60  ;;  %v2228_v27 = vpop.f32.mrb[4].mxu1  ;;  %v2088_v62 = vpop.f32.mrb[5].mxu0 }
 0x3a9   :  { %v2239_v63 = vsub.f32 0.0, %v2228_v27  ;;  %v2238_v0 = vsub.f32 0.0, %v2088_v62  ;;  %v2230_v1 = vpop.f32.mrb[5].mxu1 }
 0x3aa   :  { %v2249_v2 = vmul.f32 1.442695, %v2237_v61  ;;  %v2240_v3 = vsub.f32 0.0, %v2230_v1 }
 0x3ab   :  { %v2253_v4 = vmul.f32 1.442695, %v2239_v63  ;;  %v2251_v5 = vmul.f32 1.442695, %v2238_v0 }
 0x3ac   :  { %3404 = vpow2.f32 %v2249_v2  ;;  %v2255_v6 = vmul.f32 1.442695, %v2240_v3 }
 0x3ad   :  { %3406 = vpow2.f32 %v2253_v4 }
 0x3ae   :  { %3408 = vpow2.f32 %v2251_v5 }
 0x3af   :  { %3410 = vpow2.f32 %v2255_v6 }
 0x3b6   :  { %v3405_v7 = vpop.eup %3404 }
 0x3b7   :  { %v3407_v8 = vpop.eup %3406  ;;  %v2261_v9 = vadd.f32 1.0, %v3405_v7 }
 0x3b8   :  { %v3409_v10 = vpop.eup %3408  ;;  %v2263_v11 = vadd.f32 1.0, %v3407_v8 }
 0x3b9   :  { %v3411_v12 = vpop.eup %3410  ;;  %3412 = vrcp.f32 %v2261_v9  ;;  %v2262_v13 = vadd.f32 1.0, %v3409_v10 }
 0x3ba   :  { %3414 = vrcp.f32 %v2263_v11  ;;  %v2264_v14 = vadd.f32 1.0, %v3411_v12 }
 0x3bb   :  { %3416 = vrcp.f32 %v2262_v13 }
 0x3bc   :  { %3418 = vrcp.f32 %v2264_v14 }
 0x3c3   :  { %v3413_v15 = vpop.eup %3412 }
 0x3c4   :  { %v3415_v16 = vpop.eup %3414  ;;  %v2277_v17 = vmul.f32 %v3413_v15, %v2261_v9 }
 0x3c5   :  { %v3417_v18 = vpop.eup %3416  ;;  %v2279_v19 = vmul.f32 %v3415_v16, %v2263_v11 }
 0x3c6   :  { %v3419_v20 = vpop.eup %3418  ;;  %v2285_v21 = vsub.f32 2.0, %v2277_v17  ;;  %v2278_v22 = vmul.f32 %v3417_v18, %v2262_v13 }
 0x3c7   :  { %v2287_v23 = vsub.f32 2.0, %v2279_v19  ;;  %v2280_v24 = vmul.f32 %v3419_v20, %v2264_v14 }
 0x3c8   :  { %v2293_v25 = vmul.f32 %v3413_v15, %v2285_v21  ;;  %v2286_v28 = vsub.f32 2.0, %v2278_v22 }
 0x3c9   :  { %v2295_v29 = vmul.f32 %v3415_v16, %v2287_v23  ;;  %v2288_v30 = vsub.f32 2.0, %v2280_v24 }
 0x3ca   :  { %2301 = vst [vmem:[#allocation9 + $0x20] sm:$0xff] %v2293_v25  ;;  %v2294_v31 = vmul.f32 %v3417_v18, %v2286_v28 }
 0x3cb   :  { %2303 = vst [vmem:[#allocation9 + $0x30] sm:$0xff] %v2295_v29  ;;  %v2296_v32 = vmul.f32 %v3419_v20, %v2288_v30 }
 0x3cc   :  { %2302 = vst [vmem:[#allocation9 + $0x28] sm:$0xff] %v2294_v31 }
 0x3cd   :  { %2304 = vst [vmem:[#allocation9 + $0x38] sm:$0xff] %v2296_v32 }
 0x3ce   :  { %3522 = shalt.err (!%p3519_p8)
}
 0x3cf   :  { %s3523_s15 = scalar_lea.hbm %s3651_s4, 1024 }
 0x3d0   :  { %p3524_p9 = scmp.ne.s32.totalorder %s3651_s4, %s3523_s15  ;;  %p3527_p10 = scmp.lt.u32.totalorder %s3523_s15, %s3651_s4 }
 0x3d2   :  { %p3529_p11 = pnand %p3527_p10, %p3524_p9 }
 0x3d4   :  { %3532 = shalt.err (!%p3529_p11)
}
 0x3d5   :  { %2324 = dma.vmem_to_hbm [thread:$0]  %s2322_s12, 1024, %s3651_s4, [#allocation10]  }
 0x3d6   :  { %3537 = dma.done.wait [#allocation4], 512  }
 0x3d7   :  { %3538 = vsyncadd [#allocation4], 4294966784 }
 0x3d8   :  { %3539 = dma.done.wait [#allocation10], 1024  }
 0x3d9   :  { %3540 = vsyncadd [#allocation10], 4294966272 }
 0x3da   :  { %2331 = vsyncpa [#allocation3], 1 }
 0x3db   :  { %2332 = vsyncpa [#allocation6], 1 }
 0x3dc   :  { %2333 = vsyncpa [#allocation4], 1 }
 0x3dd   :  { %2334 = vsyncpa [#allocation10], 1 }

</bundles_post_ra>
